<compile_context>
chip_gen: v7x
topology: tpu7x:2x2x1
jax: 0.10.0
libtpu: 0.0.40
codegen_flags: <defaults>
</compile_context>

<pallas_src>
import functools
import math

import jax
import jax.numpy as jnp
import numpy as np
from jax.experimental import pallas as pl
from jax.experimental.pallas import tpu as pltpu


_PARAM_ORDER = ("wqkv", "bqkv", "wo_heads", "bo",
                "ln1w", "ln1b", "ln2w", "ln2b",
                "w1", "b1", "w2", "b2")


# ----------------------------------------------------------------------------
# Pallas kernel: one full TransformerBlock for a tile of `block_batch` batch
# elements.
# ----------------------------------------------------------------------------
def transformer_block_kernel(x_ref,
                             wqkv_ref, bqkv_ref,
                             wo_ref, bo_ref,
                             ln1w_ref, ln1b_ref, ln2w_ref, ln2b_ref,
                             w1_ref, b1_ref, w2_ref, b2_ref,
                             out_ref,
                             *, n_heads, head_dim, block_batch, seq_len):
    eps = 1e-5
    H, hd, bt, S = n_heads, head_dim, block_batch, seq_len
    E = H * hd
    G = H * bt                       # merged (head, batch) einsum batch axis
    rows = bt * S

    # bf16 activations at the HBM boundary; flatten the tile to [rows, E]
    # (leading-dim merge only -- the lane axis E stays put and is lane-dense).
    x_bf = x_ref[...].reshape(rows, E)              # bf16 [rows, E]
    x_f32 = x_bf.astype(jnp.float32)

    # Fused q|k|v projection: a single MXU matmul with 3E output lanes.
    qkv = jnp.dot(x_bf, wqkv_ref[...],
                  preferred_element_type=jnp.float32) + bqkv_ref[...]  # [rows, 3E] f32

    # Regroup per head ONCE into head-major [G, S, hd] so the attention matmuls
    # are one batched dot_general each (no per-(b, h) loop of K=hd MXU pushes).
    # The concatenate/reshape touch leading dims only (lane layout unchanged).
    def heads(base):
        chunks = [qkv[:, base + h * hd: base + (h + 1) * hd] for h in range(H)]
        return jnp.concatenate(chunks, axis=0).reshape(G, S, hd).astype(jnp.bfloat16)

    q = heads(0)
    k = heads(E)
    v = heads(2 * E)

    scale = 1.0 / math.sqrt(hd)
    dots = jnp.einsum("gqd,gkd->gqk", q, k,
                      preferred_element_type=jnp.float32) * scale      # [G, S, S] f32

    # NOTE: the reference model applies F.softmax(dot, dim=1), i.e. softmax over
    # the HEAD axis (not the key axis).  Only one [H, bt, S, S] f32 array is
    # live at a time (dots4 dies into e); 1/denom runs on the EUP slot and the
    # probabilities are cast to bf16 once, after combining with inv_denom.
    # TODO(synk): for long S, add a key-block ("arbitrary") grid axis -- the
    # head-axis softmax is local per (q, k) so plain block accumulation works.
    dots4 = dots.reshape(H, bt, S, S)
    m = jnp.max(dots4, axis=0)                                          # [bt, S, S]
    e = jnp.exp(dots4 - m[None])
    inv_denom = pl.reciprocal(jnp.sum(e, axis=0), approx=True)          # [bt, S, S]
    probs = (e * inv_denom[None]).reshape(G, S, S).astype(jnp.bfloat16)

    head_out = jnp.einsum("gqk,gkd->gqd", probs, v,
                          preferred_element_type=jnp.float32)           # [G, S, hd]

    # Output projection: one batched MXU einsum producing per-head partials,
    # followed by a head-axis sum (no per-head accumulate loop, no lane concat).
    wo_g = jnp.broadcast_to(wo_ref[...][:, None], (H, bt, hd, E)).reshape(G, hd, E)
    partial = jnp.einsum("gqd,gde->gqe", head_out.astype(jnp.bfloat16), wo_g,
                         preferred_element_type=jnp.float32)            # [G, S, E]
    attn = jnp.sum(partial.reshape(H, bt, S, E), axis=0).reshape(rows, E)
    attn = attn + bo_ref[...]

    def layer_norm(z, w, b):
        mu = jnp.mean(z, axis=-1, keepdims=True)
        var = jnp.mean((z - mu) ** 2, axis=-1, keepdims=True)
        return (z - mu) * jax.lax.rsqrt(var + eps) * w + b

    # Residual (value == x in the encoder) + LayerNorm1 (dropout == identity).
    x1n = layer_norm(attn + x_f32, ln1w_ref[...], ln1b_ref[...])

    # FFN: Linear -> ReLU -> Linear (bf16 operands, f32 accumulation).
    h1 = jnp.dot(x1n.astype(jnp.bfloat16), w1_ref[...],
                 preferred_element_type=jnp.float32) + b1_ref[...]
    h1 = jnp.maximum(h1, 0.0)
    ff = jnp.dot(h1.astype(jnp.bfloat16), w2_ref[...],
                 preferred_element_type=jnp.float32) + b2_ref[...]

    # Residual + LayerNorm2 (dropout == identity).  E is a multiple of 128 so
    # this store is lane-dense (unmasked vst).
    out2d = layer_norm(ff + x1n, ln2w_ref[...], ln2b_ref[...])
    out_ref[...] = out2d.reshape(bt, S, E).astype(out_ref.dtype)


# ----------------------------------------------------------------------------
# Wrapper: pallas_call with a batch-tile-parallel grid.
# ----------------------------------------------------------------------------
def _vmem_limit_bytes():
    """Per-generation VMEM limit: ~3/4 of physical capacity (v7x: 64 MiB ->
    ~48 MiB, v5e/v6e: 128 MiB -> ~96 MiB), never the full physical size."""
    try:
        cap = int(getattr(pltpu.get_tpu_info(), "vmem_capacity_bytes",
                          128 * 1024 * 1024))
    except Exception:
        cap = 64 * 1024 * 1024   # conservative fallback if the query fails
    return int(min(cap * 3 // 4, 100 * 1024 * 1024))


def transformer_block(x, p, n_heads, head_dim, block_batch=None):
    B, S, E = x.shape
    assert E == n_heads * head_dim

    if block_batch is None:
        # Larger tiles amortize the ~0.35us/step grid overhead and feed the MXU
        # M dim, but keep >= 4 grid steps when possible so each megacore
        # TensorCore still has >= 2 steps to overlap x-tile DMA with compute.
        target_rows = 512
        bt = max(1, min(B, target_rows // max(S, 1)))
        while bt > 1 and B % bt != 0:
            bt -= 1
        while bt > 1 and (B // bt) < 4:
            bt -= 1
            while bt > 1 and B % bt != 0:
                bt -= 1
    else:
        bt = block_batch
    assert B % bt == 0, f"block_batch {bt} must divide batch {B}"

    kern = functools.partial(transformer_block_kernel,
                             n_heads=n_heads, head_dim=head_dim,
                             block_batch=bt, seq_len=S)

    def run(single_buffer_weights):
        def weight_spec(shape):
            n = len(shape)
            idx = lambda b, n=n: (0,) * n      # block index constant across steps
            if single_buffer_weights:
                # Resident weights: single-buffer to halve their VMEM footprint
                # (matters at production sizes on v7x's 64 MiB VMEM).
                return pl.BlockSpec(shape, idx, pipeline_mode=pl.Buffered(1))
            return pl.BlockSpec(shape, idx)

        in_specs = [pl.BlockSpec((bt, S, E), lambda b: (b, 0, 0))] + \
                   [weight_spec(p[name].shape) for name in _PARAM_ORDER]

        return pl.pallas_call(
            kern,
            out_shape=jax.ShapeDtypeStruct((B, S, E), x.dtype),
            grid_spec=pl.GridSpec(
                grid=(B // bt,),
                in_specs=in_specs,
                out_specs=pl.BlockSpec((bt, S, E), lambda b: (b, 0, 0)),
            ),
            compiler_params=pltpu.CompilerParams(
                dimension_semantics=("parallel",),
                vmem_limit_bytes=_vmem_limit_bytes(),
            ),
        )(x, *[p[name] for name in _PARAM_ORDER])

    if hasattr(pl, "Buffered"):
        try:
            return run(True)
        except Exception:
            pass   # older jax without BlockSpec pipeline_mode support
    return run(False)


# ----------------------------------------------------------------------------
# Parameter init (deterministic, synthetic) + glue
# ----------------------------------------------------------------------------
def init_layer(key, E, H, hd, F):
    ks = jax.random.split(key, 12)
    s = 0.1
    wq_h = jax.random.normal(ks[0], (hd, hd), jnp.float32) * s
    wk_h = jax.random.normal(ks[1], (hd, hd), jnp.float32) * s
    wv_h = jax.random.normal(ks[2], (hd, hd), jnp.float32) * s
    bq_h = jax.random.normal(ks[3], (hd,), jnp.float32) * s
    bk_h = jax.random.normal(ks[4], (hd,), jnp.float32) * s
    bv_h = jax.random.normal(ks[5], (hd,), jnp.float32) * s

    eye = jnp.eye(H, dtype=jnp.float32)
    # The PyTorch model applies the SAME (hd x hd) Linear to every head; pack
    # it block-diagonally and fuse q|k|v along the output columns.
    wqkv = jnp.concatenate([jnp.kron(eye, wq_h),
                            jnp.kron(eye, wk_h),
                            jnp.kron(eye, wv_h)], axis=1)            # [E, 3E]
    bqkv = jnp.concatenate([jnp.tile(bq_h, H),
                            jnp.tile(bk_h, H),
                            jnp.tile(bv_h, H)])[None, :]             # [1, 3E] f32

    wo = jax.random.normal(ks[6], (E, E), jnp.float32) * s
    return {
        "wqkv": wqkv.astype(jnp.bfloat16),
        "bqkv": bqkv,                                                # f32
        "wo_heads": wo.reshape(H, hd, E).astype(jnp.bfloat16),       # [H, hd, E]
        "bo": (jax.random.normal(ks[7], (E,), jnp.float32) * s)[None, :],
        "ln1w": jnp.ones((1, E), jnp.float32),
        "ln1b": jnp.zeros((1, E), jnp.float32),
        "ln2w": jnp.ones((1, E), jnp.float32),
        "ln2b": jnp.zeros((1, E), jnp.float32),
        "w1": (jax.random.normal(ks[8], (E, F), jnp.float32) * s).astype(jnp.bfloat16),
        "b1": (jax.random.normal(ks[9], (F,), jnp.float32) * s)[None, :],
        "w2": (jax.random.normal(ks[10], (F, E), jnp.float32) * s).astype(jnp.bfloat16),
        "b2": (jax.random.normal(ks[11], (E,), jnp.float32) * s)[None, :],
    }


def make_positional_encoding(max_len, d_model):
    position = jnp.arange(max_len, dtype=jnp.float32)[:, None]
    div_term = jnp.exp(jnp.arange(0, d_model, 2, dtype=jnp.float32)
                       * (-math.log(10000.0) / d_model))
    ang = position * div_term                        # [L, d/2]
    pe = jnp.stack([jnp.sin(ang), jnp.cos(ang)], axis=-1).reshape(max_len, d_model)
    return pe[None]                                  # [1, L, d]


# Pure-JAX reference of one TransformerBlock (same bf16-stored weights as the
# kernel; f32 activations internally, exact softmax/divide).
def block_reference(x, p, H, hd):
    B, S, E = x.shape
    eps = 1e-5

    wqkv = p["wqkv"].astype(jnp.float32)
    wq, wk, wv = wqkv[:, :E], wqkv[:, E:2 * E], wqkv[:, 2 * E:]
    bqkv = p["bqkv"][0]
    bq, bk, bv = bqkv[:E], bqkv[E:2 * E], bqkv[2 * E:]
    wo = p["wo_heads"].astype(jnp.float32).reshape(E, E)
    w1 = p["w1"].astype(jnp.float32)
    w2 = p["w2"].astype(jnp.float32)

    def ln(z, w, b):
        mu = jnp.mean(z, -1, keepdims=True)
        var = jnp.mean((z - mu) ** 2, -1, keepdims=True)
        return (z - mu) * jax.lax.rsqrt(var + eps) * w + b

    q = (x @ wq + bq).reshape(B, S, H, hd).transpose(0, 2, 1, 3)
    k = (x @ wk + bk).reshape(B, S, H, hd).transpose(0, 2, 1, 3)
    v = (x @ wv + bv).reshape(B, S, H, hd).transpose(0, 2, 1, 3)
    dot = jnp.einsum("bhqd,bhkd->bhqk", q, k) / math.sqrt(hd)
    sc = jax.nn.softmax(dot, axis=1)                 # head-axis softmax, as in torch
    o = jnp.einsum("bhqk,bhkd->bhqd", sc, v).transpose(0, 2, 1, 3).reshape(B, S, E)
    attn = o @ wo + p["bo"][0]
    x1 = ln(attn + x, p["ln1w"][0], p["ln1b"][0])
    ff = jnp.maximum(x1 @ w1 + p["b1"][0], 0.0) @ w2 + p["b2"][0]
    return ln(ff + x1, p["ln2w"][0], p["ln2b"][0])


if __name__ == "__main__":
    # Small but lane-dense shapes: E = 128 keeps every input/output block's
    # minor dim a full lane tile (unmasked vst / dense DMA).
    B, S, V, E, H, L, EXP = 8, 8, 64, 128, 4, 2, 4
    hd = E // H
    F = EXP * E

    key = jax.random.PRNGKey(0)
    keys = jax.random.split(key, 2 + L)
    k_tok, k_emb, k_layers = keys[0], keys[1], keys[2:]

    tokens = jax.random.randint(k_tok, (B, S), 0, V)            # [B, S] int32
    emb_table = jax.random.normal(k_emb, (V, E), jnp.float32)   # nn.Embedding weight
    layers = [init_layer(k, E, H, hd, F) for k in k_layers]

    # Embedding lookup + positional encoding (plain-JAX glue).
    x = emb_table[tokens]                                       # [B, S, E]
    pe = make_positional_encoding(S, E)
    x = x + pe[:, :S]
    # positional-encoding dropout: inference-mode identity.

    # Carry inter-layer activations in bf16 at the pallas_call boundary; the
    # reference rounds through the same bf16 boundary for an apples-to-apples
    # comparison (its internal math stays f32).
    out = x.astype(jnp.bfloat16)
    ref = x.astype(jnp.bfloat16)
    for p in layers:
        out = transformer_block(out, p, H, hd)      # heuristic -> bt=2, grid=(4,)
        ref = block_reference(ref.astype(jnp.float32), p, H, hd).astype(jnp.bfloat16)

    out = jax.block_until_ready(out)
    assert out.shape == (B, S, E)
    out_np = np.asarray(out, dtype=np.float32)
    ref_np = np.asarray(ref, dtype=np.float32)
    max_err = float(np.max(np.abs(out_np - ref_np)))
    # bf16 matmul operands + bf16 layer boundaries + approx reciprocal.
    assert np.allclose(out_np, ref_np, atol=5e-2, rtol=5e-2), f"max err {max_err}"
    print("KERNEL_OK")
</pallas_src>

<mosaic_0001>
module attributes {stable_mosaic.version = 11 : i64} {
  func.func @transformer_block_kernel(%arg0: i32, %arg1: memref<2x8x128xbf16, #tpu.memory_space<vmem>>, %arg2: memref<128x384xbf16, #tpu.memory_space<vmem>>, %arg3: memref<1x384xf32, #tpu.memory_space<vmem>>, %arg4: memref<4x32x128xbf16, #tpu.memory_space<vmem>>, %arg5: memref<1x128xf32, #tpu.memory_space<vmem>>, %arg6: memref<1x128xf32, #tpu.memory_space<vmem>>, %arg7: memref<1x128xf32, #tpu.memory_space<vmem>>, %arg8: memref<1x128xf32, #tpu.memory_space<vmem>>, %arg9: memref<1x128xf32, #tpu.memory_space<vmem>>, %arg10: memref<128x512xbf16, #tpu.memory_space<vmem>>, %arg11: memref<1x512xf32, #tpu.memory_space<vmem>>, %arg12: memref<512x128xbf16, #tpu.memory_space<vmem>>, %arg13: memref<1x128xf32, #tpu.memory_space<vmem>>, %arg14: memref<2x8x128xbf16, #tpu.memory_space<vmem>>) attributes {dimension_semantics = [#tpu.dimension_semantics<parallel>], iteration_bounds = array<i64: 4>, scalar_prefetch = 0 : i64, scratch_operands = 0 : i64, tpu.core_type = #tpu.core_type<tc>, window_params = [{transform_indices = @transform_0, window_bounds = array<i64: 2, 8, 128>}, {pipeline_mode = #tpu.pipeline_mode<synchronous>, transform_indices = @transform_1, window_bounds = array<i64: 128, 384>}, {pipeline_mode = #tpu.pipeline_mode<synchronous>, transform_indices = @transform_2, window_bounds = array<i64: 1, 384>}, {pipeline_mode = #tpu.pipeline_mode<synchronous>, transform_indices = @transform_3, window_bounds = array<i64: 4, 32, 128>}, {pipeline_mode = #tpu.pipeline_mode<synchronous>, transform_indices = @transform_4, window_bounds = array<i64: 1, 128>}, {pipeline_mode = #tpu.pipeline_mode<synchronous>, transform_indices = @transform_5, window_bounds = array<i64: 1, 128>}, {pipeline_mode = #tpu.pipeline_mode<synchronous>, transform_indices = @transform_6, window_bounds = array<i64: 1, 128>}, {pipeline_mode = #tpu.pipeline_mode<synchronous>, transform_indices = @transform_7, window_bounds = array<i64: 1, 128>}, {pipeline_mode = #tpu.pipeline_mode<synchronous>, transform_indices = @transform_8, window_bounds = array<i64: 1, 128>}, {pipeline_mode = #tpu.pipeline_mode<synchronous>, transform_indices = @transform_9, window_bounds = array<i64: 128, 512>}, {pipeline_mode = #tpu.pipeline_mode<synchronous>, transform_indices = @transform_10, window_bounds = array<i64: 1, 512>}, {pipeline_mode = #tpu.pipeline_mode<synchronous>, transform_indices = @transform_11, window_bounds = array<i64: 512, 128>}, {pipeline_mode = #tpu.pipeline_mode<synchronous>, transform_indices = @transform_12, window_bounds = array<i64: 1, 128>}, {transform_indices = @transform_13, window_bounds = array<i64: 2, 8, 128>}]} {
    %c0 = arith.constant 0 : index
    %c0_0 = arith.constant 0 : index
    %c0_1 = arith.constant 0 : index
    %0 = vector.load %arg1[%c0, %c0_0, %c0_1] : memref<2x8x128xbf16, #tpu.memory_space<vmem>>, vector<2x8x128xbf16>
    %1 = vector.shape_cast %0 : vector<2x8x128xbf16> to vector<16x128xbf16>
    %2 = arith.extf %1 : vector<16x128xbf16> to vector<16x128xf32>
    %c0_2 = arith.constant 0 : index
    %c0_3 = arith.constant 0 : index
    %3 = vector.load %arg2[%c0_2, %c0_3] : memref<128x384xbf16, #tpu.memory_space<vmem>>, vector<128x384xbf16>
    %cst = arith.constant dense<0.000000e+00> : vector<16x384xf32>
    %4 = tpu.matmul %1, %3, %cst {dimension_numbers = #tpu.dot_dimension_numbers<[1], [0], [0], [1], [0, 0, 1, 1], [], []>} : vector<16x128xbf16>, vector<128x384xbf16>, vector<16x384xf32> -> vector<16x384xf32>
    %c0_4 = arith.constant 0 : index
    %c0_5 = arith.constant 0 : index
    %5 = vector.load %arg3[%c0_4, %c0_5] : memref<1x384xf32, #tpu.memory_space<vmem>>, vector<1x384xf32>
    %6 = vector.broadcast %5 : vector<1x384xf32> to vector<16x384xf32>
    %7 = arith.addf %4, %6 : vector<16x384xf32>
    %8 = vector.extract_strided_slice %7 {offsets = [0, 0], sizes = [16, 32], strides = [1, 1]} : vector<16x384xf32> to vector<16x32xf32>
    %9 = vector.extract_strided_slice %7 {offsets = [0, 32], sizes = [16, 32], strides = [1, 1]} : vector<16x384xf32> to vector<16x32xf32>
    %10 = vector.extract_strided_slice %7 {offsets = [0, 64], sizes = [16, 32], strides = [1, 1]} : vector<16x384xf32> to vector<16x32xf32>
    %11 = vector.extract_strided_slice %7 {offsets = [0, 96], sizes = [16, 32], strides = [1, 1]} : vector<16x384xf32> to vector<16x32xf32>
    %12 = tpu.concatenate %8, %9, %10, %11 in 0 : vector<16x32xf32>, vector<16x32xf32>, vector<16x32xf32>, vector<16x32xf32> -> vector<64x32xf32>
    %13 = vector.shape_cast %12 : vector<64x32xf32> to vector<8x8x32xf32>
    %14 = arith.truncf %13 : vector<8x8x32xf32> to vector<8x8x32xbf16>
    %15 = vector.extract_strided_slice %7 {offsets = [0, 128], sizes = [16, 32], strides = [1, 1]} : vector<16x384xf32> to vector<16x32xf32>
    %16 = vector.extract_strided_slice %7 {offsets = [0, 160], sizes = [16, 32], strides = [1, 1]} : vector<16x384xf32> to vector<16x32xf32>
    %17 = vector.extract_strided_slice %7 {offsets = [0, 192], sizes = [16, 32], strides = [1, 1]} : vector<16x384xf32> to vector<16x32xf32>
    %18 = vector.extract_strided_slice %7 {offsets = [0, 224], sizes = [16, 32], strides = [1, 1]} : vector<16x384xf32> to vector<16x32xf32>
    %19 = tpu.concatenate %15, %16, %17, %18 in 0 : vector<16x32xf32>, vector<16x32xf32>, vector<16x32xf32>, vector<16x32xf32> -> vector<64x32xf32>
    %20 = vector.shape_cast %19 : vector<64x32xf32> to vector<8x8x32xf32>
    %21 = arith.truncf %20 : vector<8x8x32xf32> to vector<8x8x32xbf16>
    %22 = vector.extract_strided_slice %7 {offsets = [0, 256], sizes = [16, 32], strides = [1, 1]} : vector<16x384xf32> to vector<16x32xf32>
    %23 = vector.extract_strided_slice %7 {offsets = [0, 288], sizes = [16, 32], strides = [1, 1]} : vector<16x384xf32> to vector<16x32xf32>
    %24 = vector.extract_strided_slice %7 {offsets = [0, 320], sizes = [16, 32], strides = [1, 1]} : vector<16x384xf32> to vector<16x32xf32>
    %25 = vector.extract_strided_slice %7 {offsets = [0, 352], sizes = [16, 32], strides = [1, 1]} : vector<16x384xf32> to vector<16x32xf32>
    %26 = tpu.concatenate %22, %23, %24, %25 in 0 : vector<16x32xf32>, vector<16x32xf32>, vector<16x32xf32>, vector<16x32xf32> -> vector<64x32xf32>
    %27 = vector.shape_cast %26 : vector<64x32xf32> to vector<8x8x32xf32>
    %28 = arith.truncf %27 : vector<8x8x32xf32> to vector<8x8x32xbf16>
    "tpu.trace_start"() <{level = 10 : i32, message = "gqd,gkd->gqk"}> : () -> ()
    %cst_6 = arith.constant dense<0.000000e+00> : vector<8x8x8xf32>
    %29 = tpu.matmul %14, %21, %cst_6 {dimension_numbers = #tpu.dot_dimension_numbers<[2], [2], [1], [1], [0, 0, 0, 1, 1, 1], [0], [0]>} : vector<8x8x32xbf16>, vector<8x8x32xbf16>, vector<8x8x8xf32> -> vector<8x8x8xf32>
    "tpu.trace_stop"() : () -> ()
    %cst_7 = arith.constant 0.176776692 : f32
    %30 = vector.broadcast %cst_7 : f32 to vector<8x8x8xf32>
    %31 = arith.mulf %29, %30 : vector<8x8x8xf32>
    %32 = vector.shape_cast %31 : vector<8x8x8xf32> to vector<4x2x8x8xf32>
    %cst_8 = arith.constant dense<0xFF800000> : vector<2x8x8xf32>
    %33 = vector.multi_reduction <maximumf>, %32, %cst_8 [0] : vector<4x2x8x8xf32> to vector<2x8x8xf32>
    %34 = vector.shape_cast %33 : vector<2x8x8xf32> to vector<1x2x8x8xf32>
    %35 = vector.broadcast %34 : vector<1x2x8x8xf32> to vector<4x2x8x8xf32>
    %36 = arith.subf %32, %35 : vector<4x2x8x8xf32>
    %37 = math.exp %36 : vector<4x2x8x8xf32>
    %cst_9 = arith.constant dense<0.000000e+00> : vector<2x8x8xf32>
    %38 = vector.multi_reduction <add>, %37, %cst_9 [0] : vector<4x2x8x8xf32> to vector<2x8x8xf32>
    %39 = tpu.reciprocal %38 {approx = true} : vector<2x8x8xf32> -> vector<2x8x8xf32>
    %40 = vector.shape_cast %39 : vector<2x8x8xf32> to vector<1x2x8x8xf32>
    %41 = vector.broadcast %40 : vector<1x2x8x8xf32> to vector<4x2x8x8xf32>
    %42 = arith.mulf %37, %41 : vector<4x2x8x8xf32>
    %43 = vector.shape_cast %42 : vector<4x2x8x8xf32> to vector<8x8x8xf32>
    %44 = arith.truncf %43 : vector<8x8x8xf32> to vector<8x8x8xbf16>
    "tpu.trace_start"() <{level = 10 : i32, message = "gqk,gkd->gqd"}> : () -> ()
    %cst_10 = arith.constant dense<0.000000e+00> : vector<8x8x32xf32>
    %45 = tpu.matmul %44, %28, %cst_10 {dimension_numbers = #tpu.dot_dimension_numbers<[2], [1], [1], [2], [0, 0, 0, 1, 1, 2], [0], [0]>} : vector<8x8x8xbf16>, vector<8x8x32xbf16>, vector<8x8x32xf32> -> vector<8x8x32xf32>
    "tpu.trace_stop"() : () -> ()
    %c0_11 = arith.constant 0 : index
    %c0_12 = arith.constant 0 : index
    %c0_13 = arith.constant 0 : index
    %46 = vector.load %arg4[%c0_11, %c0_12, %c0_13] : memref<4x32x128xbf16, #tpu.memory_space<vmem>>, vector<4x32x128xbf16>
    %47 = vector.shape_cast %46 : vector<4x32x128xbf16> to vector<4x1x32x128xbf16>
    %48 = vector.shape_cast %47 : vector<4x1x32x128xbf16> to vector<4x1x32x128xbf16>
    %49 = vector.broadcast %48 : vector<4x1x32x128xbf16> to vector<4x2x32x128xbf16>
    %50 = vector.shape_cast %49 : vector<4x2x32x128xbf16> to vector<8x32x128xbf16>
    %51 = arith.truncf %45 : vector<8x8x32xf32> to vector<8x8x32xbf16>
    "tpu.trace_start"() <{level = 10 : i32, message = "gqd,gde->gqe"}> : () -> ()
    %cst_14 = arith.constant dense<0.000000e+00> : vector<8x8x128xf32>
    %52 = tpu.matmul %51, %50, %cst_14 {dimension_numbers = #tpu.dot_dimension_numbers<[2], [1], [1], [2], [0, 0, 0, 1, 1, 2], [0], [0]>} : vector<8x8x32xbf16>, vector<8x32x128xbf16>, vector<8x8x128xf32> -> vector<8x8x128xf32>
    "tpu.trace_stop"() : () -> ()
    %53 = vector.shape_cast %52 : vector<8x8x128xf32> to vector<4x2x8x128xf32>
    %cst_15 = arith.constant dense<0.000000e+00> : vector<2x8x128xf32>
    %54 = vector.multi_reduction <add>, %53, %cst_15 [0] : vector<4x2x8x128xf32> to vector<2x8x128xf32>
    %55 = vector.shape_cast %54 : vector<2x8x128xf32> to vector<16x128xf32>
    %c0_16 = arith.constant 0 : index
    %c0_17 = arith.constant 0 : index
    %56 = vector.load %arg5[%c0_16, %c0_17] : memref<1x128xf32, #tpu.memory_space<vmem>>, vector<1x128xf32>
    %57 = vector.broadcast %56 : vector<1x128xf32> to vector<16x128xf32>
    %58 = arith.addf %55, %57 : vector<16x128xf32>
    %59 = arith.addf %58, %2 : vector<16x128xf32>
    %c0_18 = arith.constant 0 : index
    %c0_19 = arith.constant 0 : index
    %60 = vector.load %arg6[%c0_18, %c0_19] : memref<1x128xf32, #tpu.memory_space<vmem>>, vector<1x128xf32>
    %c0_20 = arith.constant 0 : index
    %c0_21 = arith.constant 0 : index
    %61 = vector.load %arg7[%c0_20, %c0_21] : memref<1x128xf32, #tpu.memory_space<vmem>>, vector<1x128xf32>
    %cst_22 = arith.constant dense<0.000000e+00> : vector<16xf32>
    %62 = vector.multi_reduction <add>, %59, %cst_22 [1] : vector<16x128xf32> to vector<16xf32>
    %63 = vector.shape_cast %62 : vector<16xf32> to vector<16x1xf32>
    %cst_23 = arith.constant 1.280000e+02 : f32
    %64 = vector.broadcast %cst_23 : f32 to vector<16x1xf32>
    %65 = arith.divf %63, %64 : vector<16x1xf32>
    %66 = vector.broadcast %65 : vector<16x1xf32> to vector<16x128xf32>
    %67 = arith.subf %59, %66 : vector<16x128xf32>
    %68 = arith.mulf %67, %67 : vector<16x128xf32>
    %cst_24 = arith.constant dense<0.000000e+00> : vector<16xf32>
    %69 = vector.multi_reduction <add>, %68, %cst_24 [1] : vector<16x128xf32> to vector<16xf32>
    %70 = vector.shape_cast %69 : vector<16xf32> to vector<16x1xf32>
    %cst_25 = arith.constant 1.280000e+02 : f32
    %71 = vector.broadcast %cst_25 : f32 to vector<16x1xf32>
    %72 = arith.divf %70, %71 : vector<16x1xf32>
    %73 = vector.broadcast %65 : vector<16x1xf32> to vector<16x128xf32>
    %74 = arith.subf %59, %73 : vector<16x128xf32>
    %cst_26 = arith.constant 9.99999974E-6 : f32
    %75 = vector.broadcast %cst_26 : f32 to vector<16x1xf32>
    %76 = arith.addf %72, %75 : vector<16x1xf32>
    %77 = math.rsqrt %76 : vector<16x1xf32>
    %78 = vector.broadcast %77 : vector<16x1xf32> to vector<16x128xf32>
    %79 = arith.mulf %74, %78 : vector<16x128xf32>
    %80 = vector.broadcast %60 : vector<1x128xf32> to vector<16x128xf32>
    %81 = arith.mulf %79, %80 : vector<16x128xf32>
    %82 = vector.broadcast %61 : vector<1x128xf32> to vector<16x128xf32>
    %83 = arith.addf %81, %82 : vector<16x128xf32>
    %84 = arith.truncf %83 : vector<16x128xf32> to vector<16x128xbf16>
    %c0_27 = arith.constant 0 : index
    %c0_28 = arith.constant 0 : index
    %85 = vector.load %arg10[%c0_27, %c0_28] : memref<128x512xbf16, #tpu.memory_space<vmem>>, vector<128x512xbf16>
    %cst_29 = arith.constant dense<0.000000e+00> : vector<16x512xf32>
    %86 = tpu.matmul %84, %85, %cst_29 {dimension_numbers = #tpu.dot_dimension_numbers<[1], [0], [0], [1], [0, 0, 1, 1], [], []>} : vector<16x128xbf16>, vector<128x512xbf16>, vector<16x512xf32> -> vector<16x512xf32>
    %c0_30 = arith.constant 0 : index
    %c0_31 = arith.constant 0 : index
    %87 = vector.load %arg11[%c0_30, %c0_31] : memref<1x512xf32, #tpu.memory_space<vmem>>, vector<1x512xf32>
    %88 = vector.broadcast %87 : vector<1x512xf32> to vector<16x512xf32>
    %89 = arith.addf %86, %88 : vector<16x512xf32>
    %cst_32 = arith.constant 0.000000e+00 : f32
    %90 = vector.broadcast %cst_32 : f32 to vector<16x512xf32>
    %91 = arith.maximumf %89, %90 : vector<16x512xf32>
    %92 = arith.truncf %91 : vector<16x512xf32> to vector<16x512xbf16>
    %c0_33 = arith.constant 0 : index
    %c0_34 = arith.constant 0 : index
    %93 = vector.load %arg12[%c0_33, %c0_34] : memref<512x128xbf16, #tpu.memory_space<vmem>>, vector<512x128xbf16>
    %cst_35 = arith.constant dense<0.000000e+00> : vector<16x128xf32>
    %94 = tpu.matmul %92, %93, %cst_35 {dimension_numbers = #tpu.dot_dimension_numbers<[1], [0], [0], [1], [0, 0, 1, 1], [], []>} : vector<16x512xbf16>, vector<512x128xbf16>, vector<16x128xf32> -> vector<16x128xf32>
    %c0_36 = arith.constant 0 : index
    %c0_37 = arith.constant 0 : index
    %95 = vector.load %arg13[%c0_36, %c0_37] : memref<1x128xf32, #tpu.memory_space<vmem>>, vector<1x128xf32>
    %96 = vector.broadcast %95 : vector<1x128xf32> to vector<16x128xf32>
    %97 = arith.addf %94, %96 : vector<16x128xf32>
    %98 = arith.addf %97, %83 : vector<16x128xf32>
    %c0_38 = arith.constant 0 : index
    %c0_39 = arith.constant 0 : index
    %99 = vector.load %arg8[%c0_38, %c0_39] : memref<1x128xf32, #tpu.memory_space<vmem>>, vector<1x128xf32>
    %c0_40 = arith.constant 0 : index
    %c0_41 = arith.constant 0 : index
    %100 = vector.load %arg9[%c0_40, %c0_41] : memref<1x128xf32, #tpu.memory_space<vmem>>, vector<1x128xf32>
    %cst_42 = arith.constant dense<0.000000e+00> : vector<16xf32>
    %101 = vector.multi_reduction <add>, %98, %cst_42 [1] : vector<16x128xf32> to vector<16xf32>
    %102 = vector.shape_cast %101 : vector<16xf32> to vector<16x1xf32>
    %cst_43 = arith.constant 1.280000e+02 : f32
    %103 = vector.broadcast %cst_43 : f32 to vector<16x1xf32>
    %104 = arith.divf %102, %103 : vector<16x1xf32>
    %105 = vector.broadcast %104 : vector<16x1xf32> to vector<16x128xf32>
    %106 = arith.subf %98, %105 : vector<16x128xf32>
    %107 = arith.mulf %106, %106 : vector<16x128xf32>
    %cst_44 = arith.constant dense<0.000000e+00> : vector<16xf32>
    %108 = vector.multi_reduction <add>, %107, %cst_44 [1] : vector<16x128xf32> to vector<16xf32>
    %109 = vector.shape_cast %108 : vector<16xf32> to vector<16x1xf32>
    %cst_45 = arith.constant 1.280000e+02 : f32
    %110 = vector.broadcast %cst_45 : f32 to vector<16x1xf32>
    %111 = arith.divf %109, %110 : vector<16x1xf32>
    %112 = vector.broadcast %104 : vector<16x1xf32> to vector<16x128xf32>
    %113 = arith.subf %98, %112 : vector<16x128xf32>
    %cst_46 = arith.constant 9.99999974E-6 : f32
    %114 = vector.broadcast %cst_46 : f32 to vector<16x1xf32>
    %115 = arith.addf %111, %114 : vector<16x1xf32>
    %116 = math.rsqrt %115 : vector<16x1xf32>
    %117 = vector.broadcast %116 : vector<16x1xf32> to vector<16x128xf32>
    %118 = arith.mulf %113, %117 : vector<16x128xf32>
    %119 = vector.broadcast %99 : vector<1x128xf32> to vector<16x128xf32>
    %120 = arith.mulf %118, %119 : vector<16x128xf32>
    %121 = vector.broadcast %100 : vector<1x128xf32> to vector<16x128xf32>
    %122 = arith.addf %120, %121 : vector<16x128xf32>
    %123 = vector.shape_cast %122 : vector<16x128xf32> to vector<2x8x128xf32>
    %124 = arith.truncf %123 : vector<2x8x128xf32> to vector<2x8x128xbf16>
    %c0_47 = arith.constant 0 : index
    %c0_48 = arith.constant 0 : index
    %c0_49 = arith.constant 0 : index
    %125 = vector.load %arg14[%c0_47, %c0_48, %c0_49] : memref<2x8x128xbf16, #tpu.memory_space<vmem>>, vector<2x8x128xbf16>
    tpu.vector_store %arg14[%c0_47, %c0_48, %c0_49], %124 {strides = array<i32>} : memref<2x8x128xbf16, #tpu.memory_space<vmem>>, vector<2x8x128xbf16>,
    return
  }
  func.func @transform_0(%arg0: i32) -> (i32, i32, i32) {
    %c0_i32 = arith.constant 0 : i32
    %c0_i32_0 = arith.constant 0 : i32
    %c0_i32_1 = arith.constant 0 : i32
    return %arg0, %c0_i32, %c0_i32_0 : i32, i32, i32
  }
  func.func @transform_1(%arg0: i32) -> (i32, i32) {
    %c0_i32 = arith.constant 0 : i32
    %c0_i32_0 = arith.constant 0 : i32
    %c0_i32_1 = arith.constant 0 : i32
    return %c0_i32, %c0_i32_0 : i32, i32
  }
  func.func @transform_2(%arg0: i32) -> (i32, i32) {
    %c0_i32 = arith.constant 0 : i32
    %c0_i32_0 = arith.constant 0 : i32
    %c0_i32_1 = arith.constant 0 : i32
    return %c0_i32, %c0_i32_0 : i32, i32
  }
  func.func @transform_3(%arg0: i32) -> (i32, i32, i32) {
    %c0_i32 = arith.constant 0 : i32
    %c0_i32_0 = arith.constant 0 : i32
    %c0_i32_1 = arith.constant 0 : i32
    %c0_i32_2 = arith.constant 0 : i32
    return %c0_i32, %c0_i32_0, %c0_i32_1 : i32, i32, i32
  }
  func.func @transform_4(%arg0: i32) -> (i32, i32) {
    %c0_i32 = arith.constant 0 : i32
    %c0_i32_0 = arith.constant 0 : i32
    %c0_i32_1 = arith.constant 0 : i32
    return %c0_i32, %c0_i32_0 : i32, i32
  }
  func.func @transform_5(%arg0: i32) -> (i32, i32) {
    %c0_i32 = arith.constant 0 : i32
    %c0_i32_0 = arith.constant 0 : i32
    %c0_i32_1 = arith.constant 0 : i32
    return %c0_i32, %c0_i32_0 : i32, i32
  }
  func.func @transform_6(%arg0: i32) -> (i32, i32) {
    %c0_i32 = arith.constant 0 : i32
    %c0_i32_0 = arith.constant 0 : i32
    %c0_i32_1 = arith.constant 0 : i32
    return %c0_i32, %c0_i32_0 : i32, i32
  }
  func.func @transform_7(%arg0: i32) -> (i32, i32) {
    %c0_i32 = arith.constant 0 : i32
    %c0_i32_0 = arith.constant 0 : i32
    %c0_i32_1 = arith.constant 0 : i32
    return %c0_i32, %c0_i32_0 : i32, i32
  }
  func.func @transform_8(%arg0: i32) -> (i32, i32) {
    %c0_i32 = arith.constant 0 : i32
    %c0_i32_0 = arith.constant 0 : i32
    %c0_i32_1 = arith.constant 0 : i32
    return %c0_i32, %c0_i32_0 : i32, i32
  }
  func.func @transform_9(%arg0: i32) -> (i32, i32) {
    %c0_i32 = arith.constant 0 : i32
    %c0_i32_0 = arith.constant 0 : i32
    %c0_i32_1 = arith.constant 0 : i32
    return %c0_i32, %c0_i32_0 : i32, i32
  }
  func.func @transform_10(%arg0: i32) -> (i32, i32) {
    %c0_i32 = arith.constant 0 : i32
    %c0_i32_0 = arith.constant 0 : i32
    %c0_i32_1 = arith.constant 0 : i32
    return %c0_i32, %c0_i32_0 : i32, i32
  }
  func.func @transform_11(%arg0: i32) -> (i32, i32) {
    %c0_i32 = arith.constant 0 : i32
    %c0_i32_0 = arith.constant 0 : i32
    %c0_i32_1 = arith.constant 0 : i32
    return %c0_i32, %c0_i32_0 : i32, i32
  }
  func.func @transform_12(%arg0: i32) -> (i32, i32) {
    %c0_i32 = arith.constant 0 : i32
    %c0_i32_0 = arith.constant 0 : i32
    %c0_i32_1 = arith.constant 0 : i32
    return %c0_i32, %c0_i32_0 : i32, i32
  }
  func.func @transform_13(%arg0: i32) -> (i32, i32, i32) {
    %c0_i32 = arith.constant 0 : i32
    %c0_i32_0 = arith.constant 0 : i32
    %c0_i32_1 = arith.constant 0 : i32
    return %arg0, %c0_i32, %c0_i32_0 : i32, i32, i32
  }
}

module attributes {stable_mosaic.version = 11 : i64} {
  func.func @transformer_block_kernel(%arg0: i32, %arg1: memref<2x8x128xbf16, #tpu.memory_space<vmem>>, %arg2: memref<128x384xbf16, #tpu.memory_space<vmem>>, %arg3: memref<1x384xf32, #tpu.memory_space<vmem>>, %arg4: memref<4x32x128xbf16, #tpu.memory_space<vmem>>, %arg5: memref<1x128xf32, #tpu.memory_space<vmem>>, %arg6: memref<1x128xf32, #tpu.memory_space<vmem>>, %arg7: memref<1x128xf32, #tpu.memory_space<vmem>>, %arg8: memref<1x128xf32, #tpu.memory_space<vmem>>, %arg9: memref<1x128xf32, #tpu.memory_space<vmem>>, %arg10: memref<128x512xbf16, #tpu.memory_space<vmem>>, %arg11: memref<1x512xf32, #tpu.memory_space<vmem>>, %arg12: memref<512x128xbf16, #tpu.memory_space<vmem>>, %arg13: memref<1x128xf32, #tpu.memory_space<vmem>>, %arg14: memref<2x8x128xbf16, #tpu.memory_space<vmem>>) attributes {dimension_semantics = [#tpu.dimension_semantics<parallel>], iteration_bounds = array<i64: 4>, scalar_prefetch = 0 : i64, scratch_operands = 0 : i64, tpu.core_type = #tpu.core_type<tc>, window_params = [{transform_indices = @transform_0, window_bounds = array<i64: 2, 8, 128>}, {pipeline_mode = #tpu.pipeline_mode<synchronous>, transform_indices = @transform_1, window_bounds = array<i64: 128, 384>}, {pipeline_mode = #tpu.pipeline_mode<synchronous>, transform_indices = @transform_2, window_bounds = array<i64: 1, 384>}, {pipeline_mode = #tpu.pipeline_mode<synchronous>, transform_indices = @transform_3, window_bounds = array<i64: 4, 32, 128>}, {pipeline_mode = #tpu.pipeline_mode<synchronous>, transform_indices = @transform_4, window_bounds = array<i64: 1, 128>}, {pipeline_mode = #tpu.pipeline_mode<synchronous>, transform_indices = @transform_5, window_bounds = array<i64: 1, 128>}, {pipeline_mode = #tpu.pipeline_mode<synchronous>, transform_indices = @transform_6, window_bounds = array<i64: 1, 128>}, {pipeline_mode = #tpu.pipeline_mode<synchronous>, transform_indices = @transform_7, window_bounds = array<i64: 1, 128>}, {pipeline_mode = #tpu.pipeline_mode<synchronous>, transform_indices = @transform_8, window_bounds = array<i64: 1, 128>}, {pipeline_mode = #tpu.pipeline_mode<synchronous>, transform_indices = @transform_9, window_bounds = array<i64: 128, 512>}, {pipeline_mode = #tpu.pipeline_mode<synchronous>, transform_indices = @transform_10, window_bounds = array<i64: 1, 512>}, {pipeline_mode = #tpu.pipeline_mode<synchronous>, transform_indices = @transform_11, window_bounds = array<i64: 512, 128>}, {pipeline_mode = #tpu.pipeline_mode<synchronous>, transform_indices = @transform_12, window_bounds = array<i64: 1, 128>}, {transform_indices = @transform_13, window_bounds = array<i64: 2, 8, 128>}]} {
    %c0 = arith.constant 0 : index
    %c0_0 = arith.constant 0 : index
    %c0_1 = arith.constant 0 : index
    %0 = vector.load %arg1[%c0, %c0_0, %c0_1] : memref<2x8x128xbf16, #tpu.memory_space<vmem>>, vector<2x8x128xbf16>
    %1 = vector.shape_cast %0 : vector<2x8x128xbf16> to vector<16x128xbf16>
    %2 = arith.extf %1 : vector<16x128xbf16> to vector<16x128xf32>
    %c0_2 = arith.constant 0 : index
    %c0_3 = arith.constant 0 : index
    %3 = vector.load %arg2[%c0_2, %c0_3] : memref<128x384xbf16, #tpu.memory_space<vmem>>, vector<128x384xbf16>
    %cst = arith.constant dense<0.000000e+00> : vector<16x384xf32>
    %4 = tpu.matmul %1, %3, %cst {dimension_numbers = #tpu.dot_dimension_numbers<[1], [0], [0], [1], [0, 0, 1, 1], [], []>} : vector<16x128xbf16>, vector<128x384xbf16>, vector<16x384xf32> -> vector<16x384xf32>
    %c0_4 = arith.constant 0 : index
    %c0_5 = arith.constant 0 : index
    %5 = vector.load %arg3[%c0_4, %c0_5] : memref<1x384xf32, #tpu.memory_space<vmem>>, vector<1x384xf32>
    %6 = vector.broadcast %5 : vector<1x384xf32> to vector<16x384xf32>
    %7 = arith.addf %4, %6 : vector<16x384xf32>
    %8 = vector.extract_strided_slice %7 {offsets = [0, 0], sizes = [16, 32], strides = [1, 1]} : vector<16x384xf32> to vector<16x32xf32>
    %9 = vector.extract_strided_slice %7 {offsets = [0, 32], sizes = [16, 32], strides = [1, 1]} : vector<16x384xf32> to vector<16x32xf32>
    %10 = vector.extract_strided_slice %7 {offsets = [0, 64], sizes = [16, 32], strides = [1, 1]} : vector<16x384xf32> to vector<16x32xf32>
    %11 = vector.extract_strided_slice %7 {offsets = [0, 96], sizes = [16, 32], strides = [1, 1]} : vector<16x384xf32> to vector<16x32xf32>
    %12 = tpu.concatenate %8, %9, %10, %11 in 0 : vector<16x32xf32>, vector<16x32xf32>, vector<16x32xf32>, vector<16x32xf32> -> vector<64x32xf32>
    %13 = vector.shape_cast %12 : vector<64x32xf32> to vector<8x8x32xf32>
    %14 = arith.truncf %13 : vector<8x8x32xf32> to vector<8x8x32xbf16>
    %15 = vector.extract_strided_slice %7 {offsets = [0, 128], sizes = [16, 32], strides = [1, 1]} : vector<16x384xf32> to vector<16x32xf32>
    %16 = vector.extract_strided_slice %7 {offsets = [0, 160], sizes = [16, 32], strides = [1, 1]} : vector<16x384xf32> to vector<16x32xf32>
    %17 = vector.extract_strided_slice %7 {offsets = [0, 192], sizes = [16, 32], strides = [1, 1]} : vector<16x384xf32> to vector<16x32xf32>
    %18 = vector.extract_strided_slice %7 {offsets = [0, 224], sizes = [16, 32], strides = [1, 1]} : vector<16x384xf32> to vector<16x32xf32>
    %19 = tpu.concatenate %15, %16, %17, %18 in 0 : vector<16x32xf32>, vector<16x32xf32>, vector<16x32xf32>, vector<16x32xf32> -> vector<64x32xf32>
    %20 = vector.shape_cast %19 : vector<64x32xf32> to vector<8x8x32xf32>
    %21 = arith.truncf %20 : vector<8x8x32xf32> to vector<8x8x32xbf16>
    %22 = vector.extract_strided_slice %7 {offsets = [0, 256], sizes = [16, 32], strides = [1, 1]} : vector<16x384xf32> to vector<16x32xf32>
    %23 = vector.extract_strided_slice %7 {offsets = [0, 288], sizes = [16, 32], strides = [1, 1]} : vector<16x384xf32> to vector<16x32xf32>
    %24 = vector.extract_strided_slice %7 {offsets = [0, 320], sizes = [16, 32], strides = [1, 1]} : vector<16x384xf32> to vector<16x32xf32>
    %25 = vector.extract_strided_slice %7 {offsets = [0, 352], sizes = [16, 32], strides = [1, 1]} : vector<16x384xf32> to vector<16x32xf32>
    %26 = tpu.concatenate %22, %23, %24, %25 in 0 : vector<16x32xf32>, vector<16x32xf32>, vector<16x32xf32>, vector<16x32xf32> -> vector<64x32xf32>
    %27 = vector.shape_cast %26 : vector<64x32xf32> to vector<8x8x32xf32>
    %28 = arith.truncf %27 : vector<8x8x32xf32> to vector<8x8x32xbf16>
    "tpu.trace_start"() <{level = 10 : i32, message = "gqd,gkd->gqk"}> : () -> ()
    %cst_6 = arith.constant dense<0.000000e+00> : vector<8x8x8xf32>
    %29 = tpu.matmul %14, %21, %cst_6 {dimension_numbers = #tpu.dot_dimension_numbers<[2], [2], [1], [1], [0, 0, 0, 1, 1, 1], [0], [0]>} : vector<8x8x32xbf16>, vector<8x8x32xbf16>, vector<8x8x8xf32> -> vector<8x8x8xf32>
    "tpu.trace_stop"() : () -> ()
    %cst_7 = arith.constant 0.176776692 : f32
    %30 = vector.broadcast %cst_7 : f32 to vector<8x8x8xf32>
    %31 = arith.mulf %29, %30 : vector<8x8x8xf32>
    %32 = vector.shape_cast %31 : vector<8x8x8xf32> to vector<4x2x8x8xf32>
    %cst_8 = arith.constant dense<0xFF800000> : vector<2x8x8xf32>
    %33 = vector.multi_reduction <maximumf>, %32, %cst_8 [0] : vector<4x2x8x8xf32> to vector<2x8x8xf32>
    %34 = vector.shape_cast %33 : vector<2x8x8xf32> to vector<1x2x8x8xf32>
    %35 = vector.broadcast %34 : vector<1x2x8x8xf32> to vector<4x2x8x8xf32>
    %36 = arith.subf %32, %35 : vector<4x2x8x8xf32>
    %37 = math.exp %36 : vector<4x2x8x8xf32>
    %cst_9 = arith.constant dense<0.000000e+00> : vector<2x8x8xf32>
    %38 = vector.multi_reduction <add>, %37, %cst_9 [0] : vector<4x2x8x8xf32> to vector<2x8x8xf32>
    %39 = tpu.reciprocal %38 {approx = true} : vector<2x8x8xf32> -> vector<2x8x8xf32>
    %40 = vector.shape_cast %39 : vector<2x8x8xf32> to vector<1x2x8x8xf32>
    %41 = vector.broadcast %40 : vector<1x2x8x8xf32> to vector<4x2x8x8xf32>
    %42 = arith.mulf %37, %41 : vector<4x2x8x8xf32>
    %43 = vector.shape_cast %42 : vector<4x2x8x8xf32> to vector<8x8x8xf32>
    %44 = arith.truncf %43 : vector<8x8x8xf32> to vector<8x8x8xbf16>
    "tpu.trace_start"() <{level = 10 : i32, message = "gqk,gkd->gqd"}> : () -> ()
    %cst_10 = arith.constant dense<0.000000e+00> : vector<8x8x32xf32>
    %45 = tpu.matmul %44, %28, %cst_10 {dimension_numbers = #tpu.dot_dimension_numbers<[2], [1], [1], [2], [0, 0, 0, 1, 1, 2], [0], [0]>} : vector<8x8x8xbf16>, vector<8x8x32xbf16>, vector<8x8x32xf32> -> vector<8x8x32xf32>
    "tpu.trace_stop"() : () -> ()
    %c0_11 = arith.constant 0 : index
    %c0_12 = arith.constant 0 : index
    %c0_13 = arith.constant 0 : index
    %46 = vector.load %arg4[%c0_11, %c0_12, %c0_13] : memref<4x32x128xbf16, #tpu.memory_space<vmem>>, vector<4x32x128xbf16>
    %47 = vector.shape_cast %46 : vector<4x32x128xbf16> to vector<4x1x32x128xbf16>
    %48 = vector.shape_cast %47 : vector<4x1x32x128xbf16> to vector<4x1x32x128xbf16>
    %49 = vector.broadcast %48 : vector<4x1x32x128xbf16> to vector<4x2x32x128xbf16>
    %50 = vector.shape_cast %49 : vector<4x2x32x128xbf16> to vector<8x32x128xbf16>
    %51 = arith.truncf %45 : vector<8x8x32xf32> to vector<8x8x32xbf16>
    "tpu.trace_start"() <{level = 10 : i32, message = "gqd,gde->gqe"}> : () -> ()
    %cst_14 = arith.constant dense<0.000000e+00> : vector<8x8x128xf32>
    %52 = tpu.matmul %51, %50, %cst_14 {dimension_numbers = #tpu.dot_dimension_numbers<[2], [1], [1], [2], [0, 0, 0, 1, 1, 2], [0], [0]>} : vector<8x8x32xbf16>, vector<8x32x128xbf16>, vector<8x8x128xf32> -> vector<8x8x128xf32>
    "tpu.trace_stop"() : () -> ()
    %53 = vector.shape_cast %52 : vector<8x8x128xf32> to vector<4x2x8x128xf32>
    %cst_15 = arith.constant dense<0.000000e+00> : vector<2x8x128xf32>
    %54 = vector.multi_reduction <add>, %53, %cst_15 [0] : vector<4x2x8x128xf32> to vector<2x8x128xf32>
    %55 = vector.shape_cast %54 : vector<2x8x128xf32> to vector<16x128xf32>
    %c0_16 = arith.constant 0 : index
    %c0_17 = arith.constant 0 : index
    %56 = vector.load %arg5[%c0_16, %c0_17] : memref<1x128xf32, #tpu.memory_space<vmem>>, vector<1x128xf32>
    %57 = vector.broadcast %56 : vector<1x128xf32> to vector<16x128xf32>
    %58 = arith.addf %55, %57 : vector<16x128xf32>
    %59 = arith.addf %58, %2 : vector<16x128xf32>
    %c0_18 = arith.constant 0 : index
    %c0_19 = arith.constant 0 : index
    %60 = vector.load %arg6[%c0_18, %c0_19] : memref<1x128xf32, #tpu.memory_space<vmem>>, vector<1x128xf32>
    %c0_20 = arith.constant 0 : index
    %c0_21 = arith.constant 0 : index
    %61 = vector.load %arg7[%c0_20, %c0_21] : memref<1x128xf32, #tpu.memory_space<vmem>>, vector<1x128xf32>
    %cst_22 = arith.constant dense<0.000000e+00> : vector<16xf32>
    %62 = vector.multi_reduction <add>, %59, %cst_22 [1] : vector<16x128xf32> to vector<16xf32>
    %63 = vector.shape_cast %62 : vector<16xf32> to vector<16x1xf32>
    %cst_23 = arith.constant 1.280000e+02 : f32
    %64 = vector.broadcast %cst_23 : f32 to vector<16x1xf32>
    %65 = arith.divf %63, %64 : vector<16x1xf32>
    %66 = vector.broadcast %65 : vector<16x1xf32> to vector<16x128xf32>
    %67 = arith.subf %59, %66 : vector<16x128xf32>
    %68 = arith.mulf %67, %67 : vector<16x128xf32>
    %cst_24 = arith.constant dense<0.000000e+00> : vector<16xf32>
    %69 = vector.multi_reduction <add>, %68, %cst_24 [1] : vector<16x128xf32> to vector<16xf32>
    %70 = vector.shape_cast %69 : vector<16xf32> to vector<16x1xf32>
    %cst_25 = arith.constant 1.280000e+02 : f32
    %71 = vector.broadcast %cst_25 : f32 to vector<16x1xf32>
    %72 = arith.divf %70, %71 : vector<16x1xf32>
    %73 = vector.broadcast %65 : vector<16x1xf32> to vector<16x128xf32>
    %74 = arith.subf %59, %73 : vector<16x128xf32>
    %cst_26 = arith.constant 9.99999974E-6 : f32
    %75 = vector.broadcast %cst_26 : f32 to vector<16x1xf32>
    %76 = arith.addf %72, %75 : vector<16x1xf32>
    %77 = math.rsqrt %76 : vector<16x1xf32>
    %78 = vector.broadcast %77 : vector<16x1xf32> to vector<16x128xf32>
    %79 = arith.mulf %74, %78 : vector<16x128xf32>
    %80 = vector.broadcast %60 : vector<1x128xf32> to vector<16x128xf32>
    %81 = arith.mulf %79, %80 : vector<16x128xf32>
    %82 = vector.broadcast %61 : vector<1x128xf32> to vector<16x128xf32>
    %83 = arith.addf %81, %82 : vector<16x128xf32>
    %84 = arith.truncf %83 : vector<16x128xf32> to vector<16x128xbf16>
    %c0_27 = arith.constant 0 : index
    %c0_28 = arith.constant 0 : index
    %85 = vector.load %arg10[%c0_27, %c0_28] : memref<128x512xbf16, #tpu.memory_space<vmem>>, vector<128x512xbf16>
    %cst_29 = arith.constant dense<0.000000e+00> : vector<16x512xf32>
    %86 = tpu.matmul %84, %85, %cst_29 {dimension_numbers = #tpu.dot_dimension_numbers<[1], [0], [0], [1], [0, 0, 1, 1], [], []>} : vector<16x128xbf16>, vector<128x512xbf16>, vector<16x512xf32> -> vector<16x512xf32>
    %c0_30 = arith.constant 0 : index
    %c0_31 = arith.constant 0 : index
    %87 = vector.load %arg11[%c0_30, %c0_31] : memref<1x512xf32, #tpu.memory_space<vmem>>, vector<1x512xf32>
    %88 = vector.broadcast %87 : vector<1x512xf32> to vector<16x512xf32>
    %89 = arith.addf %86, %88 : vector<16x512xf32>
    %cst_32 = arith.constant 0.000000e+00 : f32
    %90 = vector.broadcast %cst_32 : f32 to vector<16x512xf32>
    %91 = arith.maximumf %89, %90 : vector<16x512xf32>
    %92 = arith.truncf %91 : vector<16x512xf32> to vector<16x512xbf16>
    %c0_33 = arith.constant 0 : index
    %c0_34 = arith.constant 0 : index
    %93 = vector.load %arg12[%c0_33, %c0_34] : memref<512x128xbf16, #tpu.memory_space<vmem>>, vector<512x128xbf16>
    %cst_35 = arith.constant dense<0.000000e+00> : vector<16x128xf32>
    %94 = tpu.matmul %92, %93, %cst_35 {dimension_numbers = #tpu.dot_dimension_numbers<[1], [0], [0], [1], [0, 0, 1, 1], [], []>} : vector<16x512xbf16>, vector<512x128xbf16>, vector<16x128xf32> -> vector<16x128xf32>
    %c0_36 = arith.constant 0 : index
    %c0_37 = arith.constant 0 : index
    %95 = vector.load %arg13[%c0_36, %c0_37] : memref<1x128xf32, #tpu.memory_space<vmem>>, vector<1x128xf32>
    %96 = vector.broadcast %95 : vector<1x128xf32> to vector<16x128xf32>
    %97 = arith.addf %94, %96 : vector<16x128xf32>
    %98 = arith.addf %97, %83 : vector<16x128xf32>
    %c0_38 = arith.constant 0 : index
    %c0_39 = arith.constant 0 : index
    %99 = vector.load %arg8[%c0_38, %c0_39] : memref<1x128xf32, #tpu.memory_space<vmem>>, vector<1x128xf32>
    %c0_40 = arith.constant 0 : index
    %c0_41 = arith.constant 0 : index
    %100 = vector.load %arg9[%c0_40, %c0_41] : memref<1x128xf32, #tpu.memory_space<vmem>>, vector<1x128xf32>
    %cst_42 = arith.constant dense<0.000000e+00> : vector<16xf32>
    %101 = vector.multi_reduction <add>, %98, %cst_42 [1] : vector<16x128xf32> to vector<16xf32>
    %102 = vector.shape_cast %101 : vector<16xf32> to vector<16x1xf32>
    %cst_43 = arith.constant 1.280000e+02 : f32
    %103 = vector.broadcast %cst_43 : f32 to vector<16x1xf32>
    %104 = arith.divf %102, %103 : vector<16x1xf32>
    %105 = vector.broadcast %104 : vector<16x1xf32> to vector<16x128xf32>
    %106 = arith.subf %98, %105 : vector<16x128xf32>
    %107 = arith.mulf %106, %106 : vector<16x128xf32>
    %cst_44 = arith.constant dense<0.000000e+00> : vector<16xf32>
    %108 = vector.multi_reduction <add>, %107, %cst_44 [1] : vector<16x128xf32> to vector<16xf32>
    %109 = vector.shape_cast %108 : vector<16xf32> to vector<16x1xf32>
    %cst_45 = arith.constant 1.280000e+02 : f32
    %110 = vector.broadcast %cst_45 : f32 to vector<16x1xf32>
    %111 = arith.divf %109, %110 : vector<16x1xf32>
    %112 = vector.broadcast %104 : vector<16x1xf32> to vector<16x128xf32>
    %113 = arith.subf %98, %112 : vector<16x128xf32>
    %cst_46 = arith.constant 9.99999974E-6 : f32
    %114 = vector.broadcast %cst_46 : f32 to vector<16x1xf32>
    %115 = arith.addf %111, %114 : vector<16x1xf32>
    %116 = math.rsqrt %115 : vector<16x1xf32>
    %117 = vector.broadcast %116 : vector<16x1xf32> to vector<16x128xf32>
    %118 = arith.mulf %113, %117 : vector<16x128xf32>
    %119 = vector.broadcast %99 : vector<1x128xf32> to vector<16x128xf32>
    %120 = arith.mulf %118, %119 : vector<16x128xf32>
    %121 = vector.broadcast %100 : vector<1x128xf32> to vector<16x128xf32>
    %122 = arith.addf %120, %121 : vector<16x128xf32>
    %123 = vector.shape_cast %122 : vector<16x128xf32> to vector<2x8x128xf32>
    %124 = arith.truncf %123 : vector<2x8x128xf32> to vector<2x8x128xbf16>
    %c0_47 = arith.constant 0 : index
    %c0_48 = arith.constant 0 : index
    %c0_49 = arith.constant 0 : index
    %125 = vector.load %arg14[%c0_47, %c0_48, %c0_49] : memref<2x8x128xbf16, #tpu.memory_space<vmem>>, vector<2x8x128xbf16>
    tpu.vector_store %arg14[%c0_47, %c0_48, %c0_49], %124 {strides = array<i32>} : memref<2x8x128xbf16, #tpu.memory_space<vmem>>, vector<2x8x128xbf16>,
    return
  }
  func.func @transform_0(%arg0: i32) -> (i32, i32, i32) {
    %c0_i32 = arith.constant 0 : i32
    %c0_i32_0 = arith.constant 0 : i32
    %c0_i32_1 = arith.constant 0 : i32
    return %arg0, %c0_i32, %c0_i32_0 : i32, i32, i32
  }
  func.func @transform_1(%arg0: i32) -> (i32, i32) {
    %c0_i32 = arith.constant 0 : i32
    %c0_i32_0 = arith.constant 0 : i32
    %c0_i32_1 = arith.constant 0 : i32
    return %c0_i32, %c0_i32_0 : i32, i32
  }
  func.func @transform_2(%arg0: i32) -> (i32, i32) {
    %c0_i32 = arith.constant 0 : i32
    %c0_i32_0 = arith.constant 0 : i32
    %c0_i32_1 = arith.constant 0 : i32
    return %c0_i32, %c0_i32_0 : i32, i32
  }
  func.func @transform_3(%arg0: i32) -> (i32, i32, i32) {
    %c0_i32 = arith.constant 0 : i32
    %c0_i32_0 = arith.constant 0 : i32
    %c0_i32_1 = arith.constant 0 : i32
    %c0_i32_2 = arith.constant 0 : i32
    return %c0_i32, %c0_i32_0, %c0_i32_1 : i32, i32, i32
  }
  func.func @transform_4(%arg0: i32) -> (i32, i32) {
    %c0_i32 = arith.constant 0 : i32
    %c0_i32_0 = arith.constant 0 : i32
    %c0_i32_1 = arith.constant 0 : i32
    return %c0_i32, %c0_i32_0 : i32, i32
  }
  func.func @transform_5(%arg0: i32) -> (i32, i32) {
    %c0_i32 = arith.constant 0 : i32
    %c0_i32_0 = arith.constant 0 : i32
    %c0_i32_1 = arith.constant 0 : i32
    return %c0_i32, %c0_i32_0 : i32, i32
  }
  func.func @transform_6(%arg0: i32) -> (i32, i32) {
    %c0_i32 = arith.constant 0 : i32
    %c0_i32_0 = arith.constant 0 : i32
    %c0_i32_1 = arith.constant 0 : i32
    return %c0_i32, %c0_i32_0 : i32, i32
  }
  func.func @transform_7(%arg0: i32) -> (i32, i32) {
    %c0_i32 = arith.constant 0 : i32
    %c0_i32_0 = arith.constant 0 : i32
    %c0_i32_1 = arith.constant 0 : i32
    return %c0_i32, %c0_i32_0 : i32, i32
  }
  func.func @transform_8(%arg0: i32) -> (i32, i32) {
    %c0_i32 = arith.constant 0 : i32
    %c0_i32_0 = arith.constant 0 : i32
    %c0_i32_1 = arith.constant 0 : i32
    return %c0_i32, %c0_i32_0 : i32, i32
  }
  func.func @transform_9(%arg0: i32) -> (i32, i32) {
    %c0_i32 = arith.constant 0 : i32
    %c0_i32_0 = arith.constant 0 : i32
    %c0_i32_1 = arith.constant 0 : i32
    return %c0_i32, %c0_i32_0 : i32, i32
  }
  func.func @transform_10(%arg0: i32) -> (i32, i32) {
    %c0_i32 = arith.constant 0 : i32
    %c0_i32_0 = arith.constant 0 : i32
    %c0_i32_1 = arith.constant 0 : i32
    return %c0_i32, %c0_i32_0 : i32, i32
  }
  func.func @transform_11(%arg0: i32) -> (i32, i32) {
    %c0_i32 = arith.constant 0 : i32
    %c0_i32_0 = arith.constant 0 : i32
    %c0_i32_1 = arith.constant 0 : i32
    return %c0_i32, %c0_i32_0 : i32, i32
  }
  func.func @transform_12(%arg0: i32) -> (i32, i32) {
    %c0_i32 = arith.constant 0 : i32
    %c0_i32_0 = arith.constant 0 : i32
    %c0_i32_1 = arith.constant 0 : i32
    return %c0_i32, %c0_i32_0 : i32, i32
  }
  func.func @transform_13(%arg0: i32) -> (i32, i32, i32) {
    %c0_i32 = arith.constant 0 : i32
    %c0_i32_0 = arith.constant 0 : i32
    %c0_i32_1 = arith.constant 0 : i32
    return %arg0, %c0_i32, %c0_i32_0 : i32, i32, i32
  }
}

</mosaic_0001>

<bundles_post_ra>
// kernel: tpu_custom_call.1
= control target key start
LH: loop header
LB: loop body
LE: loop exit
PB: predicated region body
PF: predicated region fallthrough
CT: control target
= control target key end

     0   :  { %s4539_s0 = inlined_call_operand.hbm [shape: bf16[8,8,128], index: 0, kind: input, shape index: {}]   ;;  %s4540_s1 = inlined_call_operand.hbm [shape: bf16[128,384], index: 1, kind: input, shape index: {}]   ;;  %s4541_s2 = inlined_call_operand.vmem [shape: f32[1,384], index: 2, kind: input, shape index: {}]   ;;  %s4542_s3 = inlined_call_operand.hbm [shape: bf16[4,32,128], index: 3, kind: input, shape index: {}]   ;;  %s4543_s4 = inlined_call_operand.vmem [shape: f32[1,128], index: 4, kind: input, shape index: {}]   ;;  %s4544_s5 = inlined_call_operand.vmem [shape: f32[1,128], index: 5, kind: input, shape index: {}]   ;;  %s4545_s6 = inlined_call_operand.vmem [shape: f32[1,128], index: 6, kind: input, shape index: {}]   ;;  %s4546_s7 = inlined_call_operand.vmem [shape: f32[1,128], index: 7, kind: input, shape index: {}]   ;;  %s4547_s8 = inlined_call_operand.vmem [shape: f32[1,128], index: 8, kind: input, shape index: {}]   ;;  %s4548_s9 = inlined_call_operand.hbm [shape: bf16[128,512], index: 9, kind: input, shape index: {}]   ;;  %s4549_s10 = inlined_call_operand.vmem [shape: f32[1,512], index: 10, kind: input, shape index: {}]   ;;  %s4550_s11 = inlined_call_operand.hbm [shape: bf16[512,128], index: 11, kind: input, shape index: {}]   ;;  %s4551_s12 = inlined_call_operand.vmem [shape: f32[1,128], index: 12, kind: input, shape index: {}]   ;;  %s4552_s13 = inlined_call_operand.hbm [shape: bf16[8,8,128], index: 13, kind: output, shape index: {}]  }
   0x1   :  { %4559 = sst [smem:[#allocation18_spill]] %s4540_s1 }
   0x2   :  { %4560 = sst [smem:[#allocation19_spill]] %s4546_s7 }
   0x3   :  { %4561 = sst [smem:[#allocation20_spill]] %s4547_s8 }
   0x4   :  { %4562 = sst [smem:[#allocation21_spill]] %s4551_s12 }
   0x5   :  { %4563 = sst [smem:[#allocation22_spill]] %s4552_s13 }
   0x6   :  { %18 = vsyncpa [#allocation3], 0 }
   0x7   :  { %20 = vsyncpa [#allocation3 + $0x1], 0 }
   0x8   :  { %21 = vsyncpa [#allocation6], 0 }
   0x9   :  { %22 = vsyncpa [#allocation9], 0 }
   0xa   :  { %23 = vsyncpa [#allocation4], 0 }
   0xb   :  { %25 = vsyncpa [#allocation4 + $0x1], 0  ;;  %s4043_s25 = smov 0   ;;  %s4045_s26 = smov 0  }
   0xc   :  { %s4047_s27 = smov 0   ;;  %s4049_s28 = smov 0  }
   0xd LB: > { %4564 = sst [smem:[#allocation16_spill]] %s3940_s25  ;;  %s4064_s29 = sadd.s32 4294967295, %s3952_s28   ;;  %s3952_s28 = sphi %s4049_s28, %s4591_s28   ;;  %s3948_s27 = sphi %s4047_s27, %s4590_s27   ;;  %s3944_s26 = sphi %s4045_s26, %s4589_s26   ;;  %s3940_s25 = sphi %s4043_s25, %s4588_s25  }
   0xe   : > { %s2995_s30 = sadd.s32 4294967294, %s3952_s28   ;;  %p51_p0 = scmp.ne.s32.totalorder %s3944_s26, %s3940_s25 }
   0xf   : > { %p4555_p1 = scmp.eq.s32.totalorder %s4064_s29, 0  ;;  %p333_p3 = scmp.eq.s32.totalorder %s2995_s30, 3 }
  0x10   : > { %p2996_p5 = scmp.ge.s32.totalorder %s3952_s28, 1  ;;  %p340_p7 = scmp.lt.s32.totalorder %s3952_s28, 5 }
  0x11   : > { %p4073_p4 = por %p4555_p1, %p51_p0  ;;  %p4078_p6 = por %p333_p3, %p51_p0 }
  0x12   : > { %p4083_p8 = pnand %p2996_p5, %p340_p7  ;;  %s3954_s17 = smov [#allocation5]  }
  0x13   : > { %s4565_s14 = scalar_select %p4073_p4, 1, 0 }
  0x14   : > { %s4566_s15 = scalar_select %p4078_p6, 1, 0 }
  0x15   : > { %s4568_s16 = scalar_select %p4083_p8, 1, 0 }
  0x16   : > { %4567 = sst [smem:[#allocation17_spill]] %s4566_s15  ;;  %s352_s18 = sshll.u32 %s3954_s17, 4  ;;  %s353_s18 = int_to_ptr.vmem [resolvable:$true] %s352_s18 }
  0x17   : > { %p3460_p9 = pneg %p4083_p8  ;;  %s3955_s20 = smov [#allocation8]  }
  0x18   : > { %s396_s21 = sshll.u32 %s3955_s20, 4  ;;  %s4570_s1 = sld [smem:[#allocation18_spill]]  ;;  %s4095_s21 = int_to_ptr.vmem [resolvable:$true] %s396_s21 }
  0x19   : > { %p4091_p10 = pnand %p3460_p9, %p4555_p1 }
  0x1b   : > { %p4105_p12 = pneg %p4091_p10 }
  0x1e   : > { %s3736_s24 = scalar_lea.hbm %s4570_s1, 3072 }
  0x1f   : > { %p3737_p11 = scmp.ne.s32.totalorder %s4570_s1, %s3736_s24  ;;  %p3743_p3 = scmp.lt.u32.totalorder %s3736_s24, %s4570_s1 }
  0x21   : > { %p3739_p13 = pnand %p4105_p12, %p3737_p11 }
  0x23   : > { %p3740_p0 = pneg %p3739_p13 }
  0x25   : > { %p3745_p5 = pnand %p3743_p3, %p3740_p0 }
  0x27   : > { %3748 = shalt.err (!%p3745_p5)
}
  0x28   : > { %s3749_s22 = scalar_lea.vmem %s353_s18, 3072  ;;  %p3757_p2 = scmp.lt.s32.totalorder %s353_s18, %s353_s18 }
  0x29   : > { %p3750_p7 = scmp.ne.s32.totalorder %s353_s18, %s3749_s22  ;;  %p3758_p6 = scmp.lt.s32.totalorder %s3749_s22, %s3749_s22 }
  0x2b   : > { %p3752_p9 = pnand %p3750_p7, %p4105_p12  ;;  %p3759_p4 = por %p3758_p6, %p3757_p2 }
  0x2d   : > { %p3753_p1 = pneg %p3752_p9 }
  0x2f   : > { %p3760_p8 = pnand %p3759_p4, %p3753_p1 }
  0x31   : > { %3763 = shalt.err (!%p3760_p8)
}
  0x32   : > { %s3956_s15 = smov 192   ;;  %s3957_s23 = smov 12  }
  0x33   : > { %3463 = dma.hbm_to_vmem [thread:$0]  (!%p4091_p10), %s4570_s1, 3072, %s353_s18, [#allocation6], %s3956_s15, %s3956_s15, %s3957_s23  }
  0x34   : > { %s3764_s13 = scalar_lea.hbm %s4548_s9, 4096 }
  0x35   : > { %p3765_p11 = scmp.ne.s32.totalorder %s4548_s9, %s3764_s13  ;;  %p3771_p4 = scmp.lt.u32.totalorder %s3764_s13, %s4548_s9 }
  0x37   : > { %p3767_p1 = pnand %p3765_p11, %p4105_p12 }
  0x39   : > { %p3768_p2 = pneg %p3767_p1 }
  0x3b   : > { %p3773_p6 = pnand %p3771_p4, %p3768_p2 }
  0x3d   : > { %3776 = shalt.err (!%p3773_p6)
}
  0x3e   : > { %s3777_s18 = scalar_lea.vmem %s4095_s21, 4096  ;;  %p3785_p3 = scmp.lt.s32.totalorder %s4095_s21, %s4095_s21 }
  0x3f   : > { %p3778_p8 = scmp.ne.s32.totalorder %s4095_s21, %s3777_s18  ;;  %p3786_p5 = scmp.lt.s32.totalorder %s3777_s18, %s3777_s18 }
  0x41   : > { %p3780_p13 = pnand %p3778_p8, %p4105_p12  ;;  %p3787_p7 = por %p3786_p5, %p3785_p3 }
  0x43   : > { %p3781_p0 = pneg %p3780_p13 }
  0x45   : > { %p3788_p9 = pnand %p3787_p7, %p3781_p0 }
  0x47   : > { %3791 = shalt.err (!%p3788_p9)
}
  0x48   : > { %s3958_s7 = smov 256   ;;  %s3959_s8 = smov 16  }
  0x49   : > { %3469 = dma.hbm_to_vmem [thread:$0]  (!%p4091_p10), %s4548_s9, 4096, %s4095_s21, [#allocation9], %s3958_s7, %s3958_s7, %s3959_s8  }
  0x4a   : > { %s3960_s15 = smov [#allocation7]   ;;  %s3792_s30 = scalar_lea.hbm %s4542_s3, 1024 }
  0x4b   : > { %s368_s23 = sshll.u32 %s3960_s15, 4  ;;  %p3793_p11 = scmp.ne.s32.totalorder %s4542_s3, %s3792_s30  ;;  %s369_s23 = int_to_ptr.vmem [resolvable:$true] %s368_s23 }
  0x4c   : > { %p3799_p4 = scmp.lt.u32.totalorder %s3792_s30, %s4542_s3 }
  0x4d   : > { %p3795_p1 = pnand %p3793_p11, %p4105_p12 }
  0x4f   : > { %p3796_p2 = pneg %p3795_p1 }
  0x51   : > { %p3801_p6 = pnand %p3799_p4, %p3796_p2 }
  0x53   : > { %3804 = shalt.err (!%p3801_p6)
}
  0x54   : > { %s3805_s21 = scalar_lea.vmem %s369_s23, 1024  ;;  %p3813_p3 = scmp.lt.s32.totalorder %s369_s23, %s369_s23 }
  0x55   : > { %p3806_p8 = scmp.ne.s32.totalorder %s369_s23, %s3805_s21  ;;  %p3814_p5 = scmp.lt.s32.totalorder %s3805_s21, %s3805_s21 }
  0x57   : > { %p3808_p13 = pnand %p3806_p8, %p4105_p12  ;;  %p3815_p7 = por %p3814_p5, %p3813_p3 }
  0x59   : > { %p3809_p0 = pneg %p3808_p13 }
  0x5b   : > { %p3816_p9 = pnand %p3815_p7, %p3809_p0 }
  0x5d   : > { %3819 = shalt.err (!%p3816_p9)
}
  0x5e   : > { %s3961_s7 = smov 64   ;;  %s3962_s8 = smov 4  }
  0x5f   : > { %3466 = dma.hbm_to_vmem [thread:$0]  (!%p4091_p10), %s4542_s3, 1024, %s369_s23, [#allocation6], %s3961_s7, %s3961_s7, %s3962_s8  }
  0x60   : > { %s3963_s13 = smov [#allocation10]   ;;  %s3820_s30 = scalar_lea.hbm %s4550_s11, 4096 }
  0x61   : > { %s412_s15 = sshll.u32 %s3963_s13, 4  ;;  %p3821_p11 = scmp.ne.s32.totalorder %s4550_s11, %s3820_s30  ;;  %s413_s15 = int_to_ptr.vmem [resolvable:$true] %s412_s15 }
  0x62   : > { %p3827_p4 = scmp.lt.u32.totalorder %s3820_s30, %s4550_s11 }
  0x63   : > { %p3823_p1 = pnand %p3821_p11, %p4105_p12 }
  0x65   : > { %p3824_p2 = pneg %p3823_p1 }
  0x67   : > { %p3829_p6 = pnand %p3827_p4, %p3824_p2 }
  0x69   : > { %3832 = shalt.err (!%p3829_p6)
}
  0x6a   : > { %s3833_s23 = scalar_lea.vmem %s413_s15, 4096  ;;  %p3841_p3 = scmp.lt.s32.totalorder %s413_s15, %s413_s15 }
  0x6b   : > { %p3834_p8 = scmp.ne.s32.totalorder %s413_s15, %s3833_s23  ;;  %p3842_p5 = scmp.lt.s32.totalorder %s3833_s23, %s3833_s23 }
  0x6d   : > { %p3836_p13 = pnand %p3834_p8, %p4105_p12  ;;  %p3843_p7 = por %p3842_p5, %p3841_p3 }
  0x6f   : > { %p3837_p0 = pneg %p3836_p13 }
  0x71   : > { %p3844_p9 = pnand %p3843_p7, %p3837_p0 }
  0x73   : > { %3847 = shalt.err (!%p3844_p9)
}
  0x74   : > { %3472 = dma.hbm_to_vmem [thread:$0]  (!%p4091_p10), %s4550_s11, 4096, %s413_s15, [#allocation9], %s3961_s7, %s3961_s7, %s3962_s8  }
  0x75   : > { %s4187_s17 = sadd.s32 1, %s3952_s28   ;;  %s38_s19 = sadd.s32 1, %s3948_s27 }
  0x76   : > { %s35_s13 = ssub.s32 %s3952_s28, %s4187_s17  ;;  %p45_p12 = scmp.ne.s32.totalorder %s3948_s27, %s3944_s26 }
  0x77   : > { %p36_p11 = scmp.eq.s32.totalorder %s35_s13, 0  ;;  %p46_p1 = scmp.eq.s32.totalorder %s3952_s28, 0 }
  0x78   : > { %p4572_p2 = scmp.eq.s32.totalorder %s4064_s29, 3  ;;  %p3485_p6 = scmp.lt.s32.totalorder %s3952_s28, 4 }
  0x79   : > { %s4203_s24 = scalar_select %p36_p11, %s3948_s27, %s38_s19  }
  0x7a   : > { %p4197_p4 = por %p4572_p2, %p45_p12  ;;  %p47_p8 = por %p46_p1, %p45_p12 }
  0x7b   : > { %s429_s30 = sand.u32 1, %s3948_s27   ;;  %s3144_s15 = sshll.u32 %s3952_s28, 7 }
  0x7c   : > { %s3002_s20 = sshll.u32 %s429_s30, 3  ;;  %s4210_s21 = scalar_lea.hbm %s4539_s0, %s3144_s15 }
  0x7d   : > { %s433_s23 = scalar_lea.vmem [#allocation2], %s3002_s20  ;;  %p4214_p10 = pnand %p3485_p6, %p47_p8 }
  0x7e   : > { %s440_s1 = sshll.u32 %s433_s23, 4  ;;  %s4218_s19 = scalar_lea.sflag [#allocation3], %s429_s30  ;;  %s4212_s1 = int_to_ptr.vmem [resolvable:$true] %s440_s1 }
  0x7f   : > { %s3848_s13 = scalar_lea.hbm %s4210_s21, 128  ;;  %p3850_p0 = pneg %p4214_p10 }
  0x80   : > { %p3849_p13 = scmp.ne.s32.totalorder %s4210_s21, %s3848_s13  ;;  %s3853_s22 = scalar_lea.hbm %s4539_s0, 512 }
  0x81   : > { %p3854_p7 = scmp.lt.u32.totalorder %s4210_s21, %s4539_s0  ;;  %p3855_p9 = scmp.lt.u32.totalorder %s3853_s22, %s3848_s13 }
  0x82   : > { %p3851_p3 = pnand %p3850_p0, %p3849_p13  ;;  %p3857_p11 = scmp.lt.u32.totalorder %s3848_s13, %s4210_s21 }
  0x83   : > { %p3856_p12 = por %p3855_p9, %p3854_p7 }
  0x84   : > { %p3852_p5 = pneg %p3851_p3 }
  0x85   : > { %p3858_p1 = por %p3857_p11, %p3856_p12 }
  0x87   : > { %p3859_p2 = pnand %p3858_p1, %p3852_p5 }
  0x89   : > { %3862 = shalt.err (!%p3859_p2)
}
  0x8a   : > { %s3863_s30 = scalar_lea.vmem %s4212_s1, 128  ;;  %s3964_s20 = smov [#allocation2]  }
  0x8b   : > { %p3864_p6 = scmp.ne.s32.totalorder %s4212_s1, %s3863_s30  ;;  %s3868_s15 = sshll.u32 %s3964_s20, 4  ;;  %s3869_s15 = int_to_ptr.vmem [resolvable:$false] %s3868_s15 }
  0x8c   : > { %s3870_s18 = scalar_lea.vmem %s3869_s15, 256  ;;  %p3871_p3 = scmp.lt.s32.totalorder %s4212_s1, %s3869_s15 }
  0x8d   : > { %p3866_p8 = pnand %p3864_p6, %p3850_p0  ;;  %p3872_p7 = scmp.lt.s32.totalorder %s3870_s18, %s3863_s30 }
  0x8f   : > { %p3867_p13 = pneg %p3866_p8  ;;  %p3873_p9 = por %p3872_p7, %p3871_p3 }
  0x91   : > { %p3874_p12 = pnand %p3873_p9, %p3867_p13 }
  0x93   : > { %3877 = shalt.err (!%p3874_p12)
}
  0x94   : > { %3476 = dma.hbm_to_vmem [thread:$0]  (!%p4214_p10), %s4210_s21, 128, %s4212_s1, %s4218_s19, %s3961_s7, %s3961_s7, %s3962_s8  }
  0x95   : > { %p4575_p0 = scmp.ne.s32.totalorder %s4568_s16, 0 }
  0x96   : > { %s4252_s13 = sand.u32 (!%p4575_p0), 1, %s3944_s26   ;;  %p4576_p5 = scmp.ne.s32.totalorder (!%p4575_p0), %s4565_s14, 0 }
  0x97   : > { %452 = sbr.rel (%p4575_p0) target bundleno = 2364 (0x93c), region = 72  ;;  %s3006_s22 = sshll.u32 (!%p4575_p0), %s4252_s13, 3 }
  0x98   : > { %s455_s23 = scalar_lea.sflag (!%p4575_p0), [#allocation3], %s4252_s13  ;;  %s4258_s12 = scalar_lea.vmem (!%p4575_p0), [#allocation2], %s3006_s22 }
  0x9e   : > { %3923 = dma.done.wait (%p4576_p5), %s455_s23, 128  }
  0x9f   : > { %3925 = vsyncadd (%p4576_p5), %s455_s23, 4294967168  ;;  %p4577_p10 = scmp.eq.s32.totalorder %s4064_s29, 0 }
  0xa1   : > { %3927 = dma.done.wait (%p4577_p10), [#allocation6], 4096   ;;  %p4578_p11 = pmov %p4577_p10 }
  0xa2   : > { %p4579_p1 = pmov %p4577_p10 }
  0xa3   : > { %3929 = vsyncadd (%p4578_p11), [#allocation6], 4294963200 }
  0xa4   : > { %3931 = dma.done.wait (%p4579_p1), [#allocation9], 8192   ;;  %p4580_p2 = pmov %p4579_p1 }
  0xa5   : > { %v3965_v0 = vmov 0   ;;  %v3966_v1 = vmov 0.0   ;;  %v3585_v2 = vld [vmem:[#allocation5 + $0x4] ss:$12 sps:$4 sm:$0xff]   ;;  %v3587_v3 = vld [vmem:[#allocation5] ss:$12 sps:$4 sm:$0xff]   ;;  %v558_v27 = vlaneseq }
  0xa6   : > { %3933 = vsyncadd (%p4580_p2), [#allocation9], 4294959104  ;;  %739 = vmatprep.mubr.bf16.mxu0 %v3965_v0  ;;  %3260 = vmatprep.subr.bf16.mxu1 %v3966_v1  ;;  %v3588_v4 = vld [vmem:[#allocation5 + $0x1c] ss:$12 sps:$4 sm:$0xff]   ;;  %v3590_v5 = vld [vmem:[#allocation5 + $0x18] ss:$12 sps:$4 sm:$0xff]  }
  0xa7   : > { %707 = vmatprep.subr.bf16.mxu0 %v3585_v2  ;;  %v3591_v6 = vld [vmem:[#allocation5 + $0x34] ss:$12 sps:$4 sm:$0xff]   ;;  %v3593_v7 = vld [vmem:[#allocation5 + $0x30] ss:$12 sps:$4 sm:$0xff]   ;;  %v3594_v8 = vld [vmem:[#allocation5 + $0x4c] ss:$12 sps:$4 sm:$0xff]  }
  0xa8   : > { %708 = vmatpush1.bf16.msra.mxu0 %v3587_v3  ;;  %v3596_v9 = vld [vmem:[#allocation5 + $0x48] ss:$12 sps:$4 sm:$0xff]   ;;  %v3597_v11 = vld [vmem:[#allocation5 + $0x64] ss:$12 sps:$4 sm:$0xff]   ;;  %v3611_v12 = vld [vmem:[#allocation5 + $0x20] ss:$12 sps:$4 sm:$0xff]  }
  0xa9   : > { %709 = vmatprep.subr.bf16.mxu0 %v3588_v4  ;;  %v3610_v10 = vld [vmem:[#allocation5 + $0x8] ss:$12 sps:$4 sm:$0xff]   ;;  %v3599_v13 = vld [vmem:[#allocation5 + $0x60] ss:$12 sps:$4 sm:$0xff]   ;;  %v3602_v15 = vld [vmem:[#allocation5 + $0x78] ss:$12 sps:$4 sm:$0xff]  }
  0xaa   : > { %3261 = vmatpush3.bf16.msra.mxu1 %v3610_v10  ;;  %v3600_v14 = vld [vmem:[#allocation5 + $0x7c] ss:$12 sps:$4 sm:$0xff]   ;;  %v3612_v16 = vld [vmem:[#allocation5 + $0x38] ss:$12 sps:$4 sm:$0xff]   ;;  %v3603_v17 = vld [vmem:[#allocation5 + $0x94] ss:$12 sps:$4 sm:$0xff]  }
  0xab   : > { %3262 = vmatprep.subr.bf16.mxu1 %v3966_v1  ;;  %v3613_v18 = vld [vmem:[#allocation5 + $0x50] ss:$12 sps:$4 sm:$0xff]   ;;  %v3606_v20 = vld [vmem:[#allocation5 + $0xac] ss:$12 sps:$4 sm:$0xff]   ;;  %v3614_v21 = vld [vmem:[#allocation5 + $0x68] ss:$12 sps:$4 sm:$0xff]  }
  0xac   : > { %710 = vmatpush1.bf16.msra.mxu0 %v3590_v5  ;;  %v3605_v19 = vld [vmem:[#allocation5 + $0x90] ss:$12 sps:$4 sm:$0xff]   ;;  %v3608_v22 = vld [vmem:[#allocation5 + $0xa8] ss:$12 sps:$4 sm:$0xff]   ;;  %v3615_v24 = vld [vmem:[#allocation5 + $0x80] ss:$12 sps:$4 sm:$0xff]  }
  0xad   : > { %711 = vmatprep.subr.bf16.mxu0 %v3591_v6  ;;  %v520_v23 = vld [vmem:[%s4258_s12] sm:$0xff]   ;;  %vm3967_vm0 = vmmov 0   ;;  %v4290_v28 = vshrl.u32 %v558_v27, 7  ;;  %vm875_vm1 = vcmask 261120   ;;  %s3968_s7 = smov 64   ;;  %s3969_s8 = smov 96  }
  0xae   : > { %3263 = vmatpush3.bf16.msra.mxu1 %v3611_v12  ;;  %v3616_v25 = vld [vmem:[#allocation5 + $0x98] ss:$12 sps:$4 sm:$0xff]   ;;  %v3617_v26 = vld [vmem:[#allocation5 + $0xb0] ss:$12 sps:$4 sm:$0xff]   ;;  %3276 = vmatprep.mubr.msk.bf16.mxu1 %vm3967_vm0, %v3966_v1  ;;  %s3970_s21 = smov 32   ;;  %vm1326_vm2 = vcmask 1043456  }
  0xaf   : > { %3264 = vmatprep.subr.bf16.mxu1 %v3966_v1  ;;  %v564_v29 = vsub.s32 1, %v4290_v28  ;;  %v556_v30 = vld [vmem:[%s4541_s2] sm:$0x7]  ;;  %v560_v31 = vsub.s32 0, %v4290_v28  ;;  %v568_v50 = vsub.s32 2, %v4290_v28  ;;  %vm1252_vm3 = vcmask 64512  }
  0xb0   : > { %712 = vmatpush1.bf16.msra.mxu0 %v3593_v7  ;;  %s4582_s19 = sld [smem:[#allocation19_spill]]  ;;  %s4583_s15 = sld [smem:[#allocation20_spill]] }
  0xb1   : > { %713 = vmatprep.subr.bf16.mxu0 %v3594_v8  ;;  %v565_v32 = vrot.slane %v556_v30, %v564_v29  ;;  %v561_v33 = vrot.slane %v556_v30, %v560_v31  ;;  %v569_v55 = vrot.slane %v556_v30, %v568_v50  ;;  %s3145_s18 = sshll.u32 %s4064_s29, 7  ;;  %s516_s23 = scalar_lea.vmem [#allocation11], %s3006_s22 }
  0xb2   : > { %3265 = vmatpush3.bf16.msra.mxu1 %v3612_v16  ;;  %s2871_s1 = scalar_lea.sflag [#allocation4], %s4252_s13  ;;  %s3971_s29 = smov [#allocation11]  }
  0xb3   : > { %3266 = vmatprep.subr.bf16.mxu1 %v3966_v1  ;;  %s3882_s22 = sshll.u32 %s3971_s29, 4  ;;  %s3883_s22 = int_to_ptr.vmem [resolvable:$false] %s3882_s22 }
  0xb4   : > { %714 = vmatpush1.bf16.msra.mxu0 %v3596_v9  ;;  %s3884_s30 = scalar_lea.vmem %s3883_s22, 256 }
  0xb5   : > { %715 = vmatprep.subr.bf16.mxu0 %v3597_v11 }
  0xb6   : > { %3267 = vmatpush3.bf16.msra.mxu1 %v3613_v18 }
  0xb7   : > { %3268 = vmatprep.subr.bf16.mxu1 %v3966_v1 }
  0xb8   : > { %716 = vmatpush1.bf16.msra.mxu0 %v3599_v13 }
  0xb9   : > { %717 = vmatprep.subr.bf16.mxu0 %v3600_v14 }
  0xba   : > { %3269 = vmatpush3.bf16.msra.mxu1 %v3614_v21 }
  0xbb   : > { %3270 = vmatprep.subr.bf16.mxu1 %v3966_v1 }
  0xbc   : > { %718 = vmatpush1.bf16.msra.mxu0 %v3602_v15 }
  0xbd   : > { %719 = vmatprep.subr.bf16.mxu0 %v3603_v17 }
  0xbe   : > { %3271 = vmatpush3.bf16.msra.mxu1 %v3615_v24 }
  0xbf   : > { %3272 = vmatprep.subr.bf16.mxu1 %v3966_v1 }
  0xc0   : > { %720 = vmatpush1.bf16.msra.mxu0 %v3605_v19 }
  0xc1   : > { %721 = vmatprep.subr.bf16.mxu0 %v3606_v20 }
  0xc2   : > { %3273 = vmatpush3.bf16.msra.mxu1 %v3616_v25 }
  0xc3   : > { %3274 = vmatprep.subr.bf16.mxu1 %v3966_v1 }
  0xc4   : > { %722 = vmatpush1.bf16.msra.mxu0 %v3608_v22 }
  0xc5   : > { %3280 = vmatprep.subr.bf16.mxu0 %v3966_v1 }
  0xc6   : > { %3275 = vmatpush3.bf16.msra.mxu1 %v3617_v26 }
  0xc7   : > { %740 = vmatmul.mubr.bf16.vlgmr.msra.gmra.mrb[0].mxu0 %v520_v23  ;;  %3286 = vmatprep.subr.bf16.mxu1 %v3966_v1 }
  0xc8   : > { %3282 = vmatprep.mubr.msk.bf16.mxu0 %vm3967_vm0, %v3966_v1 }
  0xc9   : > { %3277 = vmatmul.mubr.bf16.vlgmr.msra.gmra.mrb[0].mxu1 %v520_v23 }
  0xca   : > { %3288 = vmatprep.mubr.msk.bf16.mxu1 %vm3967_vm0, %v3966_v1 }
 0x19a   : > { %v741_v34 = vpop.f32.mrb[0].mxu0 }
 0x19b   : > { %v743_v35 = vpop.f32.mrb[1].mxu0  ;;  %v742_v38 = vadd.f32 %v741_v34, %v561_v33 }
 0x19c   : > { %v744_v36 = vadd.f32 %v743_v35, %v565_v32  ;;  %v745_v37 = vpop.f32.mrb[2].mxu0  ;;  %v784_v51 = vpop.f32.mrb[0].mxu1 }
 0x19d   : > { %v746_v39 = vadd.f32 %v745_v37, %v561_v33  ;;  %v747_v40 = vpop.f32.mrb[3].mxu0  ;;  %v811_v48 = vpack.c.bf16 %v742_v38, %v742_v38  ;;  %v3278_v52 = vpop.f32.mrb[1].mxu1  ;;  %v4316_v56 = vadd.f32 %v784_v51, %v569_v55 }
 0x19e   : > { %v748_v41 = vadd.f32 %v747_v40, %v565_v32  ;;  %v839_v42 = vpack.c.bf16 %v744_v36, %v744_v36  ;;  %v787_v53 = vpop.f32.mrb[2].mxu1 }
 0x19f   : > { %v3555_v43 = vpack.i.bf16 %v746_v39, %v742_v38  ;;  %v812_v49 = vpack.c.bf16 %v746_v39, %v746_v39  ;;  %v3279_v54 = vpop.f32.mrb[3].mxu1  ;;  %v4318_v57 = vadd.f32 %v787_v53, %v569_v55  ;;  %v867_v33 = vpack.c.bf16 %v4316_v56, %v4316_v56 }
 0x1a0   : > { %v880_v44 = vsel %vm875_vm1, %v839_v42, 0  ;;  %v3550_v45 = vpack.i.bf16 %v748_v41, %v744_v36  ;;  %v840_v46 = vpack.c.bf16 %v748_v41, %v748_v41 }
 0x1a1   : > { %3281 = vmatpush3.bf16.xpose.msra.mxu0 %v880_v44  ;;  %v3570_v58 = vpack.i.bf16 %v4318_v57, %v4316_v56  ;;  %v868_v35 = vpack.c.bf16 %v4318_v57, %v4318_v57  ;;  %v1328_v37 = vsel %vm1326_vm2, %v867_v33, 0 }
 0x1a2   : > { %3551 = vrot.lane.b32.xlu1 %v3550_v45, %s3968_s7  ;;  %3541 = vrot.lane.b32.xlu0 %v3550_v45, %s3969_s8  ;;  %v926_v47 = vsel %vm875_vm1, %v840_v46, 0 }
 0x1a3   : > { %3287 = vmatpush3.bf16.xpose.msra.mxu1 %v926_v47  ;;  %3292 = vmatprep.subr.bf16.mxu0 %v3966_v1  ;;  %v1374_v39 = vsel %vm1326_vm2, %v868_v35, 0 }
 0x1a4   : > { %3298 = vmatprep.subr.bf16.mxu1 %v3966_v1 }
 0x1a6   : > { %3556 = vrot.lane.b32.xlu1 %v3555_v43, %s3968_s7  ;;  %3546 = vrot.lane.b32.xlu0 %v3555_v43, %s3969_s8 }
 0x1a8   : > { %3283 = vmatmul.mubr.msk.bf16.vlgmr.msra.gmra.mrb[4].mxu0 %vm875_vm1, %v811_v48 }
 0x1a9   : > { %3294 = vmatprep.mubr.msk.bf16.mxu0 %vm3967_vm0, %v3966_v1 }
 0x1aa   : > { %3289 = vmatmul.mubr.msk.bf16.vlgmr.msra.gmra.mrb[4].mxu1 %vm875_vm1, %v812_v49  ;;  %3566 = vrot.lane.b32.xlu1 %v3555_v43, %s3970_s21 }
 0x1ab   : > { %3561 = vrot.lane.b32.xlu0 %v3550_v45, %s3970_s21  ;;  %3300 = vmatprep.mubr.msk.bf16.mxu1 %vm3967_vm0, %v3966_v1 }
 0x1ae   : > { %3576 = vrot.lane.b32.xlu1 %v3570_v58, %s3968_s7 }
 0x1af   : > { %3571 = vrot.lane.b32.xlu0 %v3570_v58, %s3969_s8  ;;  %s4581_s8 = sld [smem:[#allocation21_spill]] }
 0x1b3   : > { %3581 = vrot.lane.b32.xlu0 %v3570_v58, %s3970_s21 }
 0x214   : > { %v3542_v59 = vpop.permute.xlu0 %3541  ;;  %v3552_v62 = vpop.permute.xlu1 %3551 }
 0x215   : > { %v3544_v60 = vunpack.i.h.bf16 %v3542_v59  ;;  %v3543_v61 = vunpack.i.l.bf16 %v3542_v59  ;;  %v3553_v4 = vunpack.i.l.bf16 %v3552_v62  ;;  %v3554_v7 = vunpack.i.h.bf16 %v3552_v62 }
 0x217   : > { %v842_v63 = vpack.c.bf16 %v3544_v60, %v3544_v60  ;;  %v841_v2 = vpack.c.bf16 %v3543_v61, %v3543_v61  ;;  %v843_v10 = vpack.c.bf16 %v3553_v4, %v3553_v4  ;;  %v844_v11 = vpack.c.bf16 %v3554_v7, %v3554_v7 }
 0x218   : > { %v3547_v3 = vpop.permute.xlu0 %3546  ;;  %v3557_v14 = vpop.permute.xlu1 %3556 }
 0x219   : > { %v972_v5 = vsel %vm875_vm1, %v841_v2, 0  ;;  %v1018_v6 = vsel %vm875_vm1, %v842_v63, 0  ;;  %v3548_v8 = vunpack.i.l.bf16 %v3547_v3  ;;  %v3549_v9 = vunpack.i.h.bf16 %v3547_v3 }
 0x21a   : > { %3293 = vmatpush3.bf16.xpose.msra.mxu0 %v972_v5  ;;  %3299 = vmatpush3.bf16.xpose.msra.mxu1 %v1018_v6  ;;  %v1064_v17 = vsel %vm875_vm1, %v843_v10, 0  ;;  %v1110_v19 = vsel %vm875_vm1, %v844_v11, 0  ;;  %v3558_v20 = vunpack.i.l.bf16 %v3557_v14  ;;  %v3559_v21 = vunpack.i.h.bf16 %v3557_v14 }
 0x21b   : > { %3304 = vmatprep.subr.bf16.mxu0 %v3966_v1  ;;  %3310 = vmatprep.subr.bf16.mxu1 %v3966_v1  ;;  %v813_v13 = vpack.c.bf16 %v3548_v8, %v3548_v8  ;;  %v814_v15 = vpack.c.bf16 %v3549_v9, %v3549_v9 }
 0x21c   : > { %v815_v24 = vpack.c.bf16 %v3558_v20, %v3558_v20  ;;  %v816_v25 = vpack.c.bf16 %v3559_v21, %v3559_v21  ;;  %v3567_v26 = vpop.permute.xlu1 %3566 }
 0x21d   : > { %v3562_v12 = vpop.permute.xlu0 %3561  ;;  %v3568_v32 = vunpack.i.l.bf16 %v3567_v26  ;;  %v3569_v34 = vunpack.i.h.bf16 %v3567_v26 }
 0x21e   : > { %v3563_v16 = vunpack.i.l.bf16 %v3562_v12  ;;  %v3564_v18 = vunpack.i.h.bf16 %v3562_v12 }
 0x21f   : > { %v817_v36 = vpack.c.bf16 %v3568_v32, %v3568_v32  ;;  %v818_v38 = vpack.c.bf16 %v3569_v34, %v3569_v34 }
 0x220   : > { %v845_v22 = vpack.c.bf16 %v3563_v16, %v3563_v16  ;;  %v846_v23 = vpack.c.bf16 %v3564_v18, %v3564_v18 }
 0x221   : > { %3295 = vmatmul.mubr.msk.bf16.vlgmr.msra.gmra.mrb[8].mxu0 %vm875_vm1, %v813_v13  ;;  %3301 = vmatmul.mubr.msk.bf16.vlgmr.msra.gmra.mrb[8].mxu1 %vm875_vm1, %v814_v15 }
 0x222   : > { %3305 = vmatpush3.bf16.xpose.msra.mxu0 %v1064_v17  ;;  %3311 = vmatpush3.bf16.xpose.msra.mxu1 %v1110_v19  ;;  %v1156_v27 = vsel %vm875_vm1, %v845_v22, 0  ;;  %v1202_v30 = vsel %vm875_vm1, %v846_v23, 0 }
 0x223   : > { %3306 = vmatprep.mubr.msk.bf16.mxu0 %vm3967_vm0, %v3966_v1  ;;  %3312 = vmatprep.mubr.msk.bf16.mxu1 %vm3967_vm0, %v3966_v1 }
 0x224   : > { %3316 = vmatprep.subr.bf16.mxu0 %v3966_v1  ;;  %3322 = vmatprep.subr.bf16.mxu1 %v3966_v1 }
 0x229   : > { %3307 = vmatmul.mubr.msk.bf16.vlgmr.msra.gmra.mrb[12].mxu0 %vm875_vm1, %v815_v24  ;;  %3313 = vmatmul.mubr.msk.bf16.vlgmr.msra.gmra.mrb[12].mxu1 %vm875_vm1, %v816_v25 }
 0x22a   : > { %3317 = vmatpush3.bf16.xpose.msra.mxu0 %v1156_v27  ;;  %3323 = vmatpush3.bf16.xpose.msra.mxu1 %v1202_v30 }
 0x22b   : > { %3318 = vmatprep.mubr.msk.bf16.mxu0 %vm3967_vm0, %v3966_v1  ;;  %3324 = vmatprep.mubr.msk.bf16.mxu1 %vm3967_vm0, %v3966_v1 }
 0x22c   : > { %3328 = vmatprep.subr.bf16.mxu0 %v3966_v1  ;;  %3334 = vmatprep.subr.bf16.mxu1 %v3966_v1 }
 0x231   : > { %3319 = vmatmul.mubr.msk.bf16.vlgmr.msra.gmra.mrb[16].mxu0 %vm875_vm1, %v817_v36  ;;  %3325 = vmatmul.mubr.msk.bf16.vlgmr.msra.gmra.mrb[16].mxu1 %vm875_vm1, %v818_v38 }
 0x232   : > { %3329 = vmatpush3.bf16.msra.mxu0 %v1328_v37  ;;  %3335 = vmatpush3.bf16.msra.mxu1 %v1374_v39 }
 0x233   : > { %3330 = vmatprep.mubr.msk.bf16.mxu0 %vm3967_vm0, %v3966_v1  ;;  %3336 = vmatprep.mubr.msk.bf16.mxu1 %vm3967_vm0, %v3966_v1 }
 0x234   : > { %3340 = vmatprep.subr.bf16.mxu0 %v3966_v1  ;;  %3346 = vmatprep.subr.bf16.mxu1 %v3966_v1 }
 0x27b   : > { %v916_v40 = vpop.f32.mrb[4].mxu0 }
 0x27c   : > { %v3284_v41 = vpop.f32.mrb[5].mxu0  ;;  %v1244_v57 = vmul.f32 0.17677669, %v916_v40 }
 0x27d   : > { %v919_v42 = vpop.f32.mrb[6].mxu0  ;;  %v962_v43 = vpop.f32.mrb[4].mxu1 }
 0x27e   : > { %v3285_v44 = vpop.f32.mrb[7].mxu0  ;;  %v3290_v45 = vpop.f32.mrb[5].mxu1  ;;  %v1245_v58 = vmul.f32 0.17677669, %v962_v43  ;;  %v1253_v4 = vsel %vm1252_vm3, %v1244_v57, -inf }
 0x27f   : > { %v965_v46 = vpop.f32.mrb[6].mxu1 }
 0x280   : > { %v3291_v47 = vpop.f32.mrb[7].mxu1  ;;  %v1260_v8 = vsel %vm1252_vm3, %v1245_v58, -inf }
 0x2f4   : > { %v1008_v48 = vpop.f32.mrb[8].mxu0  ;;  %v1054_v49 = vpop.f32.mrb[8].mxu1 }
 0x2f5   : > { %v3296_v51 = vpop.f32.mrb[9].mxu0  ;;  %v3302_v52 = vpop.f32.mrb[9].mxu1  ;;  %v1246_v13 = vmul.f32 0.17677669, %v1008_v48  ;;  %v1247_v14 = vmul.f32 0.17677669, %v1054_v49 }
 0x2f6   : > { %v1011_v53 = vpop.f32.mrb[10].mxu0  ;;  %v1057_v54 = vpop.f32.mrb[10].mxu1 }
 0x2f7   : > { %v3297_v55 = vpop.f32.mrb[11].mxu0  ;;  %v3303_v56 = vpop.f32.mrb[11].mxu1  ;;  %v1254_v22 = vsel %vm1252_vm3, %v1246_v13, -inf  ;;  %v1261_v26 = vsel %vm1252_vm3, %v1247_v14, -inf }
 0x2fc   : > { %v1100_v59 = vpop.f32.mrb[12].mxu0  ;;  %v1146_v61 = vpop.f32.mrb[12].mxu1 }
 0x2fd   : > { %v1248_v60 = vmul.f32 0.17677669, %v1100_v59  ;;  %v3308_v62 = vpop.f32.mrb[13].mxu0  ;;  %v1249_v63 = vmul.f32 0.17677669, %v1146_v61  ;;  %v3314_v2 = vpop.f32.mrb[13].mxu1 }
 0x2fe   : > { %v1103_v3 = vpop.f32.mrb[14].mxu0  ;;  %v1149_v6 = vpop.f32.mrb[14].mxu1 }
 0x2ff   : > { %v1255_v5 = vsel %vm1252_vm3, %v1248_v60, -inf  ;;  %v3309_v7 = vpop.f32.mrb[15].mxu0  ;;  %v1262_v10 = vsel %vm1252_vm3, %v1249_v63, -inf  ;;  %v3315_v11 = vpop.f32.mrb[15].mxu1 }
 0x300   : > { %v1256_v9 = vmax.f32 %v1253_v4, %v1255_v5  ;;  %v1263_v12 = vmax.f32 %v1260_v8, %v1262_v10 }
 0x304   : > { %v1192_v15 = vpop.f32.mrb[16].mxu0  ;;  %v1238_v17 = vpop.f32.mrb[16].mxu1 }
 0x305   : > { %v1250_v16 = vmul.f32 0.17677669, %v1192_v15  ;;  %v3320_v18 = vpop.f32.mrb[17].mxu0  ;;  %v1251_v19 = vmul.f32 0.17677669, %v1238_v17  ;;  %v3326_v20 = vpop.f32.mrb[17].mxu1 }
 0x306   : > { %v1195_v21 = vpop.f32.mrb[18].mxu0  ;;  %v1241_v24 = vpop.f32.mrb[18].mxu1 }
 0x307   : > { %v1257_v23 = vsel %vm1252_vm3, %v1250_v16, -inf  ;;  %v3321_v25 = vpop.f32.mrb[19].mxu0  ;;  %v1264_v30 = vsel %vm1252_vm3, %v1251_v19, -inf  ;;  %v3327_v32 = vpop.f32.mrb[19].mxu1 }
 0x308   : > { %v1258_v27 = vmax.f32 %v1254_v22, %v1257_v23  ;;  %v1265_v33 = vmax.f32 %v1261_v26, %v1264_v30  ;;  %v3577_v18 = vpop.permute.xlu1 %3576 }
 0x30a   : > { %v1259_v34 = vmax.f32 %v1256_v9, %v1258_v27  ;;  %v1266_v35 = vmax.f32 %v1263_v12, %v1265_v33  ;;  %v3578_v27 = vunpack.i.l.bf16 %v3577_v18 }
 0x30c   : > { %v1267_v36 = vsub.f32 %v1244_v57, %v1259_v34  ;;  %v1269_v37 = vsub.f32 %v1246_v13, %v1259_v34  ;;  %v1271_v38 = vsub.f32 %v1248_v60, %v1259_v34  ;;  %v1273_v39 = vsub.f32 %v1250_v16, %v1259_v34  ;;  %v3572_v13 = vpop.permute.xlu0 %3571 }
 0x30d   : > { %v1268_v40 = vsub.f32 %v1245_v58, %v1266_v35  ;;  %v1270_v41 = vsub.f32 %v1247_v14, %v1266_v35  ;;  %v1272_v42 = vsub.f32 %v1249_v63, %v1266_v35  ;;  %v1274_v43 = vsub.f32 %v1251_v19, %v1266_v35 }
 0x30e   : > { %v1275_v44 = vmul.f32 1.442695, %v1267_v36  ;;  %v1279_v45 = vmul.f32 1.442695, %v1269_v37  ;;  %v1283_v46 = vmul.f32 1.442695, %v1271_v38  ;;  %v3573_v14 = vunpack.i.l.bf16 %v3572_v13 }
 0x30f   : > { %v1287_v47 = vmul.f32 1.442695, %v1273_v39  ;;  %v1277_v48 = vmul.f32 1.442695, %v1268_v40  ;;  %v1281_v49 = vmul.f32 1.442695, %v1270_v41  ;;  %v3574_v15 = vunpack.i.h.bf16 %v3572_v13 }
 0x310   : > { %3707 = vpow2.f32 %v1275_v44  ;;  %v1285_v51 = vmul.f32 1.442695, %v1272_v42  ;;  %v1289_v52 = vmul.f32 1.442695, %v1274_v43  ;;  %v869_v16 = vpack.c.bf16 %v3573_v14, %v3573_v14  ;;  %v3582_v39 = vpop.permute.xlu0 %3581 }
 0x311   : > { %3709 = vpow2.f32 %v1279_v45  ;;  %v870_v23 = vpack.c.bf16 %v3574_v15, %v3574_v15  ;;  %v3579_v37 = vunpack.i.h.bf16 %v3577_v18  ;;  %v871_v38 = vpack.c.bf16 %v3578_v27, %v3578_v27  ;;  %v3623_v15 = vld [vmem:[#allocation7 + $0x28] sm:$0xff]   ;;  %v3625_v27 = vld [vmem:[#allocation7 + $0x38] sm:$0xff]  }
 0x312   : > { %3711 = vpow2.f32 %v1283_v46  ;;  %v1420_v25 = vsel %vm1326_vm2, %v869_v16, 0  ;;  %v3583_v42 = vunpack.i.l.bf16 %v3582_v39  ;;  %v3584_v45 = vunpack.i.h.bf16 %v3582_v39 }
 0x313   : > { %3713 = vpow2.f32 %v1287_v47  ;;  %v1466_v36 = vsel %vm1326_vm2, %v870_v23, 0  ;;  %v872_v41 = vpack.c.bf16 %v3579_v37, %v3579_v37  ;;  %v1512_v43 = vsel %vm1326_vm2, %v871_v38, 0 }
 0x314   : > { %3715 = vpow2.f32 %v1277_v48  ;;  %v873_v46 = vpack.c.bf16 %v3583_v42, %v3583_v42 }
 0x315   : > { %3717 = vpow2.f32 %v1281_v49  ;;  %v1558_v47 = vsel %vm1326_vm2, %v872_v41, 0  ;;  %v874_v49 = vpack.c.bf16 %v3584_v45, %v3584_v45 }
 0x316   : > { %3719 = vpow2.f32 %v1285_v51  ;;  %v1604_v51 = vsel %vm1326_vm2, %v873_v46, 0 }
 0x317   : > { %3721 = vpow2.f32 %v1289_v52 }
 0x31a   : > { %v3708_v53 = vpop.eup %3707 }
 0x31b   : > { %v3710_v54 = vpop.eup %3709  ;;  %v1291_v55 = vsel %vm1252_vm3, %v3708_v53, 0.0 }
 0x31c   : > { %v3712_v56 = vpop.eup %3711  ;;  %v1292_v57 = vsel %vm1252_vm3, %v3710_v54, 0.0 }
 0x31d   : > { %v3714_v58 = vpop.eup %3713  ;;  %v1293_v59 = vadd.f32 %v1292_v57, %v1291_v55  ;;  %v1294_v61 = vsel %vm1252_vm3, %v3712_v56, 0.0  ;;  %v3619_v57 = vld [vmem:[#allocation7 + $0x8] sm:$0xff]  }
 0x31e   : > { %v3716_v60 = vpop.eup %3715  ;;  %v1296_v4 = vsel %vm1252_vm3, %v3714_v58, 0.0 }
 0x31f   : > { %v3718_v62 = vpop.eup %3717  ;;  %v1295_v63 = vadd.f32 %v1294_v61, %v1293_v59  ;;  %v1298_v2 = vsel %vm1252_vm3, %v3716_v60, 0.0  ;;  %v3620_v59 = vld [vmem:[#allocation7 + $0x10] sm:$0xff]  }
 0x320   : > { %v3720_v3 = vpop.eup %3719  ;;  %v1299_v5 = vsel %vm1252_vm3, %v3718_v62, 0.0 }
 0x321   : > { %v3722_v6 = vpop.eup %3721  ;;  %v1297_v7 = vadd.f32 %v1296_v4, %v1295_v63  ;;  %v1300_v8 = vadd.f32 %v1299_v5, %v1298_v2  ;;  %v1301_v9 = vsel %vm1252_vm3, %v3720_v3, 0.0 }
 0x322   : > { %v1303_v11 = vsel %vm1252_vm3, %v3722_v6, 0.0 }
 0x323   : > { %3723 = vrcp.f32 %v1297_v7  ;;  %v1302_v10 = vadd.f32 %v1301_v9, %v1300_v8  ;;  %v3622_v9 = vld [vmem:[#allocation7 + $0x20] sm:$0xff]  }
 0x325   : > { %v1304_v12 = vadd.f32 %v1303_v11, %v1302_v10 }
 0x327   : > { %3725 = vrcp.f32 %v1304_v12 }
 0x32d   : > { %v3724_v17 = vpop.eup %3723 }
 0x32e   : > { %v1307_v19 = vmul.f32 %v3724_v17, %v3708_v53  ;;  %v1309_v20 = vmul.f32 %v3724_v17, %v3710_v54  ;;  %v1311_v21 = vmul.f32 %v3724_v17, %v3712_v56  ;;  %v1313_v22 = vmul.f32 %v3724_v17, %v3714_v58  ;;  %v3618_v54 = vld [vmem:[#allocation7] sm:$0xff]  }
 0x32f   : > { %v1650_v53 = vsel %vm1326_vm2, %v874_v49, 0 }
 0x330   : > { %v1315_v24 = vpack.c.bf16 %v1307_v19, %v1307_v19  ;;  %v1317_v40 = vpack.c.bf16 %v1309_v20, %v1309_v20  ;;  %v1319_v48 = vpack.c.bf16 %v1311_v21, %v1311_v21  ;;  %v1321_v55 = vpack.c.bf16 %v1313_v22, %v1313_v22  ;;  %v3624_v21 = vld [vmem:[#allocation7 + $0x30] sm:$0xff]  }
 0x331   : > { %v3726_v26 = vpop.eup %3725 }
 0x332   : > { %3331 = vmatmul.mubr.msk.bf16.vlgmr.msra.gmra.mrb[20].mxu0 %vm1252_vm3, %v1315_v24  ;;  %v1308_v30 = vmul.f32 %v3726_v26, %v3716_v60  ;;  %v1310_v32 = vmul.f32 %v3726_v26, %v3718_v62  ;;  %v1312_v33 = vmul.f32 %v3726_v26, %v3720_v3  ;;  %v1314_v34 = vmul.f32 %v3726_v26, %v3722_v6  ;;  %v3621_v3 = vld [vmem:[#allocation7 + $0x18] sm:$0xff]  }
 0x333   : > { %3341 = vmatpush3.bf16.msra.mxu0 %v1420_v25  ;;  %3342 = vmatprep.mubr.msk.bf16.mxu0 %vm3967_vm0, %v3966_v1 }
 0x334   : > { %v1316_v35 = vpack.c.bf16 %v1308_v30, %v1308_v30  ;;  %3352 = vmatprep.subr.bf16.mxu0 %v3966_v1  ;;  %v1318_v44 = vpack.c.bf16 %v1310_v32, %v1310_v32  ;;  %v1320_v52 = vpack.c.bf16 %v1312_v33, %v1312_v33  ;;  %v1322_v56 = vpack.c.bf16 %v1314_v34, %v1314_v34 }
 0x336   : > { %3337 = vmatmul.mubr.msk.bf16.vlgmr.msra.gmra.mrb[20].mxu1 %vm1252_vm3, %v1316_v35 }
 0x337   : > { %3347 = vmatpush3.bf16.msra.mxu1 %v1466_v36  ;;  %3348 = vmatprep.mubr.msk.bf16.mxu1 %vm3967_vm0, %v3966_v1 }
 0x338   : > { %3358 = vmatprep.subr.bf16.mxu1 %v3966_v1 }
 0x33a   : > { %3343 = vmatmul.mubr.msk.bf16.vlgmr.msra.gmra.mrb[24].mxu0 %vm1252_vm3, %v1317_v40 }
 0x33b   : > { %3353 = vmatpush3.bf16.msra.mxu0 %v1512_v43  ;;  %3354 = vmatprep.mubr.msk.bf16.mxu0 %vm3967_vm0, %v3966_v1 }
 0x33c   : > { %3364 = vmatprep.subr.bf16.mxu0 %v3966_v1 }
 0x33e   : > { %3349 = vmatmul.mubr.msk.bf16.vlgmr.msra.gmra.mrb[24].mxu1 %vm1252_vm3, %v1318_v44 }
 0x33f   : > { %3359 = vmatpush3.bf16.msra.mxu1 %v1558_v47  ;;  %3360 = vmatprep.mubr.msk.bf16.mxu1 %vm3967_vm0, %v3966_v1 }
 0x340   : > { %3370 = vmatprep.subr.bf16.mxu1 %v3966_v1 }
 0x342   : > { %3355 = vmatmul.mubr.msk.bf16.vlgmr.msra.gmra.mrb[28].mxu0 %vm1252_vm3, %v1319_v48 }
 0x343   : > { %3365 = vmatpush3.bf16.msra.mxu0 %v1604_v51  ;;  %3366 = vmatprep.mubr.msk.bf16.mxu0 %vm3967_vm0, %v3966_v1 }
 0x344   : > { %3376 = vmatprep.subr.bf16.mxu0 %v3966_v1 }
 0x346   : > { %3361 = vmatmul.mubr.msk.bf16.vlgmr.msra.gmra.mrb[28].mxu1 %vm1252_vm3, %v1320_v52 }
 0x347   : > { %3371 = vmatpush3.bf16.msra.mxu1 %v1650_v53  ;;  %3372 = vmatprep.mubr.msk.bf16.mxu1 %vm3967_vm0, %v3966_v1 }
 0x348   : > { %3384 = vmatprep.subr.bf16.mxu1 %v3966_v1 }
 0x34a   : > { %3367 = vmatmul.mubr.msk.bf16.vlgmr.msra.gmra.mrb[32].mxu0 %vm1252_vm3, %v1321_v55 }
 0x34b   : > { %3377 = vmatpush3.bf16.msra.mxu0 %v3618_v54  ;;  %3380 = vmatprep.mubr.msk.bf16.mxu0 %vm3967_vm0, %v3966_v1 }
 0x34c   : > { %3378 = vmatprep.subr.bf16.mxu0 %v3966_v1 }
 0x34e   : > { %3373 = vmatmul.mubr.msk.bf16.vlgmr.msra.gmra.mrb[32].mxu1 %vm1252_vm3, %v1322_v56 }
 0x34f   : > { %3385 = vmatpush3.bf16.msra.mxu1 %v3618_v54  ;;  %3388 = vmatprep.mubr.msk.bf16.mxu1 %vm3967_vm0, %v3966_v1 }
 0x350   : > { %3386 = vmatprep.subr.bf16.mxu1 %v3966_v1  ;;  %3379 = vmatpush3.bf16.msra.mxu0 %v3619_v57 }
 0x351   : > { %3392 = vmatprep.subr.bf16.mxu0 %v3966_v1 }
 0x353   : > { %3387 = vmatpush3.bf16.msra.mxu1 %v3619_v57 }
 0x354   : > { %3400 = vmatprep.subr.bf16.mxu1 %v3966_v1 }
 0x405   : > { %v1364_v58 = vpop.f32.mrb[20].mxu0 }
 0x406   : > { %v1708_v60 = vpack.c.bf16 %v1364_v58, %v1364_v58  ;;  %v3332_v61 = vpop.f32.mrb[21].mxu0 }
 0x407   : > { %v1367_v62 = vpop.f32.mrb[22].mxu0 }
 0x408   : > { %v3333_v63 = vpop.f32.mrb[23].mxu0  ;;  %3381 = vmatmul.mubr.msk.bf16.vlgmr.msra.gmra.mrb[36].mxu0 %vm875_vm1, %v1708_v60 }
 0x409   : > { %v1410_v2 = vpop.f32.mrb[20].mxu1  ;;  %3393 = vmatpush3.bf16.msra.mxu0 %v3620_v59  ;;  %3396 = vmatprep.mubr.msk.bf16.mxu0 %vm3967_vm0, %v3966_v1 }
 0x40a   : > { %v1709_v4 = vpack.c.bf16 %v1410_v2, %v1410_v2  ;;  %v3338_v5 = vpop.f32.mrb[21].mxu1  ;;  %3394 = vmatprep.subr.bf16.mxu0 %v3966_v1 }
 0x40b   : > { %v1413_v6 = vpop.f32.mrb[22].mxu1 }
 0x40c   : > { %v3339_v7 = vpop.f32.mrb[23].mxu1  ;;  %3389 = vmatmul.mubr.msk.bf16.vlgmr.msra.gmra.mrb[36].mxu1 %vm875_vm1, %v1709_v4 }
 0x40d   : > { %3401 = vmatpush3.bf16.msra.mxu1 %v3620_v59  ;;  %v1456_v8 = vpop.f32.mrb[24].mxu0  ;;  %3395 = vmatpush3.bf16.msra.mxu0 %v3621_v3 }
 0x40e   : > { %3402 = vmatprep.subr.bf16.mxu1 %v3966_v1  ;;  %v1710_v10 = vpack.c.bf16 %v1456_v8, %v1456_v8  ;;  %v3344_v11 = vpop.f32.mrb[25].mxu0  ;;  %3404 = vmatprep.mubr.msk.bf16.mxu1 %vm3967_vm0, %v3966_v1 }
 0x40f   : > { %v1459_v12 = vpop.f32.mrb[26].mxu0  ;;  %3408 = vmatprep.subr.bf16.mxu0 %v3966_v1  ;;  %v3069_v11 = vld [vmem:[%s4543_s4] ss:$0 sm:$0xff] }
 0x410   : > { %v3345_v13 = vpop.f32.mrb[27].mxu0  ;;  %3397 = vmatmul.mubr.msk.bf16.vlgmr.msra.gmra.mrb[40].mxu0 %vm875_vm1, %v1710_v10 }
 0x411   : > { %v1502_v14 = vpop.f32.mrb[24].mxu1  ;;  %3403 = vmatpush3.bf16.msra.mxu1 %v3621_v3  ;;  %3409 = vmatpush3.bf16.msra.mxu0 %v3622_v9 }
 0x412   : > { %v1711_v16 = vpack.c.bf16 %v1502_v14, %v1502_v14  ;;  %v3350_v17 = vpop.f32.mrb[25].mxu1  ;;  %3416 = vmatprep.subr.bf16.mxu1 %v3966_v1  ;;  %3410 = vmatprep.subr.bf16.mxu0 %v3966_v1  ;;  %v3735_v14 = vld [vmem:[%s4258_s12] sm:$0xff]   ;;  %s2884_s12 = sshll.u32 %s516_s23, 4  ;;  %s4494_s12 = int_to_ptr.vmem [resolvable:$true] %s2884_s12 }
 0x413   : > { %v1505_v18 = vpop.f32.mrb[26].mxu1  ;;  %3412 = vmatprep.mubr.msk.bf16.mxu0 %vm3967_vm0, %v3966_v1  ;;  %p3885_p3 = scmp.lt.s32.totalorder %s4494_s12, %s3883_s22 }
 0x414   : > { %v3351_v19 = vpop.f32.mrb[27].mxu1  ;;  %3405 = vmatmul.mubr.msk.bf16.vlgmr.msra.gmra.mrb[40].mxu1 %vm875_vm1, %v1711_v16 }
 0x415   : > { %3417 = vmatpush3.bf16.msra.mxu1 %v3622_v9  ;;  %v1548_v20 = vpop.f32.mrb[28].mxu0  ;;  %3411 = vmatpush3.bf16.msra.mxu0 %v3623_v15 }
 0x416   : > { %3418 = vmatprep.subr.bf16.mxu1 %v3966_v1  ;;  %v1712_v22 = vpack.c.bf16 %v1548_v20, %v1548_v20  ;;  %v3356_v23 = vpop.f32.mrb[29].mxu0  ;;  %3420 = vmatprep.mubr.msk.bf16.mxu1 %vm3967_vm0, %v3966_v1 }
 0x417   : > { %v1551_v24 = vpop.f32.mrb[30].mxu0  ;;  %3424 = vmatprep.subr.bf16.mxu0 %v3966_v1 }
 0x418   : > { %v3357_v25 = vpop.f32.mrb[31].mxu0  ;;  %3413 = vmatmul.mubr.msk.bf16.vlgmr.msra.gmra.mrb[44].mxu0 %vm875_vm1, %v1712_v22  ;;  %v523_v22 = vunpack.c.h.bf16 %v3735_v14 }
 0x419   : > { %v1594_v26 = vpop.f32.mrb[28].mxu1  ;;  %3419 = vmatpush3.bf16.msra.mxu1 %v3623_v15  ;;  %3425 = vmatpush3.bf16.msra.mxu0 %v3624_v21  ;;  %v522_v15 = vunpack.c.l.bf16 %v3735_v14 }
 0x41a   : > { %v1713_v30 = vpack.c.bf16 %v1594_v26, %v1594_v26  ;;  %v3362_v32 = vpop.f32.mrb[29].mxu1  ;;  %3432 = vmatprep.subr.bf16.mxu1 %v3966_v1  ;;  %3426 = vmatprep.subr.bf16.mxu0 %v3966_v1 }
 0x41b   : > { %v1597_v33 = vpop.f32.mrb[30].mxu1  ;;  %3428 = vmatprep.mubr.msk.bf16.mxu0 %vm3967_vm0, %v3966_v1  ;;  %v3628_v32 = vld [vmem:[#allocation8 + $0x4] ss:$16 sps:$4 sm:$0xff]  }
 0x41c   : > { %v3363_v34 = vpop.f32.mrb[31].mxu1  ;;  %3421 = vmatmul.mubr.msk.bf16.vlgmr.msra.gmra.mrb[44].mxu1 %vm875_vm1, %v1713_v30  ;;  %v3626_v30 = vld [vmem:[#allocation8] ss:$16 sps:$4 sm:$0xff]   ;;  %v3629_v33 = vld [vmem:[#allocation8 + $0x8] ss:$16 sps:$4 sm:$0xff]  }
 0x41d   : > { %3433 = vmatpush3.bf16.msra.mxu1 %v3624_v21  ;;  %v1640_v35 = vpop.f32.mrb[32].mxu0  ;;  %3427 = vmatpush3.bf16.msra.mxu0 %v3625_v27  ;;  %v3631_v34 = vld [vmem:[#allocation8 + $0xc] ss:$16 sps:$4 sm:$0xff]  }
 0x41e   : > { %3434 = vmatprep.subr.bf16.mxu1 %v3966_v1  ;;  %v1714_v36 = vpack.c.bf16 %v1640_v35, %v1640_v35  ;;  %v3368_v37 = vpop.f32.mrb[33].mxu0  ;;  %3436 = vmatprep.mubr.msk.bf16.mxu1 %vm3967_vm0, %v3966_v1  ;;  %v3634_v35 = vld [vmem:[#allocation8 + $0x24] ss:$16 sps:$4 sm:$0xff]  }
 0x41f   : > { %v1643_v38 = vpop.f32.mrb[34].mxu0  ;;  %2381 = vmatprep.subr.bf16.mxu0 %v3628_v32  ;;  %v3632_v37 = vld [vmem:[#allocation8 + $0x20] ss:$16 sps:$4 sm:$0xff]   ;;  %v3678_v32 = vld [vmem:[#allocation10 + $0x48] sm:$0xff]  }
 0x420   : > { %v3369_v39 = vpop.f32.mrb[35].mxu0  ;;  %3429 = vmatmul.mubr.msk.bf16.vlgmr.msra.gmra.mrb[48].mxu0 %vm875_vm1, %v1714_v36  ;;  %v3637_v36 = vld [vmem:[#allocation8 + $0x2c] ss:$16 sps:$4 sm:$0xff]   ;;  %v3635_v38 = vld [vmem:[#allocation8 + $0x28] ss:$16 sps:$4 sm:$0xff]  }
 0x421   : > { %v1686_v40 = vpop.f32.mrb[32].mxu1  ;;  %3435 = vmatpush3.bf16.msra.mxu1 %v3625_v27  ;;  %2413 = vmatprep.mubr.bf16.mxu0 %v3965_v0  ;;  %v3640_v39 = vld [vmem:[#allocation8 + $0x44] ss:$16 sps:$4 sm:$0xff]  }
 0x422   : > { %v1715_v41 = vpack.c.bf16 %v1686_v40, %v1686_v40  ;;  %v3374_v42 = vpop.f32.mrb[33].mxu1  ;;  %2424 = vmatprep.subr.bf16.mxu1 %v3631_v34  ;;  %2382 = vmatpush1.bf16.msra.mxu0 %v3626_v30  ;;  %v3643_v40 = vld [vmem:[#allocation8 + $0x4c] ss:$16 sps:$4 sm:$0xff]  }
 0x423   : > { %v1689_v43 = vpop.f32.mrb[34].mxu1  ;;  %2383 = vmatprep.subr.bf16.mxu0 %v3634_v35  ;;  %v3641_v42 = vld [vmem:[#allocation8 + $0x48] ss:$16 sps:$4 sm:$0xff]  }
 0x424   : > { %v3375_v44 = vpop.f32.mrb[35].mxu1  ;;  %3437 = vmatmul.mubr.msk.bf16.vlgmr.msra.gmra.mrb[48].mxu1 %vm875_vm1, %v1715_v41  ;;  %v3638_v41 = vld [vmem:[#allocation8 + $0x40] ss:$16 sps:$4 sm:$0xff]   ;;  %v3680_v34 = vld [vmem:[#allocation10 + $0x8] sm:$0xff]  }
 0x425   : > { %2456 = vmatprep.mubr.bf16.mxu1 %v3965_v0  ;;  %2425 = vmatpush1.bf16.msra.mxu1 %v3629_v33  ;;  %v3679_v33 = vld [vmem:[#allocation10 + $0xc8] sm:$0xff]  }
 0x426   : > { %2426 = vmatprep.subr.bf16.mxu1 %v3637_v36  ;;  %2384 = vmatpush1.bf16.msra.mxu0 %v3632_v37  ;;  %v3681_v35 = vld [vmem:[#allocation10 + $0x88] sm:$0xff]   ;;  %v3682_v36 = vld [vmem:[#allocation10 + $0x50] sm:$0xff]  }
 0x427   : > { %2385 = vmatprep.subr.bf16.mxu0 %v3640_v39  ;;  %v3683_v37 = vld [vmem:[#allocation10 + $0xd0] sm:$0xff]  }
 0x428   : > { %v3685_v39 = vld [vmem:[#allocation10 + $0x90] sm:$0xff]  }
 0x429   : > { %2427 = vmatpush1.bf16.msra.mxu1 %v3635_v38  ;;  %v3684_v38 = vld [vmem:[#allocation10 + $0x10] sm:$0xff]  }
 0x42a   : > { %2428 = vmatprep.subr.bf16.mxu1 %v3643_v40  ;;  %2386 = vmatpush1.bf16.msra.mxu0 %v3638_v41  ;;  %v3686_v40 = vld [vmem:[#allocation10 + $0x58] sm:$0xff]  }
 0x42b   : > { %v3687_v41 = vld [vmem:[#allocation10 + $0xd8] sm:$0xff]  }
 0x42d   : > { %2429 = vmatpush1.bf16.msra.mxu1 %v3641_v42  ;;  %v3688_v42 = vld [vmem:[#allocation10 + $0x18] sm:$0xff]  }
 0x4db   : > { %v1765_v45 = vpop.f32.mrb[36].mxu0 }
 0x4dc   : > { %v3382_v46 = vpop.f32.mrb[37].mxu0 }
 0x4dd   : > { %v1768_v47 = vpop.f32.mrb[38].mxu0 }
 0x4de   : > { %v3383_v1 = vpop.f32.mrb[39].mxu0 }
 0x4df   : > { %v1808_v48 = vpop.f32.mrb[36].mxu1 }
 0x4e0   : > { %v3390_v49 = vpop.f32.mrb[37].mxu1 }
 0x4e1   : > { %v1811_v51 = vpop.f32.mrb[38].mxu1 }
 0x4e2   : > { %v3391_v52 = vpop.f32.mrb[39].mxu1  ;;  %v3646_v51 = vld [vmem:[#allocation8 + $0x64] ss:$16 sps:$4 sm:$0xff]  }
 0x4e3   : > { %v1863_v53 = vpop.f32.mrb[40].mxu0  ;;  %v3649_v52 = vld [vmem:[#allocation8 + $0x6c] ss:$16 sps:$4 sm:$0xff]   ;;  %2387 = vmatprep.subr.bf16.mxu0 %v3646_v51 }
 0x4e4   : > { %v2108_v54 = vadd.f32 %v1863_v53, %v1765_v45  ;;  %v3398_v55 = vpop.f32.mrb[41].mxu0  ;;  %v3644_v53 = vld [vmem:[#allocation8 + $0x60] ss:$16 sps:$4 sm:$0xff]   ;;  %2430 = vmatprep.subr.bf16.mxu1 %v3649_v52  ;;  %v3697_v51 = vld [vmem:[#allocation10 + $0xa8] sm:$0xff]  }
 0x4e5   : > { %v1866_v56 = vpop.f32.mrb[42].mxu0  ;;  %2388 = vmatpush1.bf16.msra.mxu0 %v3644_v53  ;;  %v3652_v55 = vld [vmem:[#allocation8 + $0x84] ss:$16 sps:$4 sm:$0xff]  }
 0x4e6   : > { %v3399_v57 = vpop.f32.mrb[43].mxu0  ;;  %v3655_v56 = vld [vmem:[#allocation8 + $0x8c] ss:$16 sps:$4 sm:$0xff]   ;;  %2389 = vmatprep.subr.bf16.mxu0 %v3652_v55  ;;  %v3698_v52 = vld [vmem:[#allocation10 + $0x70] sm:$0xff]  }
 0x4e7   : > { %v1906_v58 = vpop.f32.mrb[40].mxu1  ;;  %v3650_v57 = vld [vmem:[#allocation8 + $0x80] ss:$16 sps:$4 sm:$0xff]  }
 0x4e8   : > { %v2111_v59 = vadd.f32 %v1906_v58, %v1808_v48  ;;  %v3406_v60 = vpop.f32.mrb[41].mxu1  ;;  %v3653_v58 = vld [vmem:[#allocation8 + $0x88] ss:$16 sps:$4 sm:$0xff]   ;;  %v3699_v53 = vld [vmem:[#allocation10 + $0xf0] sm:$0xff]  }
 0x4e9   : > { %v1909_v61 = vpop.f32.mrb[42].mxu1  ;;  %2390 = vmatpush1.bf16.msra.mxu0 %v3650_v57  ;;  %v3661_v60 = vld [vmem:[#allocation8 + $0xac] ss:$16 sps:$4 sm:$0xff]   ;;  %v3701_v55 = vld [vmem:[#allocation10 + $0xb0] sm:$0xff]  }
 0x4ea   : > { %v3407_v62 = vpop.f32.mrb[43].mxu1  ;;  %v3656_v61 = vld [vmem:[#allocation8 + $0xa0] ss:$16 sps:$4 sm:$0xff]   ;;  %v3703_v57 = vld [vmem:[#allocation10 + $0xf8] sm:$0xff]  }
 0x4eb   : > { %v1961_v0 = vpop.f32.mrb[44].mxu0  ;;  %v3659_v62 = vld [vmem:[#allocation8 + $0xa8] ss:$16 sps:$4 sm:$0xff]  }
 0x4ec   : > { %v2109_v63 = vadd.f32 %v2108_v54, %v1961_v0  ;;  %v3414_v2 = vpop.f32.mrb[45].mxu0  ;;  %v3647_v54 = vld [vmem:[#allocation8 + $0x68] ss:$16 sps:$4 sm:$0xff]   ;;  %v3662_v0 = vld [vmem:[#allocation8 + $0xc0] ss:$16 sps:$4 sm:$0xff]  }
 0x4ed   : > { %v1964_v3 = vpop.f32.mrb[46].mxu0  ;;  %2431 = vmatpush1.bf16.msra.mxu1 %v3647_v54  ;;  %v3665_v2 = vld [vmem:[#allocation8 + $0xc8] ss:$16 sps:$4 sm:$0xff]   ;;  %v3700_v54 = vld [vmem:[#allocation10 + $0x30] sm:$0xff]  }
 0x4ee   : > { %v3415_v4 = vpop.f32.mrb[47].mxu0  ;;  %2432 = vmatprep.subr.bf16.mxu1 %v3655_v56  ;;  %v3667_v3 = vld [vmem:[#allocation8 + $0xcc] ss:$16 sps:$4 sm:$0xff]  }
 0x4ef   : > { %v2004_v5 = vpop.f32.mrb[44].mxu1  ;;  %v3670_v4 = vld [vmem:[#allocation8 + $0xe4] ss:$16 sps:$4 sm:$0xff]   ;;  %v3702_v56 = vld [vmem:[#allocation10 + $0x78] sm:$0xff]  }
 0x4f0   : > { %v2112_v6 = vadd.f32 %v2111_v59, %v2004_v5  ;;  %v3422_v7 = vpop.f32.mrb[45].mxu1  ;;  %v3658_v59 = vld [vmem:[#allocation8 + $0xa4] ss:$16 sps:$4 sm:$0xff]   ;;  %v3673_v5 = vld [vmem:[#allocation8 + $0xec] ss:$16 sps:$4 sm:$0xff]  }
 0x4f1   : > { %v2007_v8 = vpop.f32.mrb[46].mxu1  ;;  %2433 = vmatpush1.bf16.msra.mxu1 %v3653_v58  ;;  %2391 = vmatprep.subr.bf16.mxu0 %v3658_v59  ;;  %v3671_v7 = vld [vmem:[#allocation8 + $0xe8] ss:$16 sps:$4 sm:$0xff]  }
 0x4f2   : > { %v3423_v9 = vpop.f32.mrb[47].mxu1  ;;  %2434 = vmatprep.subr.bf16.mxu1 %v3661_v60  ;;  %2392 = vmatpush1.bf16.msra.mxu0 %v3656_v61  ;;  %v3674_v8 = vld [vmem:[#allocation10 + $0x40] sm:$0xff]   ;;  %v3704_v58 = vld [vmem:[#allocation10 + $0x38] sm:$0xff]   ;;  %v2199_v60 = vld [vmem:[%s4549_s10] sm:$0xf]  ;;  %v2215_v61 = vsub.s32 3, %v4290_v28 }
 0x4f3   : > { %v2059_v10 = vpop.f32.mrb[48].mxu0  ;;  %v3675_v9 = vld [vmem:[#allocation10 + $0xc0] sm:$0xff]   ;;  %v3705_v59 = vld [vmem:[#allocation10 + $0xb8] sm:$0xff]  }
 0x4f4   : > { %v2110_v12 = vadd.f32 %v2109_v63, %v2059_v10  ;;  %v3430_v13 = vpop.f32.mrb[49].mxu0  ;;  %v3664_v63 = vld [vmem:[#allocation8 + $0xc4] ss:$16 sps:$4 sm:$0xff]  }
 0x4f5   : > { %v2062_v16 = vpop.f32.mrb[50].mxu0  ;;  %2435 = vmatpush1.bf16.msra.mxu1 %v3659_v62  ;;  %2393 = vmatprep.subr.bf16.mxu0 %v3664_v63  ;;  %v2204_v62 = vrot.slane %v2199_v60, %v560_v31  ;;  %v2208_v63 = vrot.slane %v2199_v60, %v564_v29 }
 0x4f6   : > { %v2121_v17 = vadd.f32 %v3069_v11, %v2110_v12  ;;  %v3431_v18 = vpop.f32.mrb[51].mxu0  ;;  %2436 = vmatprep.subr.bf16.mxu1 %v3667_v3  ;;  %2394 = vmatpush1.bf16.msra.mxu0 %v3662_v0  ;;  %v2212_v0 = vrot.slane %v2199_v60, %v568_v50 }
 0x4f7   : > { %v2102_v19 = vpop.f32.mrb[48].mxu1  ;;  %2395 = vmatprep.subr.bf16.mxu0 %v3670_v4 }
 0x4f8   : > { %v2113_v20 = vadd.f32 %v2112_v6, %v2102_v19  ;;  %v3438_v21 = vpop.f32.mrb[49].mxu1  ;;  %v2123_v23 = vadd.f32 %v2121_v17, %v522_v15  ;;  %v3668_v6 = vld [vmem:[#allocation8 + $0xe0] ss:$16 sps:$4 sm:$0xff]  }
 0x4f9   : > { %v2105_v24 = vpop.f32.mrb[50].mxu1  ;;  %2437 = vmatpush1.bf16.msra.mxu1 %v3665_v2  ;;  %v3070_v17 = vld [vmem:[%s4544_s5] ss:$0 sm:$0xff]  ;;  %v2216_v2 = vrot.slane %v2199_v60, %v2215_v61 }
 0x4fa   : > { %v2122_v25 = vadd.f32 %v3069_v11, %v2113_v20  ;;  %v3439_v26 = vpop.f32.mrb[51].mxu1  ;;  %2127 = vadd.xlane.f32.xlu1 %v2123_v23  ;;  %2438 = vmatprep.subr.bf16.mxu1 %v3673_v5  ;;  %v3071_v21 = vld [vmem:[%s4545_s6] ss:$0 sm:$0xff] }
 0x4fb   : > { %2396 = vmatpush1.bf16.msra.mxu0 %v3668_v6  ;;  %v3676_v26 = vld [vmem:[#allocation10] sm:$0xff]  }
 0x4fc   : > { %v2124_v27 = vadd.f32 %v2122_v25, %v523_v22  ;;  %3216 = vmatprep.subr.bf16.mxu0 %v3674_v8 }
 0x4fd   : > { %2439 = vmatpush1.bf16.msra.mxu1 %v3671_v7 }
 0x4fe   : > { %2129 = vadd.xlane.f32.xlu0 %v2124_v27  ;;  %3238 = vmatprep.subr.bf16.mxu1 %v3675_v9 }
 0x587   : > { %v2128_v43 = vpop.xlane.xlu1 %2127 }
 0x588   : > { %v2132_v44 = vmul.f32 0.0078125, %v2128_v43  ;;  %v3689_v43 = vld [vmem:[#allocation10 + $0x98] sm:$0xff]  }
 0x58a   : > { %v2134_v45 = vsub.f32 %v2123_v23, %v2132_v44  ;;  %v3690_v44 = vld [vmem:[#allocation10 + $0x60] sm:$0xff]  }
 0x58b   : > { %v2130_v46 = vpop.xlane.xlu0 %2129 }
 0x58c   : > { %v2133_v47 = vmul.f32 0.0078125, %v2130_v46  ;;  %v2136_v1 = vmul.f32 %v2134_v45, %v2134_v45  ;;  %v3692_v46 = vld [vmem:[#allocation10 + $0x20] sm:$0xff]  }
 0x58e   : > { %v2135_v48 = vsub.f32 %v2124_v27, %v2133_v47  ;;  %2138 = vadd.xlane.f32.xlu0 %v2136_v1  ;;  %v3677_v27 = vld [vmem:[#allocation10 + $0x80] sm:$0xff]   ;;  %v3694_v1 = vld [vmem:[#allocation10 + $0x68] sm:$0xff]  }
 0x58f   : > { %v3693_v47 = vld [vmem:[#allocation10 + $0xa0] sm:$0xff]  }
 0x590   : > { %v2137_v49 = vmul.f32 %v2135_v48, %v2135_v48 }
 0x592   : > { %2140 = vadd.xlane.f32.xlu1 %v2137_v49  ;;  %v3696_v49 = vld [vmem:[#allocation10 + $0x28] sm:$0xff]  }
 0x61b   : > { %v2139_v10 = vpop.xlane.xlu0 %2138 }
 0x61c   : > { %v2142_v11 = vmul.f32 0.0078125, %v2139_v10 }
 0x61e   : > { %v2144_v12 = vadd.f32 1e-05, %v2142_v11 }
 0x61f   : > { %v2141_v13 = vpop.xlane.xlu1 %2140 }
 0x620   : > { %3727 = vrsqrt.f32 %v2144_v12  ;;  %v2143_v14 = vmul.f32 0.0078125, %v2141_v13 }
 0x622   : > { %v2145_v15 = vadd.f32 1e-05, %v2143_v14 }
 0x624   : > { %3729 = vrsqrt.f32 %v2145_v15 }
 0x62a   : > { %v3728_v16 = vpop.eup %3727 }
 0x62b   : > { %v2148_v18 = vmul.f32 %v3728_v16, %v2134_v45  ;;  %v3691_v45 = vld [vmem:[#allocation10 + $0xe0] sm:$0xff]  }
 0x62d   : > { %v2156_v19 = vmul.f32 %v3070_v17, %v2148_v18 }
 0x62e   : > { %v3730_v20 = vpop.eup %3729 }
 0x62f   : > { %v2149_v22 = vmul.f32 %v3730_v20, %v2135_v48  ;;  %v4459_v24 = vadd.f32 %v3071_v21, %v2156_v19  ;;  %v3695_v48 = vld [vmem:[#allocation10 + $0xe8] sm:$0xff]  }
 0x631   : > { %v2157_v23 = vmul.f32 %v3070_v17, %v2149_v22 }
 0x633   : > { %v4461_v25 = vadd.f32 %v3071_v21, %v2157_v23 }
 0x635   : > { %v2166_v30 = vpack.c.bf16 %v4461_v25, %v4459_v24 }
 0x637   : > { %2414 = vmatmul.mubr.bf16.vlgmr.msra.gmra.mrb[52].mxu0 %v2166_v30  ;;  %2457 = vmatmul.mubr.bf16.vlgmr.msra.gmra.mrb[52].mxu1 %v2166_v30 }
 0x638   : > { %3217 = vmatpush3.bf16.msra.mxu0 %v3676_v26  ;;  %3239 = vmatpush3.bf16.msra.mxu1 %v3677_v27 }
 0x639   : > { %3218 = vmatprep.subr.bf16.mxu0 %v3678_v32  ;;  %3240 = vmatprep.subr.bf16.mxu1 %v3679_v33 }
 0x63c   : > { %3219 = vmatpush3.bf16.msra.mxu0 %v3680_v34  ;;  %3241 = vmatpush3.bf16.msra.mxu1 %v3681_v35  ;;  %v3104_v34 = vld [vmem:[%s4581_s8] ss:$0 sm:$0xff]  ;;  %s4584_s8 = sld [smem:[#allocation22_spill]] }
 0x63d   : > { %3220 = vmatprep.subr.bf16.mxu0 %v3682_v36  ;;  %3242 = vmatprep.subr.bf16.mxu1 %v3683_v37 }
 0x640   : > { %3221 = vmatpush3.bf16.msra.mxu0 %v3684_v38  ;;  %3243 = vmatpush3.bf16.msra.mxu1 %v3685_v39 }
 0x641   : > { %3222 = vmatprep.subr.bf16.mxu0 %v3686_v40  ;;  %3244 = vmatprep.subr.bf16.mxu1 %v3687_v41 }
 0x642   : > { %s4492_s21 = scalar_lea.hbm %s4584_s8, %s3145_s18 }
 0x644   : > { %3223 = vmatpush3.bf16.msra.mxu0 %v3688_v42  ;;  %3245 = vmatpush3.bf16.msra.mxu1 %v3689_v43 }
 0x645   : > { %3224 = vmatprep.subr.bf16.mxu0 %v3690_v44  ;;  %3246 = vmatprep.subr.bf16.mxu1 %v3691_v45 }
 0x648   : > { %3225 = vmatpush3.bf16.msra.mxu0 %v3692_v46  ;;  %3247 = vmatpush3.bf16.msra.mxu1 %v3693_v47 }
 0x649   : > { %3226 = vmatprep.subr.bf16.mxu0 %v3694_v1  ;;  %3248 = vmatprep.subr.bf16.mxu1 %v3695_v48 }
 0x64c   : > { %3227 = vmatpush3.bf16.msra.mxu0 %v3696_v49  ;;  %3249 = vmatpush3.bf16.msra.mxu1 %v3697_v51 }
 0x64d   : > { %3228 = vmatprep.subr.bf16.mxu0 %v3698_v52  ;;  %3250 = vmatprep.subr.bf16.mxu1 %v3699_v53 }
 0x650   : > { %3229 = vmatpush3.bf16.msra.mxu0 %v3700_v54  ;;  %3251 = vmatpush3.bf16.msra.mxu1 %v3701_v55 }
 0x651   : > { %3230 = vmatprep.subr.bf16.mxu0 %v3702_v56  ;;  %3252 = vmatprep.subr.bf16.mxu1 %v3703_v57 }
 0x654   : > { %3231 = vmatpush3.bf16.msra.mxu0 %v3704_v58  ;;  %3253 = vmatpush3.bf16.msra.mxu1 %v3705_v59 }
 0x70a   : > { %v2415_v3 = vpop.f32.mrb[52].mxu0  ;;  %v2458_v4 = vpop.f32.mrb[52].mxu1 }
 0x70b   : > { %v2416_v5 = vadd.f32 %v2415_v3, %v2204_v62  ;;  %v2459_v6 = vadd.f32 %v2458_v4, %v2212_v0  ;;  %v2417_v7 = vpop.f32.mrb[53].mxu0  ;;  %v2460_v8 = vpop.f32.mrb[53].mxu1 }
 0x70c   : > { %v2418_v9 = vadd.f32 %v2417_v7, %v2208_v63  ;;  %v2461_v10 = vadd.f32 %v2460_v8, %v2216_v2  ;;  %v2419_v11 = vpop.f32.mrb[54].mxu0  ;;  %v2462_v12 = vpop.f32.mrb[54].mxu1 }
 0x70d   : > { %v2420_v13 = vadd.f32 %v2419_v11, %v2204_v62  ;;  %v2463_v14 = vadd.f32 %v2462_v12, %v2212_v0  ;;  %v2421_v31 = vpop.f32.mrb[55].mxu0  ;;  %v2464_v15 = vpop.f32.mrb[55].mxu1  ;;  %v2467_v17 = vmax.f32 %v2416_v5, 0.0  ;;  %v2469_v28 = vmax.f32 %v2459_v6, 0.0  ;;  %v3138_v6 = vld [vmem:[%s4583_s15] ss:$0 sm:$0xff] }
 0x70e   : > { %v2422_v16 = vadd.f32 %v2421_v31, %v2208_v63  ;;  %v2465_v50 = vadd.f32 %v2464_v15, %v2216_v2  ;;  %v2468_v19 = vmax.f32 %v2418_v9, 0.0  ;;  %v2470_v20 = vmax.f32 %v2461_v10, 0.0  ;;  %v3137_v63 = vld [vmem:[%s4582_s19] ss:$0 sm:$0xff]  ;;  %s3878_s19 = scalar_lea.vmem %s4494_s12, 128 }
 0x70f   : > { %v2471_v29 = vmax.f32 %v2420_v13, 0.0  ;;  %v2473_v18 = vmax.f32 %v2463_v14, 0.0  ;;  %p3879_p6 = scmp.ne.s32.totalorder %s4494_s12, %s3878_s19  ;;  %p3886_p7 = scmp.lt.s32.totalorder %s3884_s30, %s3878_s19 }
 0x710   : > { %v2472_v21 = vmax.f32 %v2422_v16, 0.0  ;;  %v2474_v22 = vmax.f32 %v2465_v50, 0.0 }
 0x711   : > { %v2475_v23 = vpack.c.bf16 %v2471_v29, %v2467_v17  ;;  %v2477_v26 = vpack.c.bf16 %v2473_v18, %v2469_v28  ;;  %p3880_p8 = pnand %p3879_p6, %p4197_p4  ;;  %p3887_p9 = por %p3886_p7, %p3885_p3 }
 0x712   : > { %v2476_v27 = vpack.c.bf16 %v2472_v21, %v2468_v19  ;;  %v2478_v30 = vpack.c.bf16 %v2474_v22, %v2470_v20 }
 0x713   : > { %p3881_p13 = pneg %p3880_p8 }
 0x714   : > { %2774 = vmatprep.mubr.bf16.mxu0 %v2476_v27  ;;  %2815 = vmatprep.mubr.bf16.mxu1 %v2478_v30 }
 0x715   : > { %2775 = vmatmul.mubr.bf16.vlgmr.msra.gmra.mrb[56].mxu0 %v2475_v23  ;;  %2816 = vmatmul.mubr.bf16.vlgmr.msra.gmra.mrb[56].mxu1 %v2477_v26  ;;  %p3888_p12 = pnand %p3887_p9, %p3881_p13 }
 0x7e8   : > { %v3232_v32 = vpop.f32.mrb[56].mxu0  ;;  %v3254_v33 = vpop.f32.mrb[56].mxu1 }
 0x7e9   : > { %v3233_v35 = vpop.f32.mrb[57].mxu0  ;;  %v3255_v36 = vpop.f32.mrb[57].mxu1 }
 0x7ea   : > { %v3234_v37 = vadd.f32 %v3233_v35, %v3232_v32  ;;  %v3256_v38 = vadd.f32 %v3255_v36, %v3254_v33  ;;  %v3235_v39 = vpop.f32.mrb[58].mxu0  ;;  %v3257_v40 = vpop.f32.mrb[58].mxu1 }
 0x7eb   : > { %v3236_v41 = vpop.f32.mrb[59].mxu0  ;;  %v3258_v42 = vpop.f32.mrb[59].mxu1 }
 0x7ec   : > { %v2777_v43 = vadd.f32 %v3234_v37, %v3104_v34  ;;  %v3237_v44 = vadd.f32 %v3236_v41, %v3235_v39  ;;  %v3259_v45 = vadd.f32 %v3258_v42, %v3257_v40 }
 0x7ee   : > { %v2818_v46 = vadd.f32 %v3256_v38, %v2777_v43  ;;  %v2780_v47 = vadd.f32 %v3237_v44, %v3104_v34 }
 0x7f0   : > { %v2821_v1 = vadd.f32 %v3259_v45, %v2780_v47  ;;  %v2824_v48 = vadd.f32 %v2818_v46, %v4459_v24 }
 0x7f2   : > { %2828 = vadd.xlane.f32.xlu0 %v2824_v48  ;;  %v2825_v49 = vadd.f32 %v2821_v1, %v4461_v25 }
 0x7f4   : > { %2830 = vadd.xlane.f32.xlu1 %v2825_v49 }
 0x87f   : > { %v2829_v51 = vpop.xlane.xlu0 %2828 }
 0x880   : > { %v2832_v52 = vmul.f32 0.0078125, %v2829_v51 }
 0x881   : > { %v2831_v53 = vpop.xlane.xlu1 %2830 }
 0x882   : > { %v2834_v54 = vsub.f32 %v2824_v48, %v2832_v52  ;;  %v2833_v55 = vmul.f32 0.0078125, %v2831_v53 }
 0x884   : > { %v2835_v56 = vsub.f32 %v2825_v49, %v2833_v55  ;;  %v2836_v57 = vmul.f32 %v2834_v54, %v2834_v54 }
 0x886   : > { %2838 = vadd.xlane.f32.xlu0 %v2836_v57  ;;  %v2837_v58 = vmul.f32 %v2835_v56, %v2835_v56 }
 0x888   : > { %2840 = vadd.xlane.f32.xlu1 %v2837_v58 }
 0x913   : > { %v2839_v59 = vpop.xlane.xlu0 %2838 }
 0x914   : > { %v2842_v60 = vmul.f32 0.0078125, %v2839_v59 }
 0x915   : > { %v2841_v61 = vpop.xlane.xlu1 %2840 }
 0x916   : > { %v2844_v24 = vadd.f32 1e-05, %v2842_v60  ;;  %v2843_v62 = vmul.f32 0.0078125, %v2841_v61 }
 0x918   : > { %3731 = vrsqrt.f32 %v2844_v24  ;;  %v2845_v25 = vadd.f32 1e-05, %v2843_v62 }
 0x91a   : > { %3733 = vrsqrt.f32 %v2845_v25 }
 0x922   : > { %v3732_v0 = vpop.eup %3731 }
 0x923   : > { %v2848_v2 = vmul.f32 %v3732_v0, %v2834_v54 }
 0x924   : > { %v3734_v3 = vpop.eup %3733 }
 0x925   : > { %v2856_v4 = vmul.f32 %v3137_v63, %v2848_v2  ;;  %v2849_v5 = vmul.f32 %v3734_v3, %v2835_v56 }
 0x927   : > { %v2857_v7 = vmul.f32 %v3137_v63, %v2849_v5  ;;  %v2864_v8 = vadd.f32 %v3138_v6, %v2856_v4 }
 0x929   : > { %v2865_v9 = vadd.f32 %v3138_v6, %v2857_v7 }
 0x92b   : > { %v3149_v10 = vpack.c.bf16 %v2865_v9, %v2864_v8 }
 0x92d   : > { %3150 = vst [vmem:[%s516_s23] sm:$0xff] %v3149_v10  }
 0x92e   : > { %3891 = shalt.err (!%p3888_p12)
}
 0x92f   : > { %s3892_s20 = scalar_lea.hbm %s4492_s21, 128  ;;  %s3896_s23 = scalar_lea.hbm %s4584_s8, 512 }
 0x930   : > { %p3893_p0 = scmp.ne.s32.totalorder %s4492_s21, %s3892_s20  ;;  %p3897_p11 = scmp.lt.u32.totalorder %s4492_s21, %s4584_s8 }
 0x931   : > { %p3898_p1 = scmp.lt.u32.totalorder %s3896_s23, %s3892_s20  ;;  %p3900_p6 = scmp.lt.u32.totalorder %s3892_s20, %s4492_s21 }
 0x932   : > { %p3894_p5 = pnand %p3893_p0, %p4197_p4 }
 0x933   : > { %p3899_p2 = por %p3898_p1, %p3897_p11 }
 0x934   : > { %p3895_p10 = pneg %p3894_p5 }
 0x935   : > { %p3901_p8 = por %p3900_p6, %p3899_p2 }
 0x937   : > { %p3902_p13 = pnand %p3901_p8, %p3895_p10 }
 0x939   : > { %3905 = shalt.err (!%p3902_p13)
}
 0x93a   : > { %s3972_s19 = smov 4  }
 0x93b   : > { %3458 = dma.vmem_to_hbm [thread:$0]  (%p4197_p4), %s4494_s12, 128, %s4492_s21, %s2871_s1, %s3968_s7, %s3968_s7, %s3972_s19  }
 0x93c PF: > { %s4585_s29 = sld [smem:[#allocation16_spill]]  ;;  %s4586_s22 = sld [smem:[#allocation17_spill]] }
 0x93d   : > { %p3490_p3 = scmp.ge.s32.totalorder %s3952_s28, 2 }
 0x942   : > { %s2899_s30 = sand.u32 1, %s4585_s29   ;;  %p4587_p7 = scmp.ne.s32.totalorder %s4586_s22, 0 }
 0x943   : > { %s2900_s20 = scalar_lea.sflag [#allocation4], %s2899_s30 }
 0x944   : > { %p3478_p9 = pnand %p3490_p3, %p4587_p7 }
 0x946   : > { %3935 = dma.done.wait (!%p3478_p9), %s2900_s20, 128  }
 0x947   : > { %3937 = vsyncadd (!%p3478_p9), %s2900_s20, 4294967168  ;;  %p28_p12 = scmp.ge.s32.totalorder %s4187_s17, 6   ;;  %s4588_s25 = smov %s3944_s26 }
 0x948   : > { %s4589_s26 = smov %s3948_s27  ;;  %s4590_s27 = smov %s4203_s24 }
 0x949   : > { %s4591_s28 = smov %s4187_s17  ;;  %30 = sbr.rel (!%p28_p12) target bundleno = 13 (0xd), region = 133 }
 0x950   :  { %2905 = vsyncpa [#allocation3], 1 }
 0x951   :  { %2907 = vsyncpa [#allocation3 + $0x1], 1 }
 0x952   :  { %2908 = vsyncpa [#allocation6], 1 }
 0x953   :  { %2909 = vsyncpa [#allocation9], 1 }
 0x954   :  { %2910 = vsyncpa [#allocation4], 1 }
 0x955   :  { %2912 = vsyncpa [#allocation4 + $0x1], 1 }

// kernel: tpu_custom_call.1
= control target key start
LH: loop header
LB: loop body
LE: loop exit
PB: predicated region body
PF: predicated region fallthrough
CT: control target
= control target key end

     0   :  { %s4539_s0 = inlined_call_operand.hbm [shape: bf16[8,8,128], index: 0, kind: input, shape index: {}]   ;;  %s4540_s1 = inlined_call_operand.hbm [shape: bf16[128,384], index: 1, kind: input, shape index: {}]   ;;  %s4541_s2 = inlined_call_operand.vmem [shape: f32[1,384], index: 2, kind: input, shape index: {}]   ;;  %s4542_s3 = inlined_call_operand.hbm [shape: bf16[4,32,128], index: 3, kind: input, shape index: {}]   ;;  %s4543_s4 = inlined_call_operand.vmem [shape: f32[1,128], index: 4, kind: input, shape index: {}]   ;;  %s4544_s5 = inlined_call_operand.vmem [shape: f32[1,128], index: 5, kind: input, shape index: {}]   ;;  %s4545_s6 = inlined_call_operand.vmem [shape: f32[1,128], index: 6, kind: input, shape index: {}]   ;;  %s4546_s7 = inlined_call_operand.vmem [shape: f32[1,128], index: 7, kind: input, shape index: {}]   ;;  %s4547_s8 = inlined_call_operand.vmem [shape: f32[1,128], index: 8, kind: input, shape index: {}]   ;;  %s4548_s9 = inlined_call_operand.hbm [shape: bf16[128,512], index: 9, kind: input, shape index: {}]   ;;  %s4549_s10 = inlined_call_operand.vmem [shape: f32[1,512], index: 10, kind: input, shape index: {}]   ;;  %s4550_s11 = inlined_call_operand.hbm [shape: bf16[512,128], index: 11, kind: input, shape index: {}]   ;;  %s4551_s12 = inlined_call_operand.vmem [shape: f32[1,128], index: 12, kind: input, shape index: {}]   ;;  %s4552_s13 = inlined_call_operand.hbm [shape: bf16[8,8,128], index: 13, kind: output, shape index: {}]  }
   0x1   :  { %4559 = sst [smem:[#allocation18_spill]] %s4540_s1 }
   0x2   :  { %4560 = sst [smem:[#allocation19_spill]] %s4546_s7 }
   0x3   :  { %4561 = sst [smem:[#allocation20_spill]] %s4547_s8 }
   0x4   :  { %4562 = sst [smem:[#allocation21_spill]] %s4551_s12 }
   0x5   :  { %4563 = sst [smem:[#allocation22_spill]] %s4552_s13 }
   0x6   :  { %18 = vsyncpa [#allocation3], 0 }
   0x7   :  { %20 = vsyncpa [#allocation3 + $0x1], 0 }
   0x8   :  { %21 = vsyncpa [#allocation6], 0 }
   0x9   :  { %22 = vsyncpa [#allocation9], 0 }
   0xa   :  { %23 = vsyncpa [#allocation4], 0 }
   0xb   :  { %25 = vsyncpa [#allocation4 + $0x1], 0  ;;  %s4043_s25 = smov 0   ;;  %s4045_s26 = smov 0  }
   0xc   :  { %s4047_s27 = smov 0   ;;  %s4049_s28 = smov 0  }
   0xd LB: > { %4564 = sst [smem:[#allocation16_spill]] %s3940_s25  ;;  %s4064_s29 = sadd.s32 4294967295, %s3952_s28   ;;  %s3952_s28 = sphi %s4049_s28, %s4591_s28   ;;  %s3948_s27 = sphi %s4047_s27, %s4590_s27   ;;  %s3944_s26 = sphi %s4045_s26, %s4589_s26   ;;  %s3940_s25 = sphi %s4043_s25, %s4588_s25  }
   0xe   : > { %s2995_s30 = sadd.s32 4294967294, %s3952_s28   ;;  %p51_p0 = scmp.ne.s32.totalorder %s3944_s26, %s3940_s25 }
   0xf   : > { %p4555_p1 = scmp.eq.s32.totalorder %s4064_s29, 0  ;;  %p333_p3 = scmp.eq.s32.totalorder %s2995_s30, 3 }
  0x10   : > { %p2996_p5 = scmp.ge.s32.totalorder %s3952_s28, 1  ;;  %p340_p7 = scmp.lt.s32.totalorder %s3952_s28, 5 }
  0x11   : > { %p4073_p4 = por %p4555_p1, %p51_p0  ;;  %p4078_p6 = por %p333_p3, %p51_p0 }
  0x12   : > { %p4083_p8 = pnand %p2996_p5, %p340_p7  ;;  %s3954_s17 = smov [#allocation5]  }
  0x13   : > { %s4565_s14 = scalar_select %p4073_p4, 1, 0 }
  0x14   : > { %s4566_s15 = scalar_select %p4078_p6, 1, 0 }
  0x15   : > { %s4568_s16 = scalar_select %p4083_p8, 1, 0 }
  0x16   : > { %4567 = sst [smem:[#allocation17_spill]] %s4566_s15  ;;  %s352_s18 = sshll.u32 %s3954_s17, 4  ;;  %s353_s18 = int_to_ptr.vmem [resolvable:$true] %s352_s18 }
  0x17   : > { %p3460_p9 = pneg %p4083_p8  ;;  %s3955_s20 = smov [#allocation8]  }
  0x18   : > { %s396_s21 = sshll.u32 %s3955_s20, 4  ;;  %s4570_s1 = sld [smem:[#allocation18_spill]]  ;;  %s4095_s21 = int_to_ptr.vmem [resolvable:$true] %s396_s21 }
  0x19   : > { %p4091_p10 = pnand %p3460_p9, %p4555_p1 }
  0x1b   : > { %p4105_p12 = pneg %p4091_p10 }
  0x1e   : > { %s3736_s24 = scalar_lea.hbm %s4570_s1, 3072 }
  0x1f   : > { %p3737_p11 = scmp.ne.s32.totalorder %s4570_s1, %s3736_s24  ;;  %p3743_p3 = scmp.lt.u32.totalorder %s3736_s24, %s4570_s1 }
  0x21   : > { %p3739_p13 = pnand %p4105_p12, %p3737_p11 }
  0x23   : > { %p3740_p0 = pneg %p3739_p13 }
  0x25   : > { %p3745_p5 = pnand %p3743_p3, %p3740_p0 }
  0x27   : > { %3748 = shalt.err (!%p3745_p5)
}
  0x28   : > { %s3749_s22 = scalar_lea.vmem %s353_s18, 3072  ;;  %p3757_p2 = scmp.lt.s32.totalorder %s353_s18, %s353_s18 }
  0x29   : > { %p3750_p7 = scmp.ne.s32.totalorder %s353_s18, %s3749_s22  ;;  %p3758_p6 = scmp.lt.s32.totalorder %s3749_s22, %s3749_s22 }
  0x2b   : > { %p3752_p9 = pnand %p3750_p7, %p4105_p12  ;;  %p3759_p4 = por %p3758_p6, %p3757_p2 }
  0x2d   : > { %p3753_p1 = pneg %p3752_p9 }
  0x2f   : > { %p3760_p8 = pnand %p3759_p4, %p3753_p1 }
  0x31   : > { %3763 = shalt.err (!%p3760_p8)
}
  0x32   : > { %s3956_s15 = smov 192   ;;  %s3957_s23 = smov 12  }
  0x33   : > { %3463 = dma.hbm_to_vmem [thread:$0]  (!%p4091_p10), %s4570_s1, 3072, %s353_s18, [#allocation6], %s3956_s15, %s3956_s15, %s3957_s23  }
  0x34   : > { %s3764_s13 = scalar_lea.hbm %s4548_s9, 4096 }
  0x35   : > { %p3765_p11 = scmp.ne.s32.totalorder %s4548_s9, %s3764_s13  ;;  %p3771_p4 = scmp.lt.u32.totalorder %s3764_s13, %s4548_s9 }
  0x37   : > { %p3767_p1 = pnand %p3765_p11, %p4105_p12 }
  0x39   : > { %p3768_p2 = pneg %p3767_p1 }
  0x3b   : > { %p3773_p6 = pnand %p3771_p4, %p3768_p2 }
  0x3d   : > { %3776 = shalt.err (!%p3773_p6)
}
  0x3e   : > { %s3777_s18 = scalar_lea.vmem %s4095_s21, 4096  ;;  %p3785_p3 = scmp.lt.s32.totalorder %s4095_s21, %s4095_s21 }
  0x3f   : > { %p3778_p8 = scmp.ne.s32.totalorder %s4095_s21, %s3777_s18  ;;  %p3786_p5 = scmp.lt.s32.totalorder %s3777_s18, %s3777_s18 }
  0x41   : > { %p3780_p13 = pnand %p3778_p8, %p4105_p12  ;;  %p3787_p7 = por %p3786_p5, %p3785_p3 }
  0x43   : > { %p3781_p0 = pneg %p3780_p13 }
  0x45   : > { %p3788_p9 = pnand %p3787_p7, %p3781_p0 }
  0x47   : > { %3791 = shalt.err (!%p3788_p9)
}
  0x48   : > { %s3958_s7 = smov 256   ;;  %s3959_s8 = smov 16  }
  0x49   : > { %3469 = dma.hbm_to_vmem [thread:$0]  (!%p4091_p10), %s4548_s9, 4096, %s4095_s21, [#allocation9], %s3958_s7, %s3958_s7, %s3959_s8  }
  0x4a   : > { %s3960_s15 = smov [#allocation7]   ;;  %s3792_s30 = scalar_lea.hbm %s4542_s3, 1024 }
  0x4b   : > { %s368_s23 = sshll.u32 %s3960_s15, 4  ;;  %p3793_p11 = scmp.ne.s32.totalorder %s4542_s3, %s3792_s30  ;;  %s369_s23 = int_to_ptr.vmem [resolvable:$true] %s368_s23 }
  0x4c   : > { %p3799_p4 = scmp.lt.u32.totalorder %s3792_s30, %s4542_s3 }
  0x4d   : > { %p3795_p1 = pnand %p3793_p11, %p4105_p12 }
  0x4f   : > { %p3796_p2 = pneg %p3795_p1 }
  0x51   : > { %p3801_p6 = pnand %p3799_p4, %p3796_p2 }
  0x53   : > { %3804 = shalt.err (!%p3801_p6)
}
  0x54   : > { %s3805_s21 = scalar_lea.vmem %s369_s23, 1024  ;;  %p3813_p3 = scmp.lt.s32.totalorder %s369_s23, %s369_s23 }
  0x55   : > { %p3806_p8 = scmp.ne.s32.totalorder %s369_s23, %s3805_s21  ;;  %p3814_p5 = scmp.lt.s32.totalorder %s3805_s21, %s3805_s21 }
  0x57   : > { %p3808_p13 = pnand %p3806_p8, %p4105_p12  ;;  %p3815_p7 = por %p3814_p5, %p3813_p3 }
  0x59   : > { %p3809_p0 = pneg %p3808_p13 }
  0x5b   : > { %p3816_p9 = pnand %p3815_p7, %p3809_p0 }
  0x5d   : > { %3819 = shalt.err (!%p3816_p9)
}
  0x5e   : > { %s3961_s7 = smov 64   ;;  %s3962_s8 = smov 4  }
  0x5f   : > { %3466 = dma.hbm_to_vmem [thread:$0]  (!%p4091_p10), %s4542_s3, 1024, %s369_s23, [#allocation6], %s3961_s7, %s3961_s7, %s3962_s8  }
  0x60   : > { %s3963_s13 = smov [#allocation10]   ;;  %s3820_s30 = scalar_lea.hbm %s4550_s11, 4096 }
  0x61   : > { %s412_s15 = sshll.u32 %s3963_s13, 4  ;;  %p3821_p11 = scmp.ne.s32.totalorder %s4550_s11, %s3820_s30  ;;  %s413_s15 = int_to_ptr.vmem [resolvable:$true] %s412_s15 }
  0x62   : > { %p3827_p4 = scmp.lt.u32.totalorder %s3820_s30, %s4550_s11 }
  0x63   : > { %p3823_p1 = pnand %p3821_p11, %p4105_p12 }
  0x65   : > { %p3824_p2 = pneg %p3823_p1 }
  0x67   : > { %p3829_p6 = pnand %p3827_p4, %p3824_p2 }
  0x69   : > { %3832 = shalt.err (!%p3829_p6)
}
  0x6a   : > { %s3833_s23 = scalar_lea.vmem %s413_s15, 4096  ;;  %p3841_p3 = scmp.lt.s32.totalorder %s413_s15, %s413_s15 }
  0x6b   : > { %p3834_p8 = scmp.ne.s32.totalorder %s413_s15, %s3833_s23  ;;  %p3842_p5 = scmp.lt.s32.totalorder %s3833_s23, %s3833_s23 }
  0x6d   : > { %p3836_p13 = pnand %p3834_p8, %p4105_p12  ;;  %p3843_p7 = por %p3842_p5, %p3841_p3 }
  0x6f   : > { %p3837_p0 = pneg %p3836_p13 }
  0x71   : > { %p3844_p9 = pnand %p3843_p7, %p3837_p0 }
  0x73   : > { %3847 = shalt.err (!%p3844_p9)
}
  0x74   : > { %3472 = dma.hbm_to_vmem [thread:$0]  (!%p4091_p10), %s4550_s11, 4096, %s413_s15, [#allocation9], %s3961_s7, %s3961_s7, %s3962_s8  }
  0x75   : > { %s4187_s17 = sadd.s32 1, %s3952_s28   ;;  %s38_s19 = sadd.s32 1, %s3948_s27 }
  0x76   : > { %s35_s13 = ssub.s32 %s3952_s28, %s4187_s17  ;;  %p45_p12 = scmp.ne.s32.totalorder %s3948_s27, %s3944_s26 }
  0x77   : > { %p36_p11 = scmp.eq.s32.totalorder %s35_s13, 0  ;;  %p46_p1 = scmp.eq.s32.totalorder %s3952_s28, 0 }
  0x78   : > { %p4572_p2 = scmp.eq.s32.totalorder %s4064_s29, 3  ;;  %p3485_p6 = scmp.lt.s32.totalorder %s3952_s28, 4 }
  0x79   : > { %s4203_s24 = scalar_select %p36_p11, %s3948_s27, %s38_s19  }
  0x7a   : > { %p4197_p4 = por %p4572_p2, %p45_p12  ;;  %p47_p8 = por %p46_p1, %p45_p12 }
  0x7b   : > { %s429_s30 = sand.u32 1, %s3948_s27   ;;  %s3144_s15 = sshll.u32 %s3952_s28, 7 }
  0x7c   : > { %s3002_s20 = sshll.u32 %s429_s30, 3  ;;  %s4210_s21 = scalar_lea.hbm %s4539_s0, %s3144_s15 }
  0x7d   : > { %s433_s23 = scalar_lea.vmem [#allocation2], %s3002_s20  ;;  %p4214_p10 = pnand %p3485_p6, %p47_p8 }
  0x7e   : > { %s440_s1 = sshll.u32 %s433_s23, 4  ;;  %s4218_s19 = scalar_lea.sflag [#allocation3], %s429_s30  ;;  %s4212_s1 = int_to_ptr.vmem [resolvable:$true] %s440_s1 }
  0x7f   : > { %s3848_s13 = scalar_lea.hbm %s4210_s21, 128  ;;  %p3850_p0 = pneg %p4214_p10 }
  0x80   : > { %p3849_p13 = scmp.ne.s32.totalorder %s4210_s21, %s3848_s13  ;;  %s3853_s22 = scalar_lea.hbm %s4539_s0, 512 }
  0x81   : > { %p3854_p7 = scmp.lt.u32.totalorder %s4210_s21, %s4539_s0  ;;  %p3855_p9 = scmp.lt.u32.totalorder %s3853_s22, %s3848_s13 }
  0x82   : > { %p3851_p3 = pnand %p3850_p0, %p3849_p13  ;;  %p3857_p11 = scmp.lt.u32.totalorder %s3848_s13, %s4210_s21 }
  0x83   : > { %p3856_p12 = por %p3855_p9, %p3854_p7 }
  0x84   : > { %p3852_p5 = pneg %p3851_p3 }
  0x85   : > { %p3858_p1 = por %p3857_p11, %p3856_p12 }
  0x87   : > { %p3859_p2 = pnand %p3858_p1, %p3852_p5 }
  0x89   : > { %3862 = shalt.err (!%p3859_p2)
}
  0x8a   : > { %s3863_s30 = scalar_lea.vmem %s4212_s1, 128  ;;  %s3964_s20 = smov [#allocation2]  }
  0x8b   : > { %p3864_p6 = scmp.ne.s32.totalorder %s4212_s1, %s3863_s30  ;;  %s3868_s15 = sshll.u32 %s3964_s20, 4  ;;  %s3869_s15 = int_to_ptr.vmem [resolvable:$false] %s3868_s15 }
  0x8c   : > { %s3870_s18 = scalar_lea.vmem %s3869_s15, 256  ;;  %p3871_p3 = scmp.lt.s32.totalorder %s4212_s1, %s3869_s15 }
  0x8d   : > { %p3866_p8 = pnand %p3864_p6, %p3850_p0  ;;  %p3872_p7 = scmp.lt.s32.totalorder %s3870_s18, %s3863_s30 }
  0x8f   : > { %p3867_p13 = pneg %p3866_p8  ;;  %p3873_p9 = por %p3872_p7, %p3871_p3 }
  0x91   : > { %p3874_p12 = pnand %p3873_p9, %p3867_p13 }
  0x93   : > { %3877 = shalt.err (!%p3874_p12)
}
  0x94   : > { %3476 = dma.hbm_to_vmem [thread:$0]  (!%p4214_p10), %s4210_s21, 128, %s4212_s1, %s4218_s19, %s3961_s7, %s3961_s7, %s3962_s8  }
  0x95   : > { %p4575_p0 = scmp.ne.s32.totalorder %s4568_s16, 0 }
  0x96   : > { %s4252_s13 = sand.u32 (!%p4575_p0), 1, %s3944_s26   ;;  %p4576_p5 = scmp.ne.s32.totalorder (!%p4575_p0), %s4565_s14, 0 }
  0x97   : > { %452 = sbr.rel (%p4575_p0) target bundleno = 2364 (0x93c), region = 72  ;;  %s3006_s22 = sshll.u32 (!%p4575_p0), %s4252_s13, 3 }
  0x98   : > { %s455_s23 = scalar_lea.sflag (!%p4575_p0), [#allocation3], %s4252_s13  ;;  %s4258_s12 = scalar_lea.vmem (!%p4575_p0), [#allocation2], %s3006_s22 }
  0x9e   : > { %3923 = dma.done.wait (%p4576_p5), %s455_s23, 128  }
  0x9f   : > { %3925 = vsyncadd (%p4576_p5), %s455_s23, 4294967168  ;;  %p4577_p10 = scmp.eq.s32.totalorder %s4064_s29, 0 }
  0xa1   : > { %3927 = dma.done.wait (%p4577_p10), [#allocation6], 4096   ;;  %p4578_p11 = pmov %p4577_p10 }
  0xa2   : > { %p4579_p1 = pmov %p4577_p10 }
  0xa3   : > { %3929 = vsyncadd (%p4578_p11), [#allocation6], 4294963200 }
  0xa4   : > { %3931 = dma.done.wait (%p4579_p1), [#allocation9], 8192   ;;  %p4580_p2 = pmov %p4579_p1 }
  0xa5   : > { %v3965_v0 = vmov 0   ;;  %v3966_v1 = vmov 0.0   ;;  %v3585_v2 = vld [vmem:[#allocation5 + $0x4] ss:$12 sps:$4 sm:$0xff]   ;;  %v3587_v3 = vld [vmem:[#allocation5] ss:$12 sps:$4 sm:$0xff]   ;;  %v558_v27 = vlaneseq }
  0xa6   : > { %3933 = vsyncadd (%p4580_p2), [#allocation9], 4294959104  ;;  %739 = vmatprep.mubr.bf16.mxu0 %v3965_v0  ;;  %3260 = vmatprep.subr.bf16.mxu1 %v3966_v1  ;;  %v3588_v4 = vld [vmem:[#allocation5 + $0x1c] ss:$12 sps:$4 sm:$0xff]   ;;  %v3590_v5 = vld [vmem:[#allocation5 + $0x18] ss:$12 sps:$4 sm:$0xff]  }
  0xa7   : > { %707 = vmatprep.subr.bf16.mxu0 %v3585_v2  ;;  %v3591_v6 = vld [vmem:[#allocation5 + $0x34] ss:$12 sps:$4 sm:$0xff]   ;;  %v3593_v7 = vld [vmem:[#allocation5 + $0x30] ss:$12 sps:$4 sm:$0xff]   ;;  %v3594_v8 = vld [vmem:[#allocation5 + $0x4c] ss:$12 sps:$4 sm:$0xff]  }
  0xa8   : > { %708 = vmatpush1.bf16.msra.mxu0 %v3587_v3  ;;  %v3596_v9 = vld [vmem:[#allocation5 + $0x48] ss:$12 sps:$4 sm:$0xff]   ;;  %v3597_v11 = vld [vmem:[#allocation5 + $0x64] ss:$12 sps:$4 sm:$0xff]   ;;  %v3611_v12 = vld [vmem:[#allocation5 + $0x20] ss:$12 sps:$4 sm:$0xff]  }
  0xa9   : > { %709 = vmatprep.subr.bf16.mxu0 %v3588_v4  ;;  %v3610_v10 = vld [vmem:[#allocation5 + $0x8] ss:$12 sps:$4 sm:$0xff]   ;;  %v3599_v13 = vld [vmem:[#allocation5 + $0x60] ss:$12 sps:$4 sm:$0xff]   ;;  %v3602_v15 = vld [vmem:[#allocation5 + $0x78] ss:$12 sps:$4 sm:$0xff]  }
  0xaa   : > { %3261 = vmatpush3.bf16.msra.mxu1 %v3610_v10  ;;  %v3600_v14 = vld [vmem:[#allocation5 + $0x7c] ss:$12 sps:$4 sm:$0xff]   ;;  %v3612_v16 = vld [vmem:[#allocation5 + $0x38] ss:$12 sps:$4 sm:$0xff]   ;;  %v3603_v17 = vld [vmem:[#allocation5 + $0x94] ss:$12 sps:$4 sm:$0xff]  }
  0xab   : > { %3262 = vmatprep.subr.bf16.mxu1 %v3966_v1  ;;  %v3613_v18 = vld [vmem:[#allocation5 + $0x50] ss:$12 sps:$4 sm:$0xff]   ;;  %v3606_v20 = vld [vmem:[#allocation5 + $0xac] ss:$12 sps:$4 sm:$0xff]   ;;  %v3614_v21 = vld [vmem:[#allocation5 + $0x68] ss:$12 sps:$4 sm:$0xff]  }
  0xac   : > { %710 = vmatpush1.bf16.msra.mxu0 %v3590_v5  ;;  %v3605_v19 = vld [vmem:[#allocation5 + $0x90] ss:$12 sps:$4 sm:$0xff]   ;;  %v3608_v22 = vld [vmem:[#allocation5 + $0xa8] ss:$12 sps:$4 sm:$0xff]   ;;  %v3615_v24 = vld [vmem:[#allocation5 + $0x80] ss:$12 sps:$4 sm:$0xff]  }
  0xad   : > { %711 = vmatprep.subr.bf16.mxu0 %v3591_v6  ;;  %v520_v23 = vld [vmem:[%s4258_s12] sm:$0xff]   ;;  %vm3967_vm0 = vmmov 0   ;;  %v4290_v28 = vshrl.u32 %v558_v27, 7  ;;  %vm875_vm1 = vcmask 261120   ;;  %s3968_s7 = smov 64   ;;  %s3969_s8 = smov 96  }
  0xae   : > { %3263 = vmatpush3.bf16.msra.mxu1 %v3611_v12  ;;  %v3616_v25 = vld [vmem:[#allocation5 + $0x98] ss:$12 sps:$4 sm:$0xff]   ;;  %v3617_v26 = vld [vmem:[#allocation5 + $0xb0] ss:$12 sps:$4 sm:$0xff]   ;;  %3276 = vmatprep.mubr.msk.bf16.mxu1 %vm3967_vm0, %v3966_v1  ;;  %s3970_s21 = smov 32   ;;  %vm1326_vm2 = vcmask 1043456  }
  0xaf   : > { %3264 = vmatprep.subr.bf16.mxu1 %v3966_v1  ;;  %v564_v29 = vsub.s32 1, %v4290_v28  ;;  %v556_v30 = vld [vmem:[%s4541_s2] sm:$0x7]  ;;  %v560_v31 = vsub.s32 0, %v4290_v28  ;;  %v568_v50 = vsub.s32 2, %v4290_v28  ;;  %vm1252_vm3 = vcmask 64512  }
  0xb0   : > { %712 = vmatpush1.bf16.msra.mxu0 %v3593_v7  ;;  %s4582_s19 = sld [smem:[#allocation19_spill]]  ;;  %s4583_s15 = sld [smem:[#allocation20_spill]] }
  0xb1   : > { %713 = vmatprep.subr.bf16.mxu0 %v3594_v8  ;;  %v565_v32 = vrot.slane %v556_v30, %v564_v29  ;;  %v561_v33 = vrot.slane %v556_v30, %v560_v31  ;;  %v569_v55 = vrot.slane %v556_v30, %v568_v50  ;;  %s3145_s18 = sshll.u32 %s4064_s29, 7  ;;  %s516_s23 = scalar_lea.vmem [#allocation11], %s3006_s22 }
  0xb2   : > { %3265 = vmatpush3.bf16.msra.mxu1 %v3612_v16  ;;  %s2871_s1 = scalar_lea.sflag [#allocation4], %s4252_s13  ;;  %s3971_s29 = smov [#allocation11]  }
  0xb3   : > { %3266 = vmatprep.subr.bf16.mxu1 %v3966_v1  ;;  %s3882_s22 = sshll.u32 %s3971_s29, 4  ;;  %s3883_s22 = int_to_ptr.vmem [resolvable:$false] %s3882_s22 }
  0xb4   : > { %714 = vmatpush1.bf16.msra.mxu0 %v3596_v9  ;;  %s3884_s30 = scalar_lea.vmem %s3883_s22, 256 }
  0xb5   : > { %715 = vmatprep.subr.bf16.mxu0 %v3597_v11 }
  0xb6   : > { %3267 = vmatpush3.bf16.msra.mxu1 %v3613_v18 }
  0xb7   : > { %3268 = vmatprep.subr.bf16.mxu1 %v3966_v1 }
  0xb8   : > { %716 = vmatpush1.bf16.msra.mxu0 %v3599_v13 }
  0xb9   : > { %717 = vmatprep.subr.bf16.mxu0 %v3600_v14 }
  0xba   : > { %3269 = vmatpush3.bf16.msra.mxu1 %v3614_v21 }
  0xbb   : > { %3270 = vmatprep.subr.bf16.mxu1 %v3966_v1 }
  0xbc   : > { %718 = vmatpush1.bf16.msra.mxu0 %v3602_v15 }
  0xbd   : > { %719 = vmatprep.subr.bf16.mxu0 %v3603_v17 }
  0xbe   : > { %3271 = vmatpush3.bf16.msra.mxu1 %v3615_v24 }
  0xbf   : > { %3272 = vmatprep.subr.bf16.mxu1 %v3966_v1 }
  0xc0   : > { %720 = vmatpush1.bf16.msra.mxu0 %v3605_v19 }
  0xc1   : > { %721 = vmatprep.subr.bf16.mxu0 %v3606_v20 }
  0xc2   : > { %3273 = vmatpush3.bf16.msra.mxu1 %v3616_v25 }
  0xc3   : > { %3274 = vmatprep.subr.bf16.mxu1 %v3966_v1 }
  0xc4   : > { %722 = vmatpush1.bf16.msra.mxu0 %v3608_v22 }
  0xc5   : > { %3280 = vmatprep.subr.bf16.mxu0 %v3966_v1 }
  0xc6   : > { %3275 = vmatpush3.bf16.msra.mxu1 %v3617_v26 }
  0xc7   : > { %740 = vmatmul.mubr.bf16.vlgmr.msra.gmra.mrb[0].mxu0 %v520_v23  ;;  %3286 = vmatprep.subr.bf16.mxu1 %v3966_v1 }
  0xc8   : > { %3282 = vmatprep.mubr.msk.bf16.mxu0 %vm3967_vm0, %v3966_v1 }
  0xc9   : > { %3277 = vmatmul.mubr.bf16.vlgmr.msra.gmra.mrb[0].mxu1 %v520_v23 }
  0xca   : > { %3288 = vmatprep.mubr.msk.bf16.mxu1 %vm3967_vm0, %v3966_v1 }
 0x19a   : > { %v741_v34 = vpop.f32.mrb[0].mxu0 }
 0x19b   : > { %v743_v35 = vpop.f32.mrb[1].mxu0  ;;  %v742_v38 = vadd.f32 %v741_v34, %v561_v33 }
 0x19c   : > { %v744_v36 = vadd.f32 %v743_v35, %v565_v32  ;;  %v745_v37 = vpop.f32.mrb[2].mxu0  ;;  %v784_v51 = vpop.f32.mrb[0].mxu1 }
 0x19d   : > { %v746_v39 = vadd.f32 %v745_v37, %v561_v33  ;;  %v747_v40 = vpop.f32.mrb[3].mxu0  ;;  %v811_v48 = vpack.c.bf16 %v742_v38, %v742_v38  ;;  %v3278_v52 = vpop.f32.mrb[1].mxu1  ;;  %v4316_v56 = vadd.f32 %v784_v51, %v569_v55 }
 0x19e   : > { %v748_v41 = vadd.f32 %v747_v40, %v565_v32  ;;  %v839_v42 = vpack.c.bf16 %v744_v36, %v744_v36  ;;  %v787_v53 = vpop.f32.mrb[2].mxu1 }
 0x19f   : > { %v3555_v43 = vpack.i.bf16 %v746_v39, %v742_v38  ;;  %v812_v49 = vpack.c.bf16 %v746_v39, %v746_v39  ;;  %v3279_v54 = vpop.f32.mrb[3].mxu1  ;;  %v4318_v57 = vadd.f32 %v787_v53, %v569_v55  ;;  %v867_v33 = vpack.c.bf16 %v4316_v56, %v4316_v56 }
 0x1a0   : > { %v880_v44 = vsel %vm875_vm1, %v839_v42, 0  ;;  %v3550_v45 = vpack.i.bf16 %v748_v41, %v744_v36  ;;  %v840_v46 = vpack.c.bf16 %v748_v41, %v748_v41 }
 0x1a1   : > { %3281 = vmatpush3.bf16.xpose.msra.mxu0 %v880_v44  ;;  %v3570_v58 = vpack.i.bf16 %v4318_v57, %v4316_v56  ;;  %v868_v35 = vpack.c.bf16 %v4318_v57, %v4318_v57  ;;  %v1328_v37 = vsel %vm1326_vm2, %v867_v33, 0 }
 0x1a2   : > { %3551 = vrot.lane.b32.xlu1 %v3550_v45, %s3968_s7  ;;  %3541 = vrot.lane.b32.xlu0 %v3550_v45, %s3969_s8  ;;  %v926_v47 = vsel %vm875_vm1, %v840_v46, 0 }
 0x1a3   : > { %3287 = vmatpush3.bf16.xpose.msra.mxu1 %v926_v47  ;;  %3292 = vmatprep.subr.bf16.mxu0 %v3966_v1  ;;  %v1374_v39 = vsel %vm1326_vm2, %v868_v35, 0 }
 0x1a4   : > { %3298 = vmatprep.subr.bf16.mxu1 %v3966_v1 }
 0x1a6   : > { %3556 = vrot.lane.b32.xlu1 %v3555_v43, %s3968_s7  ;;  %3546 = vrot.lane.b32.xlu0 %v3555_v43, %s3969_s8 }
 0x1a8   : > { %3283 = vmatmul.mubr.msk.bf16.vlgmr.msra.gmra.mrb[4].mxu0 %vm875_vm1, %v811_v48 }
 0x1a9   : > { %3294 = vmatprep.mubr.msk.bf16.mxu0 %vm3967_vm0, %v3966_v1 }
 0x1aa   : > { %3289 = vmatmul.mubr.msk.bf16.vlgmr.msra.gmra.mrb[4].mxu1 %vm875_vm1, %v812_v49  ;;  %3566 = vrot.lane.b32.xlu1 %v3555_v43, %s3970_s21 }
 0x1ab   : > { %3561 = vrot.lane.b32.xlu0 %v3550_v45, %s3970_s21  ;;  %3300 = vmatprep.mubr.msk.bf16.mxu1 %vm3967_vm0, %v3966_v1 }
 0x1ae   : > { %3576 = vrot.lane.b32.xlu1 %v3570_v58, %s3968_s7 }
 0x1af   : > { %3571 = vrot.lane.b32.xlu0 %v3570_v58, %s3969_s8  ;;  %s4581_s8 = sld [smem:[#allocation21_spill]] }
 0x1b3   : > { %3581 = vrot.lane.b32.xlu0 %v3570_v58, %s3970_s21 }
 0x214   : > { %v3542_v59 = vpop.permute.xlu0 %3541  ;;  %v3552_v62 = vpop.permute.xlu1 %3551 }
 0x215   : > { %v3544_v60 = vunpack.i.h.bf16 %v3542_v59  ;;  %v3543_v61 = vunpack.i.l.bf16 %v3542_v59  ;;  %v3553_v4 = vunpack.i.l.bf16 %v3552_v62  ;;  %v3554_v7 = vunpack.i.h.bf16 %v3552_v62 }
 0x217   : > { %v842_v63 = vpack.c.bf16 %v3544_v60, %v3544_v60  ;;  %v841_v2 = vpack.c.bf16 %v3543_v61, %v3543_v61  ;;  %v843_v10 = vpack.c.bf16 %v3553_v4, %v3553_v4  ;;  %v844_v11 = vpack.c.bf16 %v3554_v7, %v3554_v7 }
 0x218   : > { %v3547_v3 = vpop.permute.xlu0 %3546  ;;  %v3557_v14 = vpop.permute.xlu1 %3556 }
 0x219   : > { %v972_v5 = vsel %vm875_vm1, %v841_v2, 0  ;;  %v1018_v6 = vsel %vm875_vm1, %v842_v63, 0  ;;  %v3548_v8 = vunpack.i.l.bf16 %v3547_v3  ;;  %v3549_v9 = vunpack.i.h.bf16 %v3547_v3 }
 0x21a   : > { %3293 = vmatpush3.bf16.xpose.msra.mxu0 %v972_v5  ;;  %3299 = vmatpush3.bf16.xpose.msra.mxu1 %v1018_v6  ;;  %v1064_v17 = vsel %vm875_vm1, %v843_v10, 0  ;;  %v1110_v19 = vsel %vm875_vm1, %v844_v11, 0  ;;  %v3558_v20 = vunpack.i.l.bf16 %v3557_v14  ;;  %v3559_v21 = vunpack.i.h.bf16 %v3557_v14 }
 0x21b   : > { %3304 = vmatprep.subr.bf16.mxu0 %v3966_v1  ;;  %3310 = vmatprep.subr.bf16.mxu1 %v3966_v1  ;;  %v813_v13 = vpack.c.bf16 %v3548_v8, %v3548_v8  ;;  %v814_v15 = vpack.c.bf16 %v3549_v9, %v3549_v9 }
 0x21c   : > { %v815_v24 = vpack.c.bf16 %v3558_v20, %v3558_v20  ;;  %v816_v25 = vpack.c.bf16 %v3559_v21, %v3559_v21  ;;  %v3567_v26 = vpop.permute.xlu1 %3566 }
 0x21d   : > { %v3562_v12 = vpop.permute.xlu0 %3561  ;;  %v3568_v32 = vunpack.i.l.bf16 %v3567_v26  ;;  %v3569_v34 = vunpack.i.h.bf16 %v3567_v26 }
 0x21e   : > { %v3563_v16 = vunpack.i.l.bf16 %v3562_v12  ;;  %v3564_v18 = vunpack.i.h.bf16 %v3562_v12 }
 0x21f   : > { %v817_v36 = vpack.c.bf16 %v3568_v32, %v3568_v32  ;;  %v818_v38 = vpack.c.bf16 %v3569_v34, %v3569_v34 }
 0x220   : > { %v845_v22 = vpack.c.bf16 %v3563_v16, %v3563_v16  ;;  %v846_v23 = vpack.c.bf16 %v3564_v18, %v3564_v18 }
 0x221   : > { %3295 = vmatmul.mubr.msk.bf16.vlgmr.msra.gmra.mrb[8].mxu0 %vm875_vm1, %v813_v13  ;;  %3301 = vmatmul.mubr.msk.bf16.vlgmr.msra.gmra.mrb[8].mxu1 %vm875_vm1, %v814_v15 }
 0x222   : > { %3305 = vmatpush3.bf16.xpose.msra.mxu0 %v1064_v17  ;;  %3311 = vmatpush3.bf16.xpose.msra.mxu1 %v1110_v19  ;;  %v1156_v27 = vsel %vm875_vm1, %v845_v22, 0  ;;  %v1202_v30 = vsel %vm875_vm1, %v846_v23, 0 }
 0x223   : > { %3306 = vmatprep.mubr.msk.bf16.mxu0 %vm3967_vm0, %v3966_v1  ;;  %3312 = vmatprep.mubr.msk.bf16.mxu1 %vm3967_vm0, %v3966_v1 }
 0x224   : > { %3316 = vmatprep.subr.bf16.mxu0 %v3966_v1  ;;  %3322 = vmatprep.subr.bf16.mxu1 %v3966_v1 }
 0x229   : > { %3307 = vmatmul.mubr.msk.bf16.vlgmr.msra.gmra.mrb[12].mxu0 %vm875_vm1, %v815_v24  ;;  %3313 = vmatmul.mubr.msk.bf16.vlgmr.msra.gmra.mrb[12].mxu1 %vm875_vm1, %v816_v25 }
 0x22a   : > { %3317 = vmatpush3.bf16.xpose.msra.mxu0 %v1156_v27  ;;  %3323 = vmatpush3.bf16.xpose.msra.mxu1 %v1202_v30 }
 0x22b   : > { %3318 = vmatprep.mubr.msk.bf16.mxu0 %vm3967_vm0, %v3966_v1  ;;  %3324 = vmatprep.mubr.msk.bf16.mxu1 %vm3967_vm0, %v3966_v1 }
 0x22c   : > { %3328 = vmatprep.subr.bf16.mxu0 %v3966_v1  ;;  %3334 = vmatprep.subr.bf16.mxu1 %v3966_v1 }
 0x231   : > { %3319 = vmatmul.mubr.msk.bf16.vlgmr.msra.gmra.mrb[16].mxu0 %vm875_vm1, %v817_v36  ;;  %3325 = vmatmul.mubr.msk.bf16.vlgmr.msra.gmra.mrb[16].mxu1 %vm875_vm1, %v818_v38 }
 0x232   : > { %3329 = vmatpush3.bf16.msra.mxu0 %v1328_v37  ;;  %3335 = vmatpush3.bf16.msra.mxu1 %v1374_v39 }
 0x233   : > { %3330 = vmatprep.mubr.msk.bf16.mxu0 %vm3967_vm0, %v3966_v1  ;;  %3336 = vmatprep.mubr.msk.bf16.mxu1 %vm3967_vm0, %v3966_v1 }
 0x234   : > { %3340 = vmatprep.subr.bf16.mxu0 %v3966_v1  ;;  %3346 = vmatprep.subr.bf16.mxu1 %v3966_v1 }
 0x27b   : > { %v916_v40 = vpop.f32.mrb[4].mxu0 }
 0x27c   : > { %v3284_v41 = vpop.f32.mrb[5].mxu0  ;;  %v1244_v57 = vmul.f32 0.17677669, %v916_v40 }
 0x27d   : > { %v919_v42 = vpop.f32.mrb[6].mxu0  ;;  %v962_v43 = vpop.f32.mrb[4].mxu1 }
 0x27e   : > { %v3285_v44 = vpop.f32.mrb[7].mxu0  ;;  %v3290_v45 = vpop.f32.mrb[5].mxu1  ;;  %v1245_v58 = vmul.f32 0.17677669, %v962_v43  ;;  %v1253_v4 = vsel %vm1252_vm3, %v1244_v57, -inf }
 0x27f   : > { %v965_v46 = vpop.f32.mrb[6].mxu1 }
 0x280   : > { %v3291_v47 = vpop.f32.mrb[7].mxu1  ;;  %v1260_v8 = vsel %vm1252_vm3, %v1245_v58, -inf }
 0x2f4   : > { %v1008_v48 = vpop.f32.mrb[8].mxu0  ;;  %v1054_v49 = vpop.f32.mrb[8].mxu1 }
 0x2f5   : > { %v3296_v51 = vpop.f32.mrb[9].mxu0  ;;  %v3302_v52 = vpop.f32.mrb[9].mxu1  ;;  %v1246_v13 = vmul.f32 0.17677669, %v1008_v48  ;;  %v1247_v14 = vmul.f32 0.17677669, %v1054_v49 }
 0x2f6   : > { %v1011_v53 = vpop.f32.mrb[10].mxu0  ;;  %v1057_v54 = vpop.f32.mrb[10].mxu1 }
 0x2f7   : > { %v3297_v55 = vpop.f32.mrb[11].mxu0  ;;  %v3303_v56 = vpop.f32.mrb[11].mxu1  ;;  %v1254_v22 = vsel %vm1252_vm3, %v1246_v13, -inf  ;;  %v1261_v26 = vsel %vm1252_vm3, %v1247_v14, -inf }
 0x2fc   : > { %v1100_v59 = vpop.f32.mrb[12].mxu0  ;;  %v1146_v61 = vpop.f32.mrb[12].mxu1 }
 0x2fd   : > { %v1248_v60 = vmul.f32 0.17677669, %v1100_v59  ;;  %v3308_v62 = vpop.f32.mrb[13].mxu0  ;;  %v1249_v63 = vmul.f32 0.17677669, %v1146_v61  ;;  %v3314_v2 = vpop.f32.mrb[13].mxu1 }
 0x2fe   : > { %v1103_v3 = vpop.f32.mrb[14].mxu0  ;;  %v1149_v6 = vpop.f32.mrb[14].mxu1 }
 0x2ff   : > { %v1255_v5 = vsel %vm1252_vm3, %v1248_v60, -inf  ;;  %v3309_v7 = vpop.f32.mrb[15].mxu0  ;;  %v1262_v10 = vsel %vm1252_vm3, %v1249_v63, -inf  ;;  %v3315_v11 = vpop.f32.mrb[15].mxu1 }
 0x300   : > { %v1256_v9 = vmax.f32 %v1253_v4, %v1255_v5  ;;  %v1263_v12 = vmax.f32 %v1260_v8, %v1262_v10 }
 0x304   : > { %v1192_v15 = vpop.f32.mrb[16].mxu0  ;;  %v1238_v17 = vpop.f32.mrb[16].mxu1 }
 0x305   : > { %v1250_v16 = vmul.f32 0.17677669, %v1192_v15  ;;  %v3320_v18 = vpop.f32.mrb[17].mxu0  ;;  %v1251_v19 = vmul.f32 0.17677669, %v1238_v17  ;;  %v3326_v20 = vpop.f32.mrb[17].mxu1 }
 0x306   : > { %v1195_v21 = vpop.f32.mrb[18].mxu0  ;;  %v1241_v24 = vpop.f32.mrb[18].mxu1 }
 0x307   : > { %v1257_v23 = vsel %vm1252_vm3, %v1250_v16, -inf  ;;  %v3321_v25 = vpop.f32.mrb[19].mxu0  ;;  %v1264_v30 = vsel %vm1252_vm3, %v1251_v19, -inf  ;;  %v3327_v32 = vpop.f32.mrb[19].mxu1 }
 0x308   : > { %v1258_v27 = vmax.f32 %v1254_v22, %v1257_v23  ;;  %v1265_v33 = vmax.f32 %v1261_v26, %v1264_v30  ;;  %v3577_v18 = vpop.permute.xlu1 %3576 }
 0x30a   : > { %v1259_v34 = vmax.f32 %v1256_v9, %v1258_v27  ;;  %v1266_v35 = vmax.f32 %v1263_v12, %v1265_v33  ;;  %v3578_v27 = vunpack.i.l.bf16 %v3577_v18 }
 0x30c   : > { %v1267_v36 = vsub.f32 %v1244_v57, %v1259_v34  ;;  %v1269_v37 = vsub.f32 %v1246_v13, %v1259_v34  ;;  %v1271_v38 = vsub.f32 %v1248_v60, %v1259_v34  ;;  %v1273_v39 = vsub.f32 %v1250_v16, %v1259_v34  ;;  %v3572_v13 = vpop.permute.xlu0 %3571 }
 0x30d   : > { %v1268_v40 = vsub.f32 %v1245_v58, %v1266_v35  ;;  %v1270_v41 = vsub.f32 %v1247_v14, %v1266_v35  ;;  %v1272_v42 = vsub.f32 %v1249_v63, %v1266_v35  ;;  %v1274_v43 = vsub.f32 %v1251_v19, %v1266_v35 }
 0x30e   : > { %v1275_v44 = vmul.f32 1.442695, %v1267_v36  ;;  %v1279_v45 = vmul.f32 1.442695, %v1269_v37  ;;  %v1283_v46 = vmul.f32 1.442695, %v1271_v38  ;;  %v3573_v14 = vunpack.i.l.bf16 %v3572_v13 }
 0x30f   : > { %v1287_v47 = vmul.f32 1.442695, %v1273_v39  ;;  %v1277_v48 = vmul.f32 1.442695, %v1268_v40  ;;  %v1281_v49 = vmul.f32 1.442695, %v1270_v41  ;;  %v3574_v15 = vunpack.i.h.bf16 %v3572_v13 }
 0x310   : > { %3707 = vpow2.f32 %v1275_v44  ;;  %v1285_v51 = vmul.f32 1.442695, %v1272_v42  ;;  %v1289_v52 = vmul.f32 1.442695, %v1274_v43  ;;  %v869_v16 = vpack.c.bf16 %v3573_v14, %v3573_v14  ;;  %v3582_v39 = vpop.permute.xlu0 %3581 }
 0x311   : > { %3709 = vpow2.f32 %v1279_v45  ;;  %v870_v23 = vpack.c.bf16 %v3574_v15, %v3574_v15  ;;  %v3579_v37 = vunpack.i.h.bf16 %v3577_v18  ;;  %v871_v38 = vpack.c.bf16 %v3578_v27, %v3578_v27  ;;  %v3623_v15 = vld [vmem:[#allocation7 + $0x28] sm:$0xff]   ;;  %v3625_v27 = vld [vmem:[#allocation7 + $0x38] sm:$0xff]  }
 0x312   : > { %3711 = vpow2.f32 %v1283_v46  ;;  %v1420_v25 = vsel %vm1326_vm2, %v869_v16, 0  ;;  %v3583_v42 = vunpack.i.l.bf16 %v3582_v39  ;;  %v3584_v45 = vunpack.i.h.bf16 %v3582_v39 }
 0x313   : > { %3713 = vpow2.f32 %v1287_v47  ;;  %v1466_v36 = vsel %vm1326_vm2, %v870_v23, 0  ;;  %v872_v41 = vpack.c.bf16 %v3579_v37, %v3579_v37  ;;  %v1512_v43 = vsel %vm1326_vm2, %v871_v38, 0 }
 0x314   : > { %3715 = vpow2.f32 %v1277_v48  ;;  %v873_v46 = vpack.c.bf16 %v3583_v42, %v3583_v42 }
 0x315   : > { %3717 = vpow2.f32 %v1281_v49  ;;  %v1558_v47 = vsel %vm1326_vm2, %v872_v41, 0  ;;  %v874_v49 = vpack.c.bf16 %v3584_v45, %v3584_v45 }
 0x316   : > { %3719 = vpow2.f32 %v1285_v51  ;;  %v1604_v51 = vsel %vm1326_vm2, %v873_v46, 0 }
 0x317   : > { %3721 = vpow2.f32 %v1289_v52 }
 0x31a   : > { %v3708_v53 = vpop.eup %3707 }
 0x31b   : > { %v3710_v54 = vpop.eup %3709  ;;  %v1291_v55 = vsel %vm1252_vm3, %v3708_v53, 0.0 }
 0x31c   : > { %v3712_v56 = vpop.eup %3711  ;;  %v1292_v57 = vsel %vm1252_vm3, %v3710_v54, 0.0 }
 0x31d   : > { %v3714_v58 = vpop.eup %3713  ;;  %v1293_v59 = vadd.f32 %v1292_v57, %v1291_v55  ;;  %v1294_v61 = vsel %vm1252_vm3, %v3712_v56, 0.0  ;;  %v3619_v57 = vld [vmem:[#allocation7 + $0x8] sm:$0xff]  }
 0x31e   : > { %v3716_v60 = vpop.eup %3715  ;;  %v1296_v4 = vsel %vm1252_vm3, %v3714_v58, 0.0 }
 0x31f   : > { %v3718_v62 = vpop.eup %3717  ;;  %v1295_v63 = vadd.f32 %v1294_v61, %v1293_v59  ;;  %v1298_v2 = vsel %vm1252_vm3, %v3716_v60, 0.0  ;;  %v3620_v59 = vld [vmem:[#allocation7 + $0x10] sm:$0xff]  }
 0x320   : > { %v3720_v3 = vpop.eup %3719  ;;  %v1299_v5 = vsel %vm1252_vm3, %v3718_v62, 0.0 }
 0x321   : > { %v3722_v6 = vpop.eup %3721  ;;  %v1297_v7 = vadd.f32 %v1296_v4, %v1295_v63  ;;  %v1300_v8 = vadd.f32 %v1299_v5, %v1298_v2  ;;  %v1301_v9 = vsel %vm1252_vm3, %v3720_v3, 0.0 }
 0x322   : > { %v1303_v11 = vsel %vm1252_vm3, %v3722_v6, 0.0 }
 0x323   : > { %3723 = vrcp.f32 %v1297_v7  ;;  %v1302_v10 = vadd.f32 %v1301_v9, %v1300_v8  ;;  %v3622_v9 = vld [vmem:[#allocation7 + $0x20] sm:$0xff]  }
 0x325   : > { %v1304_v12 = vadd.f32 %v1303_v11, %v1302_v10 }
 0x327   : > { %3725 = vrcp.f32 %v1304_v12 }
 0x32d   : > { %v3724_v17 = vpop.eup %3723 }
 0x32e   : > { %v1307_v19 = vmul.f32 %v3724_v17, %v3708_v53  ;;  %v1309_v20 = vmul.f32 %v3724_v17, %v3710_v54  ;;  %v1311_v21 = vmul.f32 %v3724_v17, %v3712_v56  ;;  %v1313_v22 = vmul.f32 %v3724_v17, %v3714_v58  ;;  %v3618_v54 = vld [vmem:[#allocation7] sm:$0xff]  }
 0x32f   : > { %v1650_v53 = vsel %vm1326_vm2, %v874_v49, 0 }
 0x330   : > { %v1315_v24 = vpack.c.bf16 %v1307_v19, %v1307_v19  ;;  %v1317_v40 = vpack.c.bf16 %v1309_v20, %v1309_v20  ;;  %v1319_v48 = vpack.c.bf16 %v1311_v21, %v1311_v21  ;;  %v1321_v55 = vpack.c.bf16 %v1313_v22, %v1313_v22  ;;  %v3624_v21 = vld [vmem:[#allocation7 + $0x30] sm:$0xff]  }
 0x331   : > { %v3726_v26 = vpop.eup %3725 }
 0x332   : > { %3331 = vmatmul.mubr.msk.bf16.vlgmr.msra.gmra.mrb[20].mxu0 %vm1252_vm3, %v1315_v24  ;;  %v1308_v30 = vmul.f32 %v3726_v26, %v3716_v60  ;;  %v1310_v32 = vmul.f32 %v3726_v26, %v3718_v62  ;;  %v1312_v33 = vmul.f32 %v3726_v26, %v3720_v3  ;;  %v1314_v34 = vmul.f32 %v3726_v26, %v3722_v6  ;;  %v3621_v3 = vld [vmem:[#allocation7 + $0x18] sm:$0xff]  }
 0x333   : > { %3341 = vmatpush3.bf16.msra.mxu0 %v1420_v25  ;;  %3342 = vmatprep.mubr.msk.bf16.mxu0 %vm3967_vm0, %v3966_v1 }
 0x334   : > { %v1316_v35 = vpack.c.bf16 %v1308_v30, %v1308_v30  ;;  %3352 = vmatprep.subr.bf16.mxu0 %v3966_v1  ;;  %v1318_v44 = vpack.c.bf16 %v1310_v32, %v1310_v32  ;;  %v1320_v52 = vpack.c.bf16 %v1312_v33, %v1312_v33  ;;  %v1322_v56 = vpack.c.bf16 %v1314_v34, %v1314_v34 }
 0x336   : > { %3337 = vmatmul.mubr.msk.bf16.vlgmr.msra.gmra.mrb[20].mxu1 %vm1252_vm3, %v1316_v35 }
 0x337   : > { %3347 = vmatpush3.bf16.msra.mxu1 %v1466_v36  ;;  %3348 = vmatprep.mubr.msk.bf16.mxu1 %vm3967_vm0, %v3966_v1 }
 0x338   : > { %3358 = vmatprep.subr.bf16.mxu1 %v3966_v1 }
 0x33a   : > { %3343 = vmatmul.mubr.msk.bf16.vlgmr.msra.gmra.mrb[24].mxu0 %vm1252_vm3, %v1317_v40 }
 0x33b   : > { %3353 = vmatpush3.bf16.msra.mxu0 %v1512_v43  ;;  %3354 = vmatprep.mubr.msk.bf16.mxu0 %vm3967_vm0, %v3966_v1 }
 0x33c   : > { %3364 = vmatprep.subr.bf16.mxu0 %v3966_v1 }
 0x33e   : > { %3349 = vmatmul.mubr.msk.bf16.vlgmr.msra.gmra.mrb[24].mxu1 %vm1252_vm3, %v1318_v44 }
 0x33f   : > { %3359 = vmatpush3.bf16.msra.mxu1 %v1558_v47  ;;  %3360 = vmatprep.mubr.msk.bf16.mxu1 %vm3967_vm0, %v3966_v1 }
 0x340   : > { %3370 = vmatprep.subr.bf16.mxu1 %v3966_v1 }
 0x342   : > { %3355 = vmatmul.mubr.msk.bf16.vlgmr.msra.gmra.mrb[28].mxu0 %vm1252_vm3, %v1319_v48 }
 0x343   : > { %3365 = vmatpush3.bf16.msra.mxu0 %v1604_v51  ;;  %3366 = vmatprep.mubr.msk.bf16.mxu0 %vm3967_vm0, %v3966_v1 }
 0x344   : > { %3376 = vmatprep.subr.bf16.mxu0 %v3966_v1 }
 0x346   : > { %3361 = vmatmul.mubr.msk.bf16.vlgmr.msra.gmra.mrb[28].mxu1 %vm1252_vm3, %v1320_v52 }
 0x347   : > { %3371 = vmatpush3.bf16.msra.mxu1 %v1650_v53  ;;  %3372 = vmatprep.mubr.msk.bf16.mxu1 %vm3967_vm0, %v3966_v1 }
 0x348   : > { %3384 = vmatprep.subr.bf16.mxu1 %v3966_v1 }
 0x34a   : > { %3367 = vmatmul.mubr.msk.bf16.vlgmr.msra.gmra.mrb[32].mxu0 %vm1252_vm3, %v1321_v55 }
 0x34b   : > { %3377 = vmatpush3.bf16.msra.mxu0 %v3618_v54  ;;  %3380 = vmatprep.mubr.msk.bf16.mxu0 %vm3967_vm0, %v3966_v1 }
 0x34c   : > { %3378 = vmatprep.subr.bf16.mxu0 %v3966_v1 }
 0x34e   : > { %3373 = vmatmul.mubr.msk.bf16.vlgmr.msra.gmra.mrb[32].mxu1 %vm1252_vm3, %v1322_v56 }
 0x34f   : > { %3385 = vmatpush3.bf16.msra.mxu1 %v3618_v54  ;;  %3388 = vmatprep.mubr.msk.bf16.mxu1 %vm3967_vm0, %v3966_v1 }
 0x350   : > { %3386 = vmatprep.subr.bf16.mxu1 %v3966_v1  ;;  %3379 = vmatpush3.bf16.msra.mxu0 %v3619_v57 }
 0x351   : > { %3392 = vmatprep.subr.bf16.mxu0 %v3966_v1 }
 0x353   : > { %3387 = vmatpush3.bf16.msra.mxu1 %v3619_v57 }
 0x354   : > { %3400 = vmatprep.subr.bf16.mxu1 %v3966_v1 }
 0x405   : > { %v1364_v58 = vpop.f32.mrb[20].mxu0 }
 0x406   : > { %v1708_v60 = vpack.c.bf16 %v1364_v58, %v1364_v58  ;;  %v3332_v61 = vpop.f32.mrb[21].mxu0 }
 0x407   : > { %v1367_v62 = vpop.f32.mrb[22].mxu0 }
 0x408   : > { %v3333_v63 = vpop.f32.mrb[23].mxu0  ;;  %3381 = vmatmul.mubr.msk.bf16.vlgmr.msra.gmra.mrb[36].mxu0 %vm875_vm1, %v1708_v60 }
 0x409   : > { %v1410_v2 = vpop.f32.mrb[20].mxu1  ;;  %3393 = vmatpush3.bf16.msra.mxu0 %v3620_v59  ;;  %3396 = vmatprep.mubr.msk.bf16.mxu0 %vm3967_vm0, %v3966_v1 }
 0x40a   : > { %v1709_v4 = vpack.c.bf16 %v1410_v2, %v1410_v2  ;;  %v3338_v5 = vpop.f32.mrb[21].mxu1  ;;  %3394 = vmatprep.subr.bf16.mxu0 %v3966_v1 }
 0x40b   : > { %v1413_v6 = vpop.f32.mrb[22].mxu1 }
 0x40c   : > { %v3339_v7 = vpop.f32.mrb[23].mxu1  ;;  %3389 = vmatmul.mubr.msk.bf16.vlgmr.msra.gmra.mrb[36].mxu1 %vm875_vm1, %v1709_v4 }
 0x40d   : > { %3401 = vmatpush3.bf16.msra.mxu1 %v3620_v59  ;;  %v1456_v8 = vpop.f32.mrb[24].mxu0  ;;  %3395 = vmatpush3.bf16.msra.mxu0 %v3621_v3 }
 0x40e   : > { %3402 = vmatprep.subr.bf16.mxu1 %v3966_v1  ;;  %v1710_v10 = vpack.c.bf16 %v1456_v8, %v1456_v8  ;;  %v3344_v11 = vpop.f32.mrb[25].mxu0  ;;  %3404 = vmatprep.mubr.msk.bf16.mxu1 %vm3967_vm0, %v3966_v1 }
 0x40f   : > { %v1459_v12 = vpop.f32.mrb[26].mxu0  ;;  %3408 = vmatprep.subr.bf16.mxu0 %v3966_v1  ;;  %v3069_v11 = vld [vmem:[%s4543_s4] ss:$0 sm:$0xff] }
 0x410   : > { %v3345_v13 = vpop.f32.mrb[27].mxu0  ;;  %3397 = vmatmul.mubr.msk.bf16.vlgmr.msra.gmra.mrb[40].mxu0 %vm875_vm1, %v1710_v10 }
 0x411   : > { %v1502_v14 = vpop.f32.mrb[24].mxu1  ;;  %3403 = vmatpush3.bf16.msra.mxu1 %v3621_v3  ;;  %3409 = vmatpush3.bf16.msra.mxu0 %v3622_v9 }
 0x412   : > { %v1711_v16 = vpack.c.bf16 %v1502_v14, %v1502_v14  ;;  %v3350_v17 = vpop.f32.mrb[25].mxu1  ;;  %3416 = vmatprep.subr.bf16.mxu1 %v3966_v1  ;;  %3410 = vmatprep.subr.bf16.mxu0 %v3966_v1  ;;  %v3735_v14 = vld [vmem:[%s4258_s12] sm:$0xff]   ;;  %s2884_s12 = sshll.u32 %s516_s23, 4  ;;  %s4494_s12 = int_to_ptr.vmem [resolvable:$true] %s2884_s12 }
 0x413   : > { %v1505_v18 = vpop.f32.mrb[26].mxu1  ;;  %3412 = vmatprep.mubr.msk.bf16.mxu0 %vm3967_vm0, %v3966_v1  ;;  %p3885_p3 = scmp.lt.s32.totalorder %s4494_s12, %s3883_s22 }
 0x414   : > { %v3351_v19 = vpop.f32.mrb[27].mxu1  ;;  %3405 = vmatmul.mubr.msk.bf16.vlgmr.msra.gmra.mrb[40].mxu1 %vm875_vm1, %v1711_v16 }
 0x415   : > { %3417 = vmatpush3.bf16.msra.mxu1 %v3622_v9  ;;  %v1548_v20 = vpop.f32.mrb[28].mxu0  ;;  %3411 = vmatpush3.bf16.msra.mxu0 %v3623_v15 }
 0x416   : > { %3418 = vmatprep.subr.bf16.mxu1 %v3966_v1  ;;  %v1712_v22 = vpack.c.bf16 %v1548_v20, %v1548_v20  ;;  %v3356_v23 = vpop.f32.mrb[29].mxu0  ;;  %3420 = vmatprep.mubr.msk.bf16.mxu1 %vm3967_vm0, %v3966_v1 }
 0x417   : > { %v1551_v24 = vpop.f32.mrb[30].mxu0  ;;  %3424 = vmatprep.subr.bf16.mxu0 %v3966_v1 }
 0x418   : > { %v3357_v25 = vpop.f32.mrb[31].mxu0  ;;  %3413 = vmatmul.mubr.msk.bf16.vlgmr.msra.gmra.mrb[44].mxu0 %vm875_vm1, %v1712_v22  ;;  %v523_v22 = vunpack.c.h.bf16 %v3735_v14 }
 0x419   : > { %v1594_v26 = vpop.f32.mrb[28].mxu1  ;;  %3419 = vmatpush3.bf16.msra.mxu1 %v3623_v15  ;;  %3425 = vmatpush3.bf16.msra.mxu0 %v3624_v21  ;;  %v522_v15 = vunpack.c.l.bf16 %v3735_v14 }
 0x41a   : > { %v1713_v30 = vpack.c.bf16 %v1594_v26, %v1594_v26  ;;  %v3362_v32 = vpop.f32.mrb[29].mxu1  ;;  %3432 = vmatprep.subr.bf16.mxu1 %v3966_v1  ;;  %3426 = vmatprep.subr.bf16.mxu0 %v3966_v1 }
 0x41b   : > { %v1597_v33 = vpop.f32.mrb[30].mxu1  ;;  %3428 = vmatprep.mubr.msk.bf16.mxu0 %vm3967_vm0, %v3966_v1  ;;  %v3628_v32 = vld [vmem:[#allocation8 + $0x4] ss:$16 sps:$4 sm:$0xff]  }
 0x41c   : > { %v3363_v34 = vpop.f32.mrb[31].mxu1  ;;  %3421 = vmatmul.mubr.msk.bf16.vlgmr.msra.gmra.mrb[44].mxu1 %vm875_vm1, %v1713_v30  ;;  %v3626_v30 = vld [vmem:[#allocation8] ss:$16 sps:$4 sm:$0xff]   ;;  %v3629_v33 = vld [vmem:[#allocation8 + $0x8] ss:$16 sps:$4 sm:$0xff]  }
 0x41d   : > { %3433 = vmatpush3.bf16.msra.mxu1 %v3624_v21  ;;  %v1640_v35 = vpop.f32.mrb[32].mxu0  ;;  %3427 = vmatpush3.bf16.msra.mxu0 %v3625_v27  ;;  %v3631_v34 = vld [vmem:[#allocation8 + $0xc] ss:$16 sps:$4 sm:$0xff]  }
 0x41e   : > { %3434 = vmatprep.subr.bf16.mxu1 %v3966_v1  ;;  %v1714_v36 = vpack.c.bf16 %v1640_v35, %v1640_v35  ;;  %v3368_v37 = vpop.f32.mrb[33].mxu0  ;;  %3436 = vmatprep.mubr.msk.bf16.mxu1 %vm3967_vm0, %v3966_v1  ;;  %v3634_v35 = vld [vmem:[#allocation8 + $0x24] ss:$16 sps:$4 sm:$0xff]  }
 0x41f   : > { %v1643_v38 = vpop.f32.mrb[34].mxu0  ;;  %2381 = vmatprep.subr.bf16.mxu0 %v3628_v32  ;;  %v3632_v37 = vld [vmem:[#allocation8 + $0x20] ss:$16 sps:$4 sm:$0xff]   ;;  %v3678_v32 = vld [vmem:[#allocation10 + $0x48] sm:$0xff]  }
 0x420   : > { %v3369_v39 = vpop.f32.mrb[35].mxu0  ;;  %3429 = vmatmul.mubr.msk.bf16.vlgmr.msra.gmra.mrb[48].mxu0 %vm875_vm1, %v1714_v36  ;;  %v3637_v36 = vld [vmem:[#allocation8 + $0x2c] ss:$16 sps:$4 sm:$0xff]   ;;  %v3635_v38 = vld [vmem:[#allocation8 + $0x28] ss:$16 sps:$4 sm:$0xff]  }
 0x421   : > { %v1686_v40 = vpop.f32.mrb[32].mxu1  ;;  %3435 = vmatpush3.bf16.msra.mxu1 %v3625_v27  ;;  %2413 = vmatprep.mubr.bf16.mxu0 %v3965_v0  ;;  %v3640_v39 = vld [vmem:[#allocation8 + $0x44] ss:$16 sps:$4 sm:$0xff]  }
 0x422   : > { %v1715_v41 = vpack.c.bf16 %v1686_v40, %v1686_v40  ;;  %v3374_v42 = vpop.f32.mrb[33].mxu1  ;;  %2424 = vmatprep.subr.bf16.mxu1 %v3631_v34  ;;  %2382 = vmatpush1.bf16.msra.mxu0 %v3626_v30  ;;  %v3643_v40 = vld [vmem:[#allocation8 + $0x4c] ss:$16 sps:$4 sm:$0xff]  }
 0x423   : > { %v1689_v43 = vpop.f32.mrb[34].mxu1  ;;  %2383 = vmatprep.subr.bf16.mxu0 %v3634_v35  ;;  %v3641_v42 = vld [vmem:[#allocation8 + $0x48] ss:$16 sps:$4 sm:$0xff]  }
 0x424   : > { %v3375_v44 = vpop.f32.mrb[35].mxu1  ;;  %3437 = vmatmul.mubr.msk.bf16.vlgmr.msra.gmra.mrb[48].mxu1 %vm875_vm1, %v1715_v41  ;;  %v3638_v41 = vld [vmem:[#allocation8 + $0x40] ss:$16 sps:$4 sm:$0xff]   ;;  %v3680_v34 = vld [vmem:[#allocation10 + $0x8] sm:$0xff]  }
 0x425   : > { %2456 = vmatprep.mubr.bf16.mxu1 %v3965_v0  ;;  %2425 = vmatpush1.bf16.msra.mxu1 %v3629_v33  ;;  %v3679_v33 = vld [vmem:[#allocation10 + $0xc8] sm:$0xff]  }
 0x426   : > { %2426 = vmatprep.subr.bf16.mxu1 %v3637_v36  ;;  %2384 = vmatpush1.bf16.msra.mxu0 %v3632_v37  ;;  %v3681_v35 = vld [vmem:[#allocation10 + $0x88] sm:$0xff]   ;;  %v3682_v36 = vld [vmem:[#allocation10 + $0x50] sm:$0xff]  }
 0x427   : > { %2385 = vmatprep.subr.bf16.mxu0 %v3640_v39  ;;  %v3683_v37 = vld [vmem:[#allocation10 + $0xd0] sm:$0xff]  }
 0x428   : > { %v3685_v39 = vld [vmem:[#allocation10 + $0x90] sm:$0xff]  }
 0x429   : > { %2427 = vmatpush1.bf16.msra.mxu1 %v3635_v38  ;;  %v3684_v38 = vld [vmem:[#allocation10 + $0x10] sm:$0xff]  }
 0x42a   : > { %2428 = vmatprep.subr.bf16.mxu1 %v3643_v40  ;;  %2386 = vmatpush1.bf16.msra.mxu0 %v3638_v41  ;;  %v3686_v40 = vld [vmem:[#allocation10 + $0x58] sm:$0xff]  }
 0x42b   : > { %v3687_v41 = vld [vmem:[#allocation10 + $0xd8] sm:$0xff]  }
 0x42d   : > { %2429 = vmatpush1.bf16.msra.mxu1 %v3641_v42  ;;  %v3688_v42 = vld [vmem:[#allocation10 + $0x18] sm:$0xff]  }
 0x4db   : > { %v1765_v45 = vpop.f32.mrb[36].mxu0 }
 0x4dc   : > { %v3382_v46 = vpop.f32.mrb[37].mxu0 }
 0x4dd   : > { %v1768_v47 = vpop.f32.mrb[38].mxu0 }
 0x4de   : > { %v3383_v1 = vpop.f32.mrb[39].mxu0 }
 0x4df   : > { %v1808_v48 = vpop.f32.mrb[36].mxu1 }
 0x4e0   : > { %v3390_v49 = vpop.f32.mrb[37].mxu1 }
 0x4e1   : > { %v1811_v51 = vpop.f32.mrb[38].mxu1 }
 0x4e2   : > { %v3391_v52 = vpop.f32.mrb[39].mxu1  ;;  %v3646_v51 = vld [vmem:[#allocation8 + $0x64] ss:$16 sps:$4 sm:$0xff]  }
 0x4e3   : > { %v1863_v53 = vpop.f32.mrb[40].mxu0  ;;  %v3649_v52 = vld [vmem:[#allocation8 + $0x6c] ss:$16 sps:$4 sm:$0xff]   ;;  %2387 = vmatprep.subr.bf16.mxu0 %v3646_v51 }
 0x4e4   : > { %v2108_v54 = vadd.f32 %v1863_v53, %v1765_v45  ;;  %v3398_v55 = vpop.f32.mrb[41].mxu0  ;;  %v3644_v53 = vld [vmem:[#allocation8 + $0x60] ss:$16 sps:$4 sm:$0xff]   ;;  %2430 = vmatprep.subr.bf16.mxu1 %v3649_v52  ;;  %v3697_v51 = vld [vmem:[#allocation10 + $0xa8] sm:$0xff]  }
 0x4e5   : > { %v1866_v56 = vpop.f32.mrb[42].mxu0  ;;  %2388 = vmatpush1.bf16.msra.mxu0 %v3644_v53  ;;  %v3652_v55 = vld [vmem:[#allocation8 + $0x84] ss:$16 sps:$4 sm:$0xff]  }
 0x4e6   : > { %v3399_v57 = vpop.f32.mrb[43].mxu0  ;;  %v3655_v56 = vld [vmem:[#allocation8 + $0x8c] ss:$16 sps:$4 sm:$0xff]   ;;  %2389 = vmatprep.subr.bf16.mxu0 %v3652_v55  ;;  %v3698_v52 = vld [vmem:[#allocation10 + $0x70] sm:$0xff]  }
 0x4e7   : > { %v1906_v58 = vpop.f32.mrb[40].mxu1  ;;  %v3650_v57 = vld [vmem:[#allocation8 + $0x80] ss:$16 sps:$4 sm:$0xff]  }
 0x4e8   : > { %v2111_v59 = vadd.f32 %v1906_v58, %v1808_v48  ;;  %v3406_v60 = vpop.f32.mrb[41].mxu1  ;;  %v3653_v58 = vld [vmem:[#allocation8 + $0x88] ss:$16 sps:$4 sm:$0xff]   ;;  %v3699_v53 = vld [vmem:[#allocation10 + $0xf0] sm:$0xff]  }
 0x4e9   : > { %v1909_v61 = vpop.f32.mrb[42].mxu1  ;;  %2390 = vmatpush1.bf16.msra.mxu0 %v3650_v57  ;;  %v3661_v60 = vld [vmem:[#allocation8 + $0xac] ss:$16 sps:$4 sm:$0xff]   ;;  %v3701_v55 = vld [vmem:[#allocation10 + $0xb0] sm:$0xff]  }
 0x4ea   : > { %v3407_v62 = vpop.f32.mrb[43].mxu1  ;;  %v3656_v61 = vld [vmem:[#allocation8 + $0xa0] ss:$16 sps:$4 sm:$0xff]   ;;  %v3703_v57 = vld [vmem:[#allocation10 + $0xf8] sm:$0xff]  }
 0x4eb   : > { %v1961_v0 = vpop.f32.mrb[44].mxu0  ;;  %v3659_v62 = vld [vmem:[#allocation8 + $0xa8] ss:$16 sps:$4 sm:$0xff]  }
 0x4ec   : > { %v2109_v63 = vadd.f32 %v2108_v54, %v1961_v0  ;;  %v3414_v2 = vpop.f32.mrb[45].mxu0  ;;  %v3647_v54 = vld [vmem:[#allocation8 + $0x68] ss:$16 sps:$4 sm:$0xff]   ;;  %v3662_v0 = vld [vmem:[#allocation8 + $0xc0] ss:$16 sps:$4 sm:$0xff]  }
 0x4ed   : > { %v1964_v3 = vpop.f32.mrb[46].mxu0  ;;  %2431 = vmatpush1.bf16.msra.mxu1 %v3647_v54  ;;  %v3665_v2 = vld [vmem:[#allocation8 + $0xc8] ss:$16 sps:$4 sm:$0xff]   ;;  %v3700_v54 = vld [vmem:[#allocation10 + $0x30] sm:$0xff]  }
 0x4ee   : > { %v3415_v4 = vpop.f32.mrb[47].mxu0  ;;  %2432 = vmatprep.subr.bf16.mxu1 %v3655_v56  ;;  %v3667_v3 = vld [vmem:[#allocation8 + $0xcc] ss:$16 sps:$4 sm:$0xff]  }
 0x4ef   : > { %v2004_v5 = vpop.f32.mrb[44].mxu1  ;;  %v3670_v4 = vld [vmem:[#allocation8 + $0xe4] ss:$16 sps:$4 sm:$0xff]   ;;  %v3702_v56 = vld [vmem:[#allocation10 + $0x78] sm:$0xff]  }
 0x4f0   : > { %v2112_v6 = vadd.f32 %v2111_v59, %v2004_v5  ;;  %v3422_v7 = vpop.f32.mrb[45].mxu1  ;;  %v3658_v59 = vld [vmem:[#allocation8 + $0xa4] ss:$16 sps:$4 sm:$0xff]   ;;  %v3673_v5 = vld [vmem:[#allocation8 + $0xec] ss:$16 sps:$4 sm:$0xff]  }
 0x4f1   : > { %v2007_v8 = vpop.f32.mrb[46].mxu1  ;;  %2433 = vmatpush1.bf16.msra.mxu1 %v3653_v58  ;;  %2391 = vmatprep.subr.bf16.mxu0 %v3658_v59  ;;  %v3671_v7 = vld [vmem:[#allocation8 + $0xe8] ss:$16 sps:$4 sm:$0xff]  }
 0x4f2   : > { %v3423_v9 = vpop.f32.mrb[47].mxu1  ;;  %2434 = vmatprep.subr.bf16.mxu1 %v3661_v60  ;;  %2392 = vmatpush1.bf16.msra.mxu0 %v3656_v61  ;;  %v3674_v8 = vld [vmem:[#allocation10 + $0x40] sm:$0xff]   ;;  %v3704_v58 = vld [vmem:[#allocation10 + $0x38] sm:$0xff]   ;;  %v2199_v60 = vld [vmem:[%s4549_s10] sm:$0xf]  ;;  %v2215_v61 = vsub.s32 3, %v4290_v28 }
 0x4f3   : > { %v2059_v10 = vpop.f32.mrb[48].mxu0  ;;  %v3675_v9 = vld [vmem:[#allocation10 + $0xc0] sm:$0xff]   ;;  %v3705_v59 = vld [vmem:[#allocation10 + $0xb8] sm:$0xff]  }
 0x4f4   : > { %v2110_v12 = vadd.f32 %v2109_v63, %v2059_v10  ;;  %v3430_v13 = vpop.f32.mrb[49].mxu0  ;;  %v3664_v63 = vld [vmem:[#allocation8 + $0xc4] ss:$16 sps:$4 sm:$0xff]  }
 0x4f5   : > { %v2062_v16 = vpop.f32.mrb[50].mxu0  ;;  %2435 = vmatpush1.bf16.msra.mxu1 %v3659_v62  ;;  %2393 = vmatprep.subr.bf16.mxu0 %v3664_v63  ;;  %v2204_v62 = vrot.slane %v2199_v60, %v560_v31  ;;  %v2208_v63 = vrot.slane %v2199_v60, %v564_v29 }
 0x4f6   : > { %v2121_v17 = vadd.f32 %v3069_v11, %v2110_v12  ;;  %v3431_v18 = vpop.f32.mrb[51].mxu0  ;;  %2436 = vmatprep.subr.bf16.mxu1 %v3667_v3  ;;  %2394 = vmatpush1.bf16.msra.mxu0 %v3662_v0  ;;  %v2212_v0 = vrot.slane %v2199_v60, %v568_v50 }
 0x4f7   : > { %v2102_v19 = vpop.f32.mrb[48].mxu1  ;;  %2395 = vmatprep.subr.bf16.mxu0 %v3670_v4 }
 0x4f8   : > { %v2113_v20 = vadd.f32 %v2112_v6, %v2102_v19  ;;  %v3438_v21 = vpop.f32.mrb[49].mxu1  ;;  %v2123_v23 = vadd.f32 %v2121_v17, %v522_v15  ;;  %v3668_v6 = vld [vmem:[#allocation8 + $0xe0] ss:$16 sps:$4 sm:$0xff]  }
 0x4f9   : > { %v2105_v24 = vpop.f32.mrb[50].mxu1  ;;  %2437 = vmatpush1.bf16.msra.mxu1 %v3665_v2  ;;  %v3070_v17 = vld [vmem:[%s4544_s5] ss:$0 sm:$0xff]  ;;  %v2216_v2 = vrot.slane %v2199_v60, %v2215_v61 }
 0x4fa   : > { %v2122_v25 = vadd.f32 %v3069_v11, %v2113_v20  ;;  %v3439_v26 = vpop.f32.mrb[51].mxu1  ;;  %2127 = vadd.xlane.f32.xlu1 %v2123_v23  ;;  %2438 = vmatprep.subr.bf16.mxu1 %v3673_v5  ;;  %v3071_v21 = vld [vmem:[%s4545_s6] ss:$0 sm:$0xff] }
 0x4fb   : > { %2396 = vmatpush1.bf16.msra.mxu0 %v3668_v6  ;;  %v3676_v26 = vld [vmem:[#allocation10] sm:$0xff]  }
 0x4fc   : > { %v2124_v27 = vadd.f32 %v2122_v25, %v523_v22  ;;  %3216 = vmatprep.subr.bf16.mxu0 %v3674_v8 }
 0x4fd   : > { %2439 = vmatpush1.bf16.msra.mxu1 %v3671_v7 }
 0x4fe   : > { %2129 = vadd.xlane.f32.xlu0 %v2124_v27  ;;  %3238 = vmatprep.subr.bf16.mxu1 %v3675_v9 }
 0x587   : > { %v2128_v43 = vpop.xlane.xlu1 %2127 }
 0x588   : > { %v2132_v44 = vmul.f32 0.0078125, %v2128_v43  ;;  %v3689_v43 = vld [vmem:[#allocation10 + $0x98] sm:$0xff]  }
 0x58a   : > { %v2134_v45 = vsub.f32 %v2123_v23, %v2132_v44  ;;  %v3690_v44 = vld [vmem:[#allocation10 + $0x60] sm:$0xff]  }
 0x58b   : > { %v2130_v46 = vpop.xlane.xlu0 %2129 }
 0x58c   : > { %v2133_v47 = vmul.f32 0.0078125, %v2130_v46  ;;  %v2136_v1 = vmul.f32 %v2134_v45, %v2134_v45  ;;  %v3692_v46 = vld [vmem:[#allocation10 + $0x20] sm:$0xff]  }
 0x58e   : > { %v2135_v48 = vsub.f32 %v2124_v27, %v2133_v47  ;;  %2138 = vadd.xlane.f32.xlu0 %v2136_v1  ;;  %v3677_v27 = vld [vmem:[#allocation10 + $0x80] sm:$0xff]   ;;  %v3694_v1 = vld [vmem:[#allocation10 + $0x68] sm:$0xff]  }
 0x58f   : > { %v3693_v47 = vld [vmem:[#allocation10 + $0xa0] sm:$0xff]  }
 0x590   : > { %v2137_v49 = vmul.f32 %v2135_v48, %v2135_v48 }
 0x592   : > { %2140 = vadd.xlane.f32.xlu1 %v2137_v49  ;;  %v3696_v49 = vld [vmem:[#allocation10 + $0x28] sm:$0xff]  }
 0x61b   : > { %v2139_v10 = vpop.xlane.xlu0 %2138 }
 0x61c   : > { %v2142_v11 = vmul.f32 0.0078125, %v2139_v10 }
 0x61e   : > { %v2144_v12 = vadd.f32 1e-05, %v2142_v11 }
 0x61f   : > { %v2141_v13 = vpop.xlane.xlu1 %2140 }
 0x620   : > { %3727 = vrsqrt.f32 %v2144_v12  ;;  %v2143_v14 = vmul.f32 0.0078125, %v2141_v13 }
 0x622   : > { %v2145_v15 = vadd.f32 1e-05, %v2143_v14 }
 0x624   : > { %3729 = vrsqrt.f32 %v2145_v15 }
 0x62a   : > { %v3728_v16 = vpop.eup %3727 }
 0x62b   : > { %v2148_v18 = vmul.f32 %v3728_v16, %v2134_v45  ;;  %v3691_v45 = vld [vmem:[#allocation10 + $0xe0] sm:$0xff]  }
 0x62d   : > { %v2156_v19 = vmul.f32 %v3070_v17, %v2148_v18 }
 0x62e   : > { %v3730_v20 = vpop.eup %3729 }
 0x62f   : > { %v2149_v22 = vmul.f32 %v3730_v20, %v2135_v48  ;;  %v4459_v24 = vadd.f32 %v3071_v21, %v2156_v19  ;;  %v3695_v48 = vld [vmem:[#allocation10 + $0xe8] sm:$0xff]  }
 0x631   : > { %v2157_v23 = vmul.f32 %v3070_v17, %v2149_v22 }
 0x633   : > { %v4461_v25 = vadd.f32 %v3071_v21, %v2157_v23 }
 0x635   : > { %v2166_v30 = vpack.c.bf16 %v4461_v25, %v4459_v24 }
 0x637   : > { %2414 = vmatmul.mubr.bf16.vlgmr.msra.gmra.mrb[52].mxu0 %v2166_v30  ;;  %2457 = vmatmul.mubr.bf16.vlgmr.msra.gmra.mrb[52].mxu1 %v2166_v30 }
 0x638   : > { %3217 = vmatpush3.bf16.msra.mxu0 %v3676_v26  ;;  %3239 = vmatpush3.bf16.msra.mxu1 %v3677_v27 }
 0x639   : > { %3218 = vmatprep.subr.bf16.mxu0 %v3678_v32  ;;  %3240 = vmatprep.subr.bf16.mxu1 %v3679_v33 }
 0x63c   : > { %3219 = vmatpush3.bf16.msra.mxu0 %v3680_v34  ;;  %3241 = vmatpush3.bf16.msra.mxu1 %v3681_v35  ;;  %v3104_v34 = vld [vmem:[%s4581_s8] ss:$0 sm:$0xff]  ;;  %s4584_s8 = sld [smem:[#allocation22_spill]] }
 0x63d   : > { %3220 = vmatprep.subr.bf16.mxu0 %v3682_v36  ;;  %3242 = vmatprep.subr.bf16.mxu1 %v3683_v37 }
 0x640   : > { %3221 = vmatpush3.bf16.msra.mxu0 %v3684_v38  ;;  %3243 = vmatpush3.bf16.msra.mxu1 %v3685_v39 }
 0x641   : > { %3222 = vmatprep.subr.bf16.mxu0 %v3686_v40  ;;  %3244 = vmatprep.subr.bf16.mxu1 %v3687_v41 }
 0x642   : > { %s4492_s21 = scalar_lea.hbm %s4584_s8, %s3145_s18 }
 0x644   : > { %3223 = vmatpush3.bf16.msra.mxu0 %v3688_v42  ;;  %3245 = vmatpush3.bf16.msra.mxu1 %v3689_v43 }
 0x645   : > { %3224 = vmatprep.subr.bf16.mxu0 %v3690_v44  ;;  %3246 = vmatprep.subr.bf16.mxu1 %v3691_v45 }
 0x648   : > { %3225 = vmatpush3.bf16.msra.mxu0 %v3692_v46  ;;  %3247 = vmatpush3.bf16.msra.mxu1 %v3693_v47 }
 0x649   : > { %3226 = vmatprep.subr.bf16.mxu0 %v3694_v1  ;;  %3248 = vmatprep.subr.bf16.mxu1 %v3695_v48 }
 0x64c   : > { %3227 = vmatpush3.bf16.msra.mxu0 %v3696_v49  ;;  %3249 = vmatpush3.bf16.msra.mxu1 %v3697_v51 }
 0x64d   : > { %3228 = vmatprep.subr.bf16.mxu0 %v3698_v52  ;;  %3250 = vmatprep.subr.bf16.mxu1 %v3699_v53 }
 0x650   : > { %3229 = vmatpush3.bf16.msra.mxu0 %v3700_v54  ;;  %3251 = vmatpush3.bf16.msra.mxu1 %v3701_v55 }
 0x651   : > { %3230 = vmatprep.subr.bf16.mxu0 %v3702_v56  ;;  %3252 = vmatprep.subr.bf16.mxu1 %v3703_v57 }
 0x654   : > { %3231 = vmatpush3.bf16.msra.mxu0 %v3704_v58  ;;  %3253 = vmatpush3.bf16.msra.mxu1 %v3705_v59 }
 0x70a   : > { %v2415_v3 = vpop.f32.mrb[52].mxu0  ;;  %v2458_v4 = vpop.f32.mrb[52].mxu1 }
 0x70b   : > { %v2416_v5 = vadd.f32 %v2415_v3, %v2204_v62  ;;  %v2459_v6 = vadd.f32 %v2458_v4, %v2212_v0  ;;  %v2417_v7 = vpop.f32.mrb[53].mxu0  ;;  %v2460_v8 = vpop.f32.mrb[53].mxu1 }
 0x70c   : > { %v2418_v9 = vadd.f32 %v2417_v7, %v2208_v63  ;;  %v2461_v10 = vadd.f32 %v2460_v8, %v2216_v2  ;;  %v2419_v11 = vpop.f32.mrb[54].mxu0  ;;  %v2462_v12 = vpop.f32.mrb[54].mxu1 }
 0x70d   : > { %v2420_v13 = vadd.f32 %v2419_v11, %v2204_v62  ;;  %v2463_v14 = vadd.f32 %v2462_v12, %v2212_v0  ;;  %v2421_v31 = vpop.f32.mrb[55].mxu0  ;;  %v2464_v15 = vpop.f32.mrb[55].mxu1  ;;  %v2467_v17 = vmax.f32 %v2416_v5, 0.0  ;;  %v2469_v28 = vmax.f32 %v2459_v6, 0.0  ;;  %v3138_v6 = vld [vmem:[%s4583_s15] ss:$0 sm:$0xff] }
 0x70e   : > { %v2422_v16 = vadd.f32 %v2421_v31, %v2208_v63  ;;  %v2465_v50 = vadd.f32 %v2464_v15, %v2216_v2  ;;  %v2468_v19 = vmax.f32 %v2418_v9, 0.0  ;;  %v2470_v20 = vmax.f32 %v2461_v10, 0.0  ;;  %v3137_v63 = vld [vmem:[%s4582_s19] ss:$0 sm:$0xff]  ;;  %s3878_s19 = scalar_lea.vmem %s4494_s12, 128 }
 0x70f   : > { %v2471_v29 = vmax.f32 %v2420_v13, 0.0  ;;  %v2473_v18 = vmax.f32 %v2463_v14, 0.0  ;;  %p3879_p6 = scmp.ne.s32.totalorder %s4494_s12, %s3878_s19  ;;  %p3886_p7 = scmp.lt.s32.totalorder %s3884_s30, %s3878_s19 }
 0x710   : > { %v2472_v21 = vmax.f32 %v2422_v16, 0.0  ;;  %v2474_v22 = vmax.f32 %v2465_v50, 0.0 }
 0x711   : > { %v2475_v23 = vpack.c.bf16 %v2471_v29, %v2467_v17  ;;  %v2477_v26 = vpack.c.bf16 %v2473_v18, %v2469_v28  ;;  %p3880_p8 = pnand %p3879_p6, %p4197_p4  ;;  %p3887_p9 = por %p3886_p7, %p3885_p3 }
 0x712   : > { %v2476_v27 = vpack.c.bf16 %v2472_v21, %v2468_v19  ;;  %v2478_v30 = vpack.c.bf16 %v2474_v22, %v2470_v20 }
 0x713   : > { %p3881_p13 = pneg %p3880_p8 }
 0x714   : > { %2774 = vmatprep.mubr.bf16.mxu0 %v2476_v27  ;;  %2815 = vmatprep.mubr.bf16.mxu1 %v2478_v30 }
 0x715   : > { %2775 = vmatmul.mubr.bf16.vlgmr.msra.gmra.mrb[56].mxu0 %v2475_v23  ;;  %2816 = vmatmul.mubr.bf16.vlgmr.msra.gmra.mrb[56].mxu1 %v2477_v26  ;;  %p3888_p12 = pnand %p3887_p9, %p3881_p13 }
 0x7e8   : > { %v3232_v32 = vpop.f32.mrb[56].mxu0  ;;  %v3254_v33 = vpop.f32.mrb[56].mxu1 }
 0x7e9   : > { %v3233_v35 = vpop.f32.mrb[57].mxu0  ;;  %v3255_v36 = vpop.f32.mrb[57].mxu1 }
 0x7ea   : > { %v3234_v37 = vadd.f32 %v3233_v35, %v3232_v32  ;;  %v3256_v38 = vadd.f32 %v3255_v36, %v3254_v33  ;;  %v3235_v39 = vpop.f32.mrb[58].mxu0  ;;  %v3257_v40 = vpop.f32.mrb[58].mxu1 }
 0x7eb   : > { %v3236_v41 = vpop.f32.mrb[59].mxu0  ;;  %v3258_v42 = vpop.f32.mrb[59].mxu1 }
 0x7ec   : > { %v2777_v43 = vadd.f32 %v3234_v37, %v3104_v34  ;;  %v3237_v44 = vadd.f32 %v3236_v41, %v3235_v39  ;;  %v3259_v45 = vadd.f32 %v3258_v42, %v3257_v40 }
 0x7ee   : > { %v2818_v46 = vadd.f32 %v3256_v38, %v2777_v43  ;;  %v2780_v47 = vadd.f32 %v3237_v44, %v3104_v34 }
 0x7f0   : > { %v2821_v1 = vadd.f32 %v3259_v45, %v2780_v47  ;;  %v2824_v48 = vadd.f32 %v2818_v46, %v4459_v24 }
 0x7f2   : > { %2828 = vadd.xlane.f32.xlu0 %v2824_v48  ;;  %v2825_v49 = vadd.f32 %v2821_v1, %v4461_v25 }
 0x7f4   : > { %2830 = vadd.xlane.f32.xlu1 %v2825_v49 }
 0x87f   : > { %v2829_v51 = vpop.xlane.xlu0 %2828 }
 0x880   : > { %v2832_v52 = vmul.f32 0.0078125, %v2829_v51 }
 0x881   : > { %v2831_v53 = vpop.xlane.xlu1 %2830 }
 0x882   : > { %v2834_v54 = vsub.f32 %v2824_v48, %v2832_v52  ;;  %v2833_v55 = vmul.f32 0.0078125, %v2831_v53 }
 0x884   : > { %v2835_v56 = vsub.f32 %v2825_v49, %v2833_v55  ;;  %v2836_v57 = vmul.f32 %v2834_v54, %v2834_v54 }
 0x886   : > { %2838 = vadd.xlane.f32.xlu0 %v2836_v57  ;;  %v2837_v58 = vmul.f32 %v2835_v56, %v2835_v56 }
 0x888   : > { %2840 = vadd.xlane.f32.xlu1 %v2837_v58 }
 0x913   : > { %v2839_v59 = vpop.xlane.xlu0 %2838 }
 0x914   : > { %v2842_v60 = vmul.f32 0.0078125, %v2839_v59 }
 0x915   : > { %v2841_v61 = vpop.xlane.xlu1 %2840 }
 0x916   : > { %v2844_v24 = vadd.f32 1e-05, %v2842_v60  ;;  %v2843_v62 = vmul.f32 0.0078125, %v2841_v61 }
 0x918   : > { %3731 = vrsqrt.f32 %v2844_v24  ;;  %v2845_v25 = vadd.f32 1e-05, %v2843_v62 }
 0x91a   : > { %3733 = vrsqrt.f32 %v2845_v25 }
 0x922   : > { %v3732_v0 = vpop.eup %3731 }
 0x923   : > { %v2848_v2 = vmul.f32 %v3732_v0, %v2834_v54 }
 0x924   : > { %v3734_v3 = vpop.eup %3733 }
 0x925   : > { %v2856_v4 = vmul.f32 %v3137_v63, %v2848_v2  ;;  %v2849_v5 = vmul.f32 %v3734_v3, %v2835_v56 }
 0x927   : > { %v2857_v7 = vmul.f32 %v3137_v63, %v2849_v5  ;;  %v2864_v8 = vadd.f32 %v3138_v6, %v2856_v4 }
 0x929   : > { %v2865_v9 = vadd.f32 %v3138_v6, %v2857_v7 }
 0x92b   : > { %v3149_v10 = vpack.c.bf16 %v2865_v9, %v2864_v8 }
 0x92d   : > { %3150 = vst [vmem:[%s516_s23] sm:$0xff] %v3149_v10  }
 0x92e   : > { %3891 = shalt.err (!%p3888_p12)
}
 0x92f   : > { %s3892_s20 = scalar_lea.hbm %s4492_s21, 128  ;;  %s3896_s23 = scalar_lea.hbm %s4584_s8, 512 }
 0x930   : > { %p3893_p0 = scmp.ne.s32.totalorder %s4492_s21, %s3892_s20  ;;  %p3897_p11 = scmp.lt.u32.totalorder %s4492_s21, %s4584_s8 }
 0x931   : > { %p3898_p1 = scmp.lt.u32.totalorder %s3896_s23, %s3892_s20  ;;  %p3900_p6 = scmp.lt.u32.totalorder %s3892_s20, %s4492_s21 }
 0x932   : > { %p3894_p5 = pnand %p3893_p0, %p4197_p4 }
 0x933   : > { %p3899_p2 = por %p3898_p1, %p3897_p11 }
 0x934   : > { %p3895_p10 = pneg %p3894_p5 }
 0x935   : > { %p3901_p8 = por %p3900_p6, %p3899_p2 }
 0x937   : > { %p3902_p13 = pnand %p3901_p8, %p3895_p10 }
 0x939   : > { %3905 = shalt.err (!%p3902_p13)
}
 0x93a   : > { %s3972_s19 = smov 4  }
 0x93b   : > { %3458 = dma.vmem_to_hbm [thread:$0]  (%p4197_p4), %s4494_s12, 128, %s4492_s21, %s2871_s1, %s3968_s7, %s3968_s7, %s3972_s19  }
 0x93c PF: > { %s4585_s29 = sld [smem:[#allocation16_spill]]  ;;  %s4586_s22 = sld [smem:[#allocation17_spill]] }
 0x93d   : > { %p3490_p3 = scmp.ge.s32.totalorder %s3952_s28, 2 }
 0x942   : > { %s2899_s30 = sand.u32 1, %s4585_s29   ;;  %p4587_p7 = scmp.ne.s32.totalorder %s4586_s22, 0 }
 0x943   : > { %s2900_s20 = scalar_lea.sflag [#allocation4], %s2899_s30 }
 0x944   : > { %p3478_p9 = pnand %p3490_p3, %p4587_p7 }
 0x946   : > { %3935 = dma.done.wait (!%p3478_p9), %s2900_s20, 128  }
 0x947   : > { %3937 = vsyncadd (!%p3478_p9), %s2900_s20, 4294967168  ;;  %p28_p12 = scmp.ge.s32.totalorder %s4187_s17, 6   ;;  %s4588_s25 = smov %s3944_s26 }
 0x948   : > { %s4589_s26 = smov %s3948_s27  ;;  %s4590_s27 = smov %s4203_s24 }
 0x949   : > { %s4591_s28 = smov %s4187_s17  ;;  %30 = sbr.rel (!%p28_p12) target bundleno = 13 (0xd), region = 133 }
 0x950   :  { %2905 = vsyncpa [#allocation3], 1 }
 0x951   :  { %2907 = vsyncpa [#allocation3 + $0x1], 1 }
 0x952   :  { %2908 = vsyncpa [#allocation6], 1 }
 0x953   :  { %2909 = vsyncpa [#allocation9], 1 }
 0x954   :  { %2910 = vsyncpa [#allocation4], 1 }
 0x955   :  { %2912 = vsyncpa [#allocation4 + $0x1], 1 }

</bundles_post_ra>
